<compile_context>
chip_gen: v5e
topology: v5e:2x2
jax: 0.10.0
libtpu: 0.0.40
codegen_flags: <defaults>
</compile_context>

<pallas_src>
import jax
import jax.numpy as jnp
import numpy as np
from jax import lax
from jax.experimental import pallas as pl
from jax.experimental.pallas import tpu as pltpu


# ----------------------------------------------------------------------------
# Kernel: one batch tile, full sentence/word recurrence inside (unrolled).
# ----------------------------------------------------------------------------
def _hier_decoder_kernel(
    enc_ref, cap_emb_ref,
    Wea_ref, bea_ref, bda_ref, wfa_ref, bfa_ref,
    Wcf_ref, bcf_ref,
    Wctx_ref, bctx_ref,
    Wgs_ref, bgs_ref,
    Whead_ref, btop_ref, bstp_ref,
    wst_ref, bst_ref,
    Wih_we_ref, Wih_wt_ref, Whh_w_ref, bw_ref,
    ts_out_ref, hword_out_ref,
):
    BT, P, Enc = enc_ref.shape
    S, Wn = cap_emb_ref.shape[0], cap_emb_ref.shape[1]
    H = Wcf_ref.shape[1]
    E = btop_ref.shape[1]
    A = bda_ref.shape[1]
    f32 = jnp.float32
    dot = lambda a, b: jnp.dot(a, b, preferred_element_type=f32)

    # Weights loaded once (t-invariant).
    bda = bda_ref[...]
    wfa, bfa = wfa_ref[...], bfa_ref[...]
    Wcf, bcf = Wcf_ref[...], bcf_ref[...]
    Wctx, bctx = Wctx_ref[...], bctx_ref[...]
    Wgs, bgs = Wgs_ref[...], bgs_ref[...]
    Whead, btop, bstp = Whead_ref[...], btop_ref[...], bstp_ref[...]
    wst_row, bst = wst_ref[...], bst_ref[...]
    Wih_we, Wih_wt = Wih_we_ref[...], Wih_wt_ref[...]
    Whh_w, bw = Whh_w_ref[...], bw_ref[...]

    # ---------------- hoisted, t-invariant compute (once per call) -----------
    enc = enc_ref[...]                                                 # (BT,P,Enc)
    att1 = (dot(enc.reshape(BT * P, Enc), Wea_ref[...]) + bea_ref[...]
            ).reshape(BT, P, A)                                        # (BT,P,A)

    zeros_h = jnp.zeros((BT, H), f32)

    h_prev = zeros_h                    # init_sent_hidden_state: zeros
    c_prev = zeros_h
    att2_pre = jnp.zeros((BT, A), f32)  # = h_prev @ Wda  (zero at t=0)

    ts_list = []      # per-step (BT, E+1) [topic|stop] slabs
    hw_list = []      # per-step (BT, Wn*H) word-hidden slabs

    for t in range(S):
        # ---- batched visual soft attention ----
        att = jax.nn.relu(att1 + (att2_pre + bda)[:, None, :])        # (BT,P,A)
        e = jnp.sum(att * wfa, axis=-1) + bfa                          # (BT,P)
        e = e - jnp.max(e, axis=-1, keepdims=True)
        a = jnp.exp(e)
        alpha = a * pl.reciprocal(jnp.sum(a, axis=-1, keepdims=True), approx=False)
        v = jnp.sum(enc * alpha[:, :, None], axis=1)                   # (BT,Enc)

        # ---- context vector: relu([cfc|h_prev] @ [Wcw;Wht] + bcw + bht) ----
        cfc = dot(v, Wcf) + bcf                                        # (BT,H)
        ctx = jax.nn.relu(dot(jnp.concatenate([cfc, h_prev], axis=-1), Wctx) + bctx)

        # ---- sentence LSTMCell, gates fused: [ctx|h_prev] @ [Wih_s;Whh_s] ----
        gates = dot(jnp.concatenate([ctx, h_prev], axis=-1), Wgs) + bgs  # (BT,4H)
        i_g = jax.nn.sigmoid(gates[:, 0 * H:1 * H])
        f_g = jax.nn.sigmoid(gates[:, 1 * H:2 * H])
        g_g = jnp.tanh(gates[:, 2 * H:3 * H])
        o_g = jax.nn.sigmoid(gates[:, 3 * H:4 * H])
        c_new = f_g * c_prev + i_g * g_g
        h_new = o_g * jnp.tanh(c_new)

        # ---- fused heads: [h_prev|h_new] @ [[0,Wsh1,0],[Wtop,Wsh,Wda]] ----
        # (zero blocks are intentional wasted MXU work to keep one push)
        heads = dot(jnp.concatenate([h_prev, h_new], axis=-1), Whead)  # (BT,E+H+A)
        topic = jax.nn.relu(heads[:, :E] + btop)                       # (BT,E)
        stop_pre = jnp.tanh(heads[:, E:E + H] + bstp)                  # (BT,H)
        att2_next = heads[:, E + H:]                                   # (BT,A) for t+1
        # stop head: N=1 matmul replaced by VPU mul + lane reduce
        stop = jax.nn.sigmoid(
            jnp.sum(stop_pre * wst_row, axis=-1, keepdims=True) + bst)  # (BT,1)
        ts_list.append(jnp.concatenate([topic, stop], axis=-1))        # (BT,E+1)

        # ---- word LSTM: only Whh_w is on the recurrent critical path ----
        pre_topic = dot(topic, Wih_wt) + bw                            # (BT,4H)
        h_w = zeros_h
        c_w = zeros_h
        hws = []
        for w in range(Wn):
            # dense (BT,E) tile read; carry-independent -> scheduler overlaps it
            g_const = dot(cap_emb_ref[t, w], Wih_we) + pre_topic
            gw = g_const + dot(h_w, Whh_w)
            i_w = jax.nn.sigmoid(gw[:, 0 * H:1 * H])
            f_w = jax.nn.sigmoid(gw[:, 1 * H:2 * H])
            g_w = jnp.tanh(gw[:, 2 * H:3 * H])
            o_w = jax.nn.sigmoid(gw[:, 3 * H:4 * H])
            c_w = f_w * c_w + i_w * g_w
            h_w = o_w * jnp.tanh(c_w)
            hws.append(h_w)
        hw_list.append(jnp.concatenate(hws, axis=-1))                  # (BT,Wn*H)

        h_prev, c_prev, att2_pre = h_new, c_new, att2_next

    # ---- single lane-dense stores for the whole call ----
    ts_out_ref[...] = jnp.concatenate(ts_list, axis=-1)                # (BT,S*(E+1))
    hword_out_ref[...] = jnp.concatenate(hw_list, axis=-1)             # (BT,S*Wn*H)


# ----------------------------------------------------------------------------
# Parameters (deterministic init, stored already transposed to (in, out))
# ----------------------------------------------------------------------------
def init_params(key, *, encoder_dim, hidden_dim, attention_dim, embed_dim, vocab_size):
    keys = iter(jax.random.split(key, 64))
    u = lambda shape: jax.random.uniform(next(keys), shape, jnp.float32, -0.1, 0.1)
    p = {}
    # visual attention (encoder_att, decoder_att, full_att)
    p['Wea'] = u((encoder_dim, attention_dim)); p['bea'] = u((1, attention_dim))
    p['Wda'] = u((hidden_dim, attention_dim));  p['bda'] = u((1, attention_dim))
    p['wfa'] = u((1, attention_dim));           p['bfa'] = u((1, 1))
    # context_vector_fc / _W / _W_h_t
    p['Wcf'] = u((encoder_dim, hidden_dim));    p['bcf'] = u((1, hidden_dim))
    p['Wcw'] = u((hidden_dim, hidden_dim));     p['bcw'] = u((1, hidden_dim))
    p['Wht'] = u((hidden_dim, hidden_dim));     p['bht'] = u((1, hidden_dim))
    # sentence_decoder LSTMCell(hidden, hidden)
    p['Wih_s'] = u((hidden_dim, 4 * hidden_dim)); p['bih_s'] = u((1, 4 * hidden_dim))
    p['Whh_s'] = u((hidden_dim, 4 * hidden_dim)); p['bhh_s'] = u((1, 4 * hidden_dim))
    # topic_vector, stop heads
    p['Wtop'] = u((hidden_dim, embed_dim));     p['btop'] = u((1, embed_dim))
    p['Wsh1'] = u((hidden_dim, hidden_dim));    p['bsh1'] = u((1, hidden_dim))
    p['Wsh'] = u((hidden_dim, hidden_dim));     p['bsh'] = u((1, hidden_dim))
    p['Wst'] = u((hidden_dim, 1));              p['bst'] = u((1, 1))
    # word_decoder LSTMCell(2*embed, hidden): W_ih split into [emb-half, topic-half]
    p['Wih_we'] = u((embed_dim, 4 * hidden_dim))
    p['Wih_wt'] = u((embed_dim, 4 * hidden_dim))
    p['Whh_w'] = u((hidden_dim, 4 * hidden_dim))
    p['bih_w'] = u((1, 4 * hidden_dim)); p['bhh_w'] = u((1, 4 * hidden_dim))
    # embedding table
    p['embedding'] = u((vocab_size, embed_dim))
    return p


# ----------------------------------------------------------------------------
# Wrapper
# ----------------------------------------------------------------------------
def hierarchical_decoder_forward(params, encoder_out, captions, *, batch_tile=None):
    """encoder_out: (B, P, encoder_dim) f32; captions: (B, S, Wn) int32."""
    B, P, Enc = encoder_out.shape
    _, S, Wn = captions.shape
    H = params['Wcw'].shape[0]
    E = params['Wtop'].shape[1]
    A = params['Wda'].shape[1]

    # Default: whole batch in one tile (best on 1-TC v5e/v6e — the kernel is
    # recurrence/latency-bound).  On v7x pass batch_tile=B//2 so the two
    # TensorCores split the "parallel" batch-tile grid axis.
    BT = B if batch_tile is None else batch_tile
    assert B % BT == 0, "batch must be divisible by batch_tile"
    n_tiles = B // BT

    # Embedding lookup is glue (gather) outside the kernel; laid out
    # (S, Wn, B, E) so each per-(t,w) in-kernel read is a dense (BT,E) tile.
    cap_emb = jnp.take(params['embedding'], captions, axis=0)          # (B,S,Wn,E)
    cap_emb = jnp.transpose(cap_emb, (1, 2, 0, 3))                      # (S,Wn,B,E)

    # ---- one-time weight fusion (hoisted out of all loops) ------------------
    Wctx = jnp.concatenate([params['Wcw'], params['Wht']], axis=0)      # (2H,H)
    bctx = params['bcw'] + params['bht']
    Wgs = jnp.concatenate([params['Wih_s'], params['Whh_s']], axis=0)   # (2H,4H)
    bgs = params['bih_s'] + params['bhh_s']
    # heads = [h_prev|h_new] @ [[0,Wsh1,0],[Wtop,Wsh,Wda]]  -> (BT, E+H+A)
    zEH = jnp.zeros((H, E), jnp.float32)
    zHA = jnp.zeros((H, A), jnp.float32)
    Whead = jnp.concatenate([
        jnp.concatenate([zEH, params['Wsh1'], zHA], axis=1),
        jnp.concatenate([params['Wtop'], params['Wsh'], params['Wda']], axis=1),
    ], axis=0)                                                          # (2H,E+H+A)
    bstp = params['bsh1'] + params['bsh']
    wst_row = params['Wst'].T                                           # (1,H)
    bw = params['bih_w'] + params['bhh_w']

    weights = [
        params['Wea'], params['bea'], params['bda'],
        params['wfa'], params['bfa'],
        params['Wcf'], params['bcf'],
        Wctx, bctx, Wgs, bgs,
        Whead, params['btop'], bstp,
        wst_row, params['bst'],
        params['Wih_we'], params['Wih_wt'], params['Whh_w'], bw,
    ]

    def _w_spec(w):
        nd = w.ndim
        return pl.BlockSpec(w.shape, lambda i, _nd=nd: (0,) * _nd)

    in_specs = [
        pl.BlockSpec((BT, P, Enc), lambda i: (i, 0, 0)),
        pl.BlockSpec((S, Wn, BT, E), lambda i: (0, 0, i, 0)),
    ] + [_w_spec(w) for w in weights]

    # Lane-dense packed outputs (one store each per kernel call).
    out_shape = (
        jax.ShapeDtypeStruct((B, S * (E + 1)), jnp.float32),   # [topic|stop] per step
        jax.ShapeDtypeStruct((B, S * Wn * H), jnp.float32),    # word hidden states
    )
    out_specs = (
        pl.BlockSpec((BT, S * (E + 1)), lambda i: (i, 0)),
        pl.BlockSpec((BT, S * Wn * H), lambda i: (i, 0)),
    )

    grid_spec = pltpu.PrefetchScalarGridSpec(
        num_scalar_prefetch=0,
        grid=(n_tiles,),
        in_specs=in_specs,
        out_specs=out_specs,
    )

    ts, hw = pl.pallas_call(
        _hier_decoder_kernel,
        grid_spec=grid_spec,
        out_shape=out_shape,
        compiler_params=pltpu.CompilerParams(
            dimension_semantics=("parallel",),
            # Right-size per generation once BT is scaled up
            # (~100 MiB v5e/v6e, <=56 MiB v7x); 32 MiB is plenty at toy shapes.
            vmem_limit_bytes=32 * 1024 * 1024),
    )(encoder_out, cap_emb, *weights)

    ts = ts.reshape(B, S, E + 1)
    topics = ts[..., :E]
    stops = ts[..., E:E + 1]
    h_words = hw.reshape(B, S, Wn, H)
    return topics, stops, h_words


# ----------------------------------------------------------------------------
# Pure-JAX reference (same math, no Pallas)
# ----------------------------------------------------------------------------
def reference_forward(params, encoder_out, captions):
    B, P, Enc = encoder_out.shape
    _, S, Wn = captions.shape
    H = params['Wcw'].shape[0]
    dot = lambda a, b: jnp.dot(a, b, preferred_element_type=jnp.float32)
    cap_emb = jnp.take(params['embedding'], captions, axis=0)  # (B,S,Wn,E)
    h = jnp.zeros((B, H), jnp.float32)
    c = jnp.zeros((B, H), jnp.float32)
    topics, stops, hwords = [], [], []
    for t in range(S):
        att1 = jnp.einsum('bpe,ea->bpa', encoder_out, params['Wea'],
                          preferred_element_type=jnp.float32) + params['bea']
        att2 = dot(h, params['Wda']) + params['bda']
        att = jax.nn.relu(att1 + att2[:, None, :])
        e = jnp.sum(att * params['wfa'][0], axis=-1) + params['bfa'][0, 0]
        alpha = jax.nn.softmax(e, axis=-1)
        v = jnp.sum(encoder_out * alpha[:, :, None], axis=1)
        cfc = dot(v, params['Wcf']) + params['bcf']
        ctx = jax.nn.relu(dot(cfc, params['Wcw']) + params['bcw']
                          + dot(h, params['Wht']) + params['bht'])
        gates = (dot(ctx, params['Wih_s']) + params['bih_s']
                 + dot(h, params['Whh_s']) + params['bhh_s'])
        i_g = jax.nn.sigmoid(gates[:, :H]); f_g = jax.nn.sigmoid(gates[:, H:2 * H])
        g_g = jnp.tanh(gates[:, 2 * H:3 * H]); o_g = jax.nn.sigmoid(gates[:, 3 * H:])
        c_new = f_g * c + i_g * g_g
        h_new = o_g * jnp.tanh(c_new)
        topic = jax.nn.relu(dot(h_new, params['Wtop']) + params['btop'])
        stop_pre = jnp.tanh(dot(h, params['Wsh1']) + params['bsh1']
                            + dot(h_new, params['Wsh']) + params['bsh'])
        stop = jax.nn.sigmoid(dot(stop_pre, params['Wst']) + params['bst'])
        topics.append(topic); stops.append(stop)
        h, c = h_new, c_new
        h_w = jnp.zeros((B, H), jnp.float32)
        c_w = jnp.zeros((B, H), jnp.float32)
        hw_t = []
        for w in range(Wn):
            emb = cap_emb[:, t, w, :]
            gw = (dot(emb, params['Wih_we']) + dot(topic, params['Wih_wt'])
                  + params['bih_w'] + params['bhh_w'] + dot(h_w, params['Whh_w']))
            i_w = jax.nn.sigmoid(gw[:, :H]); f_w = jax.nn.sigmoid(gw[:, H:2 * H])
            g_w = jnp.tanh(gw[:, 2 * H:3 * H]); o_w = jax.nn.sigmoid(gw[:, 3 * H:])
            c_w = f_w * c_w + i_w * g_w
            h_w = o_w * jnp.tanh(c_w)
            hw_t.append(h_w)
        hwords.append(jnp.stack(hw_t, axis=1))
    return (jnp.stack(topics, axis=1), jnp.stack(stops, axis=1), jnp.stack(hwords, axis=1))


# ----------------------------------------------------------------------------
if __name__ == "__main__":
    key = jax.random.PRNGKey(0)
    k_param, k_enc, k_cap = jax.random.split(key, 3)

    # small shapes consistent with the module
    B, P = 2, 16                 # batch, num_pixels (e.g. 4x4 encoder grid)
    ENC, HID, ATT, EMB = 32, 32, 16, 16
    VOCAB = 50
    S, WN = 3, 4                 # sentences per report, words per sentence

    params = init_params(k_param, encoder_dim=ENC, hidden_dim=HID,
                         attention_dim=ATT, embed_dim=EMB, vocab_size=VOCAB)
    encoder_out = jax.random.normal(k_enc, (B, P, ENC), jnp.float32)
    captions = jax.random.randint(k_cap, (B, S, WN), 0, VOCAB, jnp.int32)

    topics, stops, h_words = jax.block_until_ready(
        jax.jit(hierarchical_decoder_forward)(params, encoder_out, captions))

    assert topics.shape == (B, S, EMB)
    assert stops.shape == (B, S, 1)
    assert h_words.shape == (B, S, WN, HID)

    r_topics, r_stops, r_hwords = reference_forward(params, encoder_out, captions)
    np.testing.assert_allclose(np.asarray(topics), np.asarray(r_topics), rtol=2e-2, atol=2e-2)
    np.testing.assert_allclose(np.asarray(stops), np.asarray(r_stops), rtol=2e-2, atol=2e-2)
    np.testing.assert_allclose(np.asarray(h_words), np.asarray(r_hwords), rtol=2e-2, atol=2e-2)

    print("KERNEL_OK")
</pallas_src>

<mosaic_0001>
module attributes {stable_mosaic.version = 11 : i64} {
  func.func @_hier_decoder_kernel(%arg0: i32, %arg1: memref<2x16x32xf32, #tpu.memory_space<vmem>>, %arg2: memref<3x4x2x16xf32, #tpu.memory_space<vmem>>, %arg3: memref<32x16xf32, #tpu.memory_space<vmem>>, %arg4: memref<1x16xf32, #tpu.memory_space<vmem>>, %arg5: memref<1x16xf32, #tpu.memory_space<vmem>>, %arg6: memref<1x16xf32, #tpu.memory_space<vmem>>, %arg7: memref<1x1xf32, #tpu.memory_space<vmem>>, %arg8: memref<32x32xf32, #tpu.memory_space<vmem>>, %arg9: memref<1x32xf32, #tpu.memory_space<vmem>>, %arg10: memref<64x32xf32, #tpu.memory_space<vmem>>, %arg11: memref<1x32xf32, #tpu.memory_space<vmem>>, %arg12: memref<64x128xf32, #tpu.memory_space<vmem>>, %arg13: memref<1x128xf32, #tpu.memory_space<vmem>>, %arg14: memref<64x64xf32, #tpu.memory_space<vmem>>, %arg15: memref<1x16xf32, #tpu.memory_space<vmem>>, %arg16: memref<1x32xf32, #tpu.memory_space<vmem>>, %arg17: memref<1x32xf32, #tpu.memory_space<vmem>>, %arg18: memref<1x1xf32, #tpu.memory_space<vmem>>, %arg19: memref<16x128xf32, #tpu.memory_space<vmem>>, %arg20: memref<16x128xf32, #tpu.memory_space<vmem>>, %arg21: memref<32x128xf32, #tpu.memory_space<vmem>>, %arg22: memref<1x128xf32, #tpu.memory_space<vmem>>, %arg23: memref<2x51xf32, #tpu.memory_space<vmem>>, %arg24: memref<2x384xf32, #tpu.memory_space<vmem>>) attributes {dimension_semantics = [#tpu.dimension_semantics<parallel>], iteration_bounds = array<i64: 1>, scalar_prefetch = 0 : i64, scratch_operands = 0 : i64, tpu.core_type = #tpu.core_type<tc>, window_params = [{transform_indices = @transform_0, window_bounds = array<i64: 2, 16, 32>}, {transform_indices = @transform_1, window_bounds = array<i64: 3, 4, 2, 16>}, {pipeline_mode = #tpu.pipeline_mode<synchronous>, transform_indices = @transform_2, window_bounds = array<i64: 32, 16>}, {pipeline_mode = #tpu.pipeline_mode<synchronous>, transform_indices = @transform_3, window_bounds = array<i64: 1, 16>}, {pipeline_mode = #tpu.pipeline_mode<synchronous>, transform_indices = @transform_4, window_bounds = array<i64: 1, 16>}, {pipeline_mode = #tpu.pipeline_mode<synchronous>, transform_indices = @transform_5, window_bounds = array<i64: 1, 16>}, {pipeline_mode = #tpu.pipeline_mode<synchronous>, transform_indices = @transform_6, window_bounds = array<i64: 1, 1>}, {pipeline_mode = #tpu.pipeline_mode<synchronous>, transform_indices = @transform_7, window_bounds = array<i64: 32, 32>}, {pipeline_mode = #tpu.pipeline_mode<synchronous>, transform_indices = @transform_8, window_bounds = array<i64: 1, 32>}, {pipeline_mode = #tpu.pipeline_mode<synchronous>, transform_indices = @transform_9, window_bounds = array<i64: 64, 32>}, {pipeline_mode = #tpu.pipeline_mode<synchronous>, transform_indices = @transform_10, window_bounds = array<i64: 1, 32>}, {pipeline_mode = #tpu.pipeline_mode<synchronous>, transform_indices = @transform_11, window_bounds = array<i64: 64, 128>}, {pipeline_mode = #tpu.pipeline_mode<synchronous>, transform_indices = @transform_12, window_bounds = array<i64: 1, 128>}, {pipeline_mode = #tpu.pipeline_mode<synchronous>, transform_indices = @transform_13, window_bounds = array<i64: 64, 64>}, {pipeline_mode = #tpu.pipeline_mode<synchronous>, transform_indices = @transform_14, window_bounds = array<i64: 1, 16>}, {pipeline_mode = #tpu.pipeline_mode<synchronous>, transform_indices = @transform_15, window_bounds = array<i64: 1, 32>}, {pipeline_mode = #tpu.pipeline_mode<synchronous>, transform_indices = @transform_16, window_bounds = array<i64: 1, 32>}, {pipeline_mode = #tpu.pipeline_mode<synchronous>, transform_indices = @transform_17, window_bounds = array<i64: 1, 1>}, {pipeline_mode = #tpu.pipeline_mode<synchronous>, transform_indices = @transform_18, window_bounds = array<i64: 16, 128>}, {pipeline_mode = #tpu.pipeline_mode<synchronous>, transform_indices = @transform_19, window_bounds = array<i64: 16, 128>}, {pipeline_mode = #tpu.pipeline_mode<synchronous>, transform_indices = @transform_20, window_bounds = array<i64: 32, 128>}, {pipeline_mode = #tpu.pipeline_mode<synchronous>, transform_indices = @transform_21, window_bounds = array<i64: 1, 128>}, {transform_indices = @transform_22, window_bounds = array<i64: 2, 51>}, {transform_indices = @transform_23, window_bounds = array<i64: 2, 384>}]} {
    %c0 = arith.constant 0 : index
    %c0_0 = arith.constant 0 : index
    %0 = vector.load %arg5[%c0, %c0_0] : memref<1x16xf32, #tpu.memory_space<vmem>>, vector<1x16xf32>
    %c0_1 = arith.constant 0 : index
    %c0_2 = arith.constant 0 : index
    %1 = vector.load %arg6[%c0_1, %c0_2] : memref<1x16xf32, #tpu.memory_space<vmem>>, vector<1x16xf32>
    %c0_3 = arith.constant 0 : index
    %c0_4 = arith.constant 0 : index
    %2 = vector.load %arg7[%c0_3, %c0_4] : memref<1x1xf32, #tpu.memory_space<vmem>>, vector<1x1xf32>
    %c0_5 = arith.constant 0 : index
    %c0_6 = arith.constant 0 : index
    %3 = vector.load %arg8[%c0_5, %c0_6] : memref<32x32xf32, #tpu.memory_space<vmem>>, vector<32x32xf32>
    %c0_7 = arith.constant 0 : index
    %c0_8 = arith.constant 0 : index
    %4 = vector.load %arg9[%c0_7, %c0_8] : memref<1x32xf32, #tpu.memory_space<vmem>>, vector<1x32xf32>
    %c0_9 = arith.constant 0 : index
    %c0_10 = arith.constant 0 : index
    %5 = vector.load %arg10[%c0_9, %c0_10] : memref<64x32xf32, #tpu.memory_space<vmem>>, vector<64x32xf32>
    %c0_11 = arith.constant 0 : index
    %c0_12 = arith.constant 0 : index
    %6 = vector.load %arg11[%c0_11, %c0_12] : memref<1x32xf32, #tpu.memory_space<vmem>>, vector<1x32xf32>
    %c0_13 = arith.constant 0 : index
    %c0_14 = arith.constant 0 : index
    %7 = vector.load %arg12[%c0_13, %c0_14] : memref<64x128xf32, #tpu.memory_space<vmem>>, vector<64x128xf32>
    %c0_15 = arith.constant 0 : index
    %c0_16 = arith.constant 0 : index
    %8 = vector.load %arg13[%c0_15, %c0_16] : memref<1x128xf32, #tpu.memory_space<vmem>>, vector<1x128xf32>
    %c0_17 = arith.constant 0 : index
    %c0_18 = arith.constant 0 : index
    %9 = vector.load %arg14[%c0_17, %c0_18] : memref<64x64xf32, #tpu.memory_space<vmem>>, vector<64x64xf32>
    %c0_19 = arith.constant 0 : index
    %c0_20 = arith.constant 0 : index
    %10 = vector.load %arg15[%c0_19, %c0_20] : memref<1x16xf32, #tpu.memory_space<vmem>>, vector<1x16xf32>
    %c0_21 = arith.constant 0 : index
    %c0_22 = arith.constant 0 : index
    %11 = vector.load %arg16[%c0_21, %c0_22] : memref<1x32xf32, #tpu.memory_space<vmem>>, vector<1x32xf32>
    %c0_23 = arith.constant 0 : index
    %c0_24 = arith.constant 0 : index
    %12 = vector.load %arg17[%c0_23, %c0_24] : memref<1x32xf32, #tpu.memory_space<vmem>>, vector<1x32xf32>
    %c0_25 = arith.constant 0 : index
    %c0_26 = arith.constant 0 : index
    %13 = vector.load %arg18[%c0_25, %c0_26] : memref<1x1xf32, #tpu.memory_space<vmem>>, vector<1x1xf32>
    %c0_27 = arith.constant 0 : index
    %c0_28 = arith.constant 0 : index
    %14 = vector.load %arg19[%c0_27, %c0_28] : memref<16x128xf32, #tpu.memory_space<vmem>>, vector<16x128xf32>
    %c0_29 = arith.constant 0 : index
    %c0_30 = arith.constant 0 : index
    %15 = vector.load %arg20[%c0_29, %c0_30] : memref<16x128xf32, #tpu.memory_space<vmem>>, vector<16x128xf32>
    %c0_31 = arith.constant 0 : index
    %c0_32 = arith.constant 0 : index
    %16 = vector.load %arg21[%c0_31, %c0_32] : memref<32x128xf32, #tpu.memory_space<vmem>>, vector<32x128xf32>
    %c0_33 = arith.constant 0 : index
    %c0_34 = arith.constant 0 : index
    %17 = vector.load %arg22[%c0_33, %c0_34] : memref<1x128xf32, #tpu.memory_space<vmem>>, vector<1x128xf32>
    %c0_35 = arith.constant 0 : index
    %c0_36 = arith.constant 0 : index
    %c0_37 = arith.constant 0 : index
    %18 = vector.load %arg1[%c0_35, %c0_36, %c0_37] : memref<2x16x32xf32, #tpu.memory_space<vmem>>, vector<2x16x32xf32>
    %19 = vector.shape_cast %18 : vector<2x16x32xf32> to vector<32x32xf32>
    %c0_38 = arith.constant 0 : index
    %c0_39 = arith.constant 0 : index
    %20 = vector.load %arg3[%c0_38, %c0_39] : memref<32x16xf32, #tpu.memory_space<vmem>>, vector<32x16xf32>
    %cst = arith.constant dense<0.000000e+00> : vector<32x16xf32>
    %21 = tpu.matmul %19, %20, %cst {dimension_numbers = #tpu.dot_dimension_numbers<[1], [0], [0], [1], [0, 0, 1, 1], [], []>} : vector<32x32xf32>, vector<32x16xf32>, vector<32x16xf32> -> vector<32x16xf32>
    %c0_40 = arith.constant 0 : index
    %c0_41 = arith.constant 0 : index
    %22 = vector.load %arg4[%c0_40, %c0_41] : memref<1x16xf32, #tpu.memory_space<vmem>>, vector<1x16xf32>
    %23 = vector.broadcast %22 : vector<1x16xf32> to vector<32x16xf32>
    %24 = arith.addf %21, %23 : vector<32x16xf32>
    %25 = vector.shape_cast %24 : vector<32x16xf32> to vector<2x16x16xf32>
    %cst_42 = arith.constant 0.000000e+00 : f32
    %26 = vector.broadcast %cst_42 : f32 to vector<2x32xf32>
    %cst_43 = arith.constant 0.000000e+00 : f32
    %27 = vector.broadcast %cst_43 : f32 to vector<2x16xf32>
    %28 = vector.broadcast %0 : vector<1x16xf32> to vector<2x16xf32>
    %29 = arith.addf %27, %28 : vector<2x16xf32>
    %30 = vector.shape_cast %29 : vector<2x16xf32> to vector<2x1x16xf32>
    %31 = vector.broadcast %30 : vector<2x1x16xf32> to vector<2x16x16xf32>
    %32 = arith.addf %25, %31 : vector<2x16x16xf32>
    %cst_44 = arith.constant 0.000000e+00 : f32
    %33 = vector.broadcast %cst_44 : f32 to vector<2x16x16xf32>
    %34 = arith.maximumf %32, %33 : vector<2x16x16xf32>
    %35 = vector.shape_cast %1 : vector<1x16xf32> to vector<1x1x16xf32>
    %36 = vector.broadcast %35 : vector<1x1x16xf32> to vector<2x16x16xf32>
    %37 = arith.mulf %34, %36 : vector<2x16x16xf32>
    %cst_45 = arith.constant dense<0.000000e+00> : vector<2x16xf32>
    %38 = vector.multi_reduction <add>, %37, %cst_45 [2] : vector<2x16x16xf32> to vector<2x16xf32>
    %39 = vector.broadcast %2 : vector<1x1xf32> to vector<2x16xf32>
    %40 = arith.addf %38, %39 : vector<2x16xf32>
    %cst_46 = arith.constant dense<0xFF800000> : vector<2xf32>
    %41 = vector.multi_reduction <maximumf>, %40, %cst_46 [1] : vector<2x16xf32> to vector<2xf32>
    %42 = vector.shape_cast %41 : vector<2xf32> to vector<2x1xf32>
    %43 = vector.broadcast %42 : vector<2x1xf32> to vector<2x16xf32>
    %44 = arith.subf %40, %43 : vector<2x16xf32>
    %45 = math.exp %44 : vector<2x16xf32>
    %cst_47 = arith.constant dense<0.000000e+00> : vector<2xf32>
    %46 = vector.multi_reduction <add>, %45, %cst_47 [1] : vector<2x16xf32> to vector<2xf32>
    %47 = vector.shape_cast %46 : vector<2xf32> to vector<2x1xf32>
    %48 = tpu.reciprocal %47 : vector<2x1xf32> -> vector<2x1xf32>
    %49 = vector.broadcast %48 : vector<2x1xf32> to vector<2x16xf32>
    %50 = arith.mulf %45, %49 : vector<2x16xf32>
    %51 = vector.shape_cast %50 : vector<2x16xf32> to vector<2x16x1xf32>
    %52 = vector.broadcast %51 : vector<2x16x1xf32> to vector<2x16x32xf32>
    %53 = arith.mulf %18, %52 : vector<2x16x32xf32>
    %cst_48 = arith.constant dense<0.000000e+00> : vector<2x32xf32>
    %54 = vector.multi_reduction <add>, %53, %cst_48 [1] : vector<2x16x32xf32> to vector<2x32xf32>
    %cst_49 = arith.constant dense<0.000000e+00> : vector<2x32xf32>
    %55 = tpu.matmul %54, %3, %cst_49 {dimension_numbers = #tpu.dot_dimension_numbers<[1], [0], [0], [1], [0, 0, 1, 1], [], []>} : vector<2x32xf32>, vector<32x32xf32>, vector<2x32xf32> -> vector<2x32xf32>
    %56 = vector.broadcast %4 : vector<1x32xf32> to vector<2x32xf32>
    %57 = arith.addf %55, %56 : vector<2x32xf32>
    %58 = tpu.concatenate %57, %26 in 1 : vector<2x32xf32>, vector<2x32xf32> -> vector<2x64xf32>
    %cst_50 = arith.constant dense<0.000000e+00> : vector<2x32xf32>
    %59 = tpu.matmul %58, %5, %cst_50 {dimension_numbers = #tpu.dot_dimension_numbers<[1], [0], [0], [1], [0, 0, 1, 1], [], []>} : vector<2x64xf32>, vector<64x32xf32>, vector<2x32xf32> -> vector<2x32xf32>
    %60 = vector.broadcast %6 : vector<1x32xf32> to vector<2x32xf32>
    %61 = arith.addf %59, %60 : vector<2x32xf32>
    %cst_51 = arith.constant 0.000000e+00 : f32
    %62 = vector.broadcast %cst_51 : f32 to vector<2x32xf32>
    %63 = arith.maximumf %61, %62 : vector<2x32xf32>
    %64 = tpu.concatenate %63, %26 in 1 : vector<2x32xf32>, vector<2x32xf32> -> vector<2x64xf32>
    %cst_52 = arith.constant dense<0.000000e+00> : vector<2x128xf32>
    %65 = tpu.matmul %64, %7, %cst_52 {dimension_numbers = #tpu.dot_dimension_numbers<[1], [0], [0], [1], [0, 0, 1, 1], [], []>} : vector<2x64xf32>, vector<64x128xf32>, vector<2x128xf32> -> vector<2x128xf32>
    %66 = vector.broadcast %8 : vector<1x128xf32> to vector<2x128xf32>
    %67 = arith.addf %65, %66 : vector<2x128xf32>
    %68 = vector.extract_strided_slice %67 {offsets = [0, 0], sizes = [2, 32], strides = [1, 1]} : vector<2x128xf32> to vector<2x32xf32>
    %69 = arith.negf %68 : vector<2x32xf32>
    %70 = math.exp %69 : vector<2x32xf32>
    %cst_53 = arith.constant 1.000000e+00 : f32
    %71 = vector.broadcast %cst_53 : f32 to vector<2x32xf32>
    %72 = arith.addf %71, %70 : vector<2x32xf32>
    %73 = arith.divf %71, %72 : vector<2x32xf32>
    %74 = vector.extract_strided_slice %67 {offsets = [0, 32], sizes = [2, 32], strides = [1, 1]} : vector<2x128xf32> to vector<2x32xf32>
    %75 = arith.negf %74 : vector<2x32xf32>
    %76 = math.exp %75 : vector<2x32xf32>
    %cst_54 = arith.constant 1.000000e+00 : f32
    %77 = vector.broadcast %cst_54 : f32 to vector<2x32xf32>
    %78 = arith.addf %77, %76 : vector<2x32xf32>
    %79 = arith.divf %77, %78 : vector<2x32xf32>
    %80 = vector.extract_strided_slice %67 {offsets = [0, 64], sizes = [2, 32], strides = [1, 1]} : vector<2x128xf32> to vector<2x32xf32>
    %81 = math.tanh %80 : vector<2x32xf32>
    %82 = vector.extract_strided_slice %67 {offsets = [0, 96], sizes = [2, 32], strides = [1, 1]} : vector<2x128xf32> to vector<2x32xf32>
    %83 = arith.negf %82 : vector<2x32xf32>
    %84 = math.exp %83 : vector<2x32xf32>
    %cst_55 = arith.constant 1.000000e+00 : f32
    %85 = vector.broadcast %cst_55 : f32 to vector<2x32xf32>
    %86 = arith.addf %85, %84 : vector<2x32xf32>
    %87 = arith.divf %85, %86 : vector<2x32xf32>
    %88 = arith.mulf %79, %26 : vector<2x32xf32>
    %89 = arith.mulf %73, %81 : vector<2x32xf32>
    %90 = arith.addf %88, %89 : vector<2x32xf32>
    %91 = math.tanh %90 : vector<2x32xf32>
    %92 = arith.mulf %87, %91 : vector<2x32xf32>
    %93 = tpu.concatenate %26, %92 in 1 : vector<2x32xf32>, vector<2x32xf32> -> vector<2x64xf32>
    %cst_56 = arith.constant dense<0.000000e+00> : vector<2x64xf32>
    %94 = tpu.matmul %93, %9, %cst_56 {dimension_numbers = #tpu.dot_dimension_numbers<[1], [0], [0], [1], [0, 0, 1, 1], [], []>} : vector<2x64xf32>, vector<64x64xf32>, vector<2x64xf32> -> vector<2x64xf32>
    %95 = vector.extract_strided_slice %94 {offsets = [0, 0], sizes = [2, 16], strides = [1, 1]} : vector<2x64xf32> to vector<2x16xf32>
    %96 = vector.broadcast %10 : vector<1x16xf32> to vector<2x16xf32>
    %97 = arith.addf %95, %96 : vector<2x16xf32>
    %cst_57 = arith.constant 0.000000e+00 : f32
    %98 = vector.broadcast %cst_57 : f32 to vector<2x16xf32>
    %99 = arith.maximumf %97, %98 : vector<2x16xf32>
    %100 = vector.extract_strided_slice %94 {offsets = [0, 16], sizes = [2, 32], strides = [1, 1]} : vector<2x64xf32> to vector<2x32xf32>
    %101 = vector.broadcast %11 : vector<1x32xf32> to vector<2x32xf32>
    %102 = arith.addf %100, %101 : vector<2x32xf32>
    %103 = math.tanh %102 : vector<2x32xf32>
    %104 = vector.extract_strided_slice %94 {offsets = [0, 48], sizes = [2, 16], strides = [1, 1]} : vector<2x64xf32> to vector<2x16xf32>
    %105 = vector.broadcast %12 : vector<1x32xf32> to vector<2x32xf32>
    %106 = arith.mulf %103, %105 : vector<2x32xf32>
    %cst_58 = arith.constant dense<0.000000e+00> : vector<2xf32>
    %107 = vector.multi_reduction <add>, %106, %cst_58 [1] : vector<2x32xf32> to vector<2xf32>
    %108 = vector.shape_cast %107 : vector<2xf32> to vector<2x1xf32>
    %109 = vector.broadcast %13 : vector<1x1xf32> to vector<2x1xf32>
    %110 = arith.addf %108, %109 : vector<2x1xf32>
    %111 = arith.negf %110 : vector<2x1xf32>
    %112 = math.exp %111 : vector<2x1xf32>
    %cst_59 = arith.constant 1.000000e+00 : f32
    %113 = vector.broadcast %cst_59 : f32 to vector<2x1xf32>
    %114 = arith.addf %113, %112 : vector<2x1xf32>
    %115 = arith.divf %113, %114 : vector<2x1xf32>
    %116 = tpu.concatenate %99, %115 in 1 : vector<2x16xf32>, vector<2x1xf32> -> vector<2x17xf32>
    %cst_60 = arith.constant dense<0.000000e+00> : vector<2x128xf32>
    %117 = tpu.matmul %99, %15, %cst_60 {dimension_numbers = #tpu.dot_dimension_numbers<[1], [0], [0], [1], [0, 0, 1, 1], [], []>} : vector<2x16xf32>, vector<16x128xf32>, vector<2x128xf32> -> vector<2x128xf32>
    %118 = vector.broadcast %17 : vector<1x128xf32> to vector<2x128xf32>
    %119 = arith.addf %117, %118 : vector<2x128xf32>
    %c0_61 = arith.constant 0 : index
    %c0_62 = arith.constant 0 : index
    %c0_63 = arith.constant 0 : index
    %c0_64 = arith.constant 0 : index
    %120 = vector.load %arg2[%c0_61, %c0_62, %c0_63, %c0_64] : memref<3x4x2x16xf32, #tpu.memory_space<vmem>>, vector<1x1x2x16xf32>
    %121 = vector.shape_cast %120 : vector<1x1x2x16xf32> to vector<2x16xf32>
    %cst_65 = arith.constant dense<0.000000e+00> : vector<2x128xf32>
    %122 = tpu.matmul %121, %14, %cst_65 {dimension_numbers = #tpu.dot_dimension_numbers<[1], [0], [0], [1], [0, 0, 1, 1], [], []>} : vector<2x16xf32>, vector<16x128xf32>, vector<2x128xf32> -> vector<2x128xf32>
    %123 = arith.addf %122, %119 : vector<2x128xf32>
    %cst_66 = arith.constant dense<0.000000e+00> : vector<2x128xf32>
    %124 = tpu.matmul %26, %16, %cst_66 {dimension_numbers = #tpu.dot_dimension_numbers<[1], [0], [0], [1], [0, 0, 1, 1], [], []>} : vector<2x32xf32>, vector<32x128xf32>, vector<2x128xf32> -> vector<2x128xf32>
    %125 = arith.addf %123, %124 : vector<2x128xf32>
    %126 = vector.extract_strided_slice %125 {offsets = [0, 0], sizes = [2, 32], strides = [1, 1]} : vector<2x128xf32> to vector<2x32xf32>
    %127 = arith.negf %126 : vector<2x32xf32>
    %128 = math.exp %127 : vector<2x32xf32>
    %cst_67 = arith.constant 1.000000e+00 : f32
    %129 = vector.broadcast %cst_67 : f32 to vector<2x32xf32>
    %130 = arith.addf %129, %128 : vector<2x32xf32>
    %131 = arith.divf %129, %130 : vector<2x32xf32>
    %132 = vector.extract_strided_slice %125 {offsets = [0, 32], sizes = [2, 32], strides = [1, 1]} : vector<2x128xf32> to vector<2x32xf32>
    %133 = arith.negf %132 : vector<2x32xf32>
    %134 = math.exp %133 : vector<2x32xf32>
    %cst_68 = arith.constant 1.000000e+00 : f32
    %135 = vector.broadcast %cst_68 : f32 to vector<2x32xf32>
    %136 = arith.addf %135, %134 : vector<2x32xf32>
    %137 = arith.divf %135, %136 : vector<2x32xf32>
    %138 = vector.extract_strided_slice %125 {offsets = [0, 64], sizes = [2, 32], strides = [1, 1]} : vector<2x128xf32> to vector<2x32xf32>
    %139 = math.tanh %138 : vector<2x32xf32>
    %140 = vector.extract_strided_slice %125 {offsets = [0, 96], sizes = [2, 32], strides = [1, 1]} : vector<2x128xf32> to vector<2x32xf32>
    %141 = arith.negf %140 : vector<2x32xf32>
    %142 = math.exp %141 : vector<2x32xf32>
    %cst_69 = arith.constant 1.000000e+00 : f32
    %143 = vector.broadcast %cst_69 : f32 to vector<2x32xf32>
    %144 = arith.addf %143, %142 : vector<2x32xf32>
    %145 = arith.divf %143, %144 : vector<2x32xf32>
    %146 = arith.mulf %137, %26 : vector<2x32xf32>
    %147 = arith.mulf %131, %139 : vector<2x32xf32>
    %148 = arith.addf %146, %147 : vector<2x32xf32>
    %149 = math.tanh %148 : vector<2x32xf32>
    %150 = arith.mulf %145, %149 : vector<2x32xf32>
    %c0_70 = arith.constant 0 : index
    %c1 = arith.constant 1 : index
    %c0_71 = arith.constant 0 : index
    %c0_72 = arith.constant 0 : index
    %151 = vector.load %arg2[%c0_70, %c1, %c0_71, %c0_72] : memref<3x4x2x16xf32, #tpu.memory_space<vmem>>, vector<1x1x2x16xf32>
    %152 = vector.shape_cast %151 : vector<1x1x2x16xf32> to vector<2x16xf32>
    %cst_73 = arith.constant dense<0.000000e+00> : vector<2x128xf32>
    %153 = tpu.matmul %152, %14, %cst_73 {dimension_numbers = #tpu.dot_dimension_numbers<[1], [0], [0], [1], [0, 0, 1, 1], [], []>} : vector<2x16xf32>, vector<16x128xf32>, vector<2x128xf32> -> vector<2x128xf32>
    %154 = arith.addf %153, %119 : vector<2x128xf32>
    %cst_74 = arith.constant dense<0.000000e+00> : vector<2x128xf32>
    %155 = tpu.matmul %150, %16, %cst_74 {dimension_numbers = #tpu.dot_dimension_numbers<[1], [0], [0], [1], [0, 0, 1, 1], [], []>} : vector<2x32xf32>, vector<32x128xf32>, vector<2x128xf32> -> vector<2x128xf32>
    %156 = arith.addf %154, %155 : vector<2x128xf32>
    %157 = vector.extract_strided_slice %156 {offsets = [0, 0], sizes = [2, 32], strides = [1, 1]} : vector<2x128xf32> to vector<2x32xf32>
    %158 = arith.negf %157 : vector<2x32xf32>
    %159 = math.exp %158 : vector<2x32xf32>
    %cst_75 = arith.constant 1.000000e+00 : f32
    %160 = vector.broadcast %cst_75 : f32 to vector<2x32xf32>
    %161 = arith.addf %160, %159 : vector<2x32xf32>
    %162 = arith.divf %160, %161 : vector<2x32xf32>
    %163 = vector.extract_strided_slice %156 {offsets = [0, 32], sizes = [2, 32], strides = [1, 1]} : vector<2x128xf32> to vector<2x32xf32>
    %164 = arith.negf %163 : vector<2x32xf32>
    %165 = math.exp %164 : vector<2x32xf32>
    %cst_76 = arith.constant 1.000000e+00 : f32
    %166 = vector.broadcast %cst_76 : f32 to vector<2x32xf32>
    %167 = arith.addf %166, %165 : vector<2x32xf32>
    %168 = arith.divf %166, %167 : vector<2x32xf32>
    %169 = vector.extract_strided_slice %156 {offsets = [0, 64], sizes = [2, 32], strides = [1, 1]} : vector<2x128xf32> to vector<2x32xf32>
    %170 = math.tanh %169 : vector<2x32xf32>
    %171 = vector.extract_strided_slice %156 {offsets = [0, 96], sizes = [2, 32], strides = [1, 1]} : vector<2x128xf32> to vector<2x32xf32>
    %172 = arith.negf %171 : vector<2x32xf32>
    %173 = math.exp %172 : vector<2x32xf32>
    %cst_77 = arith.constant 1.000000e+00 : f32
    %174 = vector.broadcast %cst_77 : f32 to vector<2x32xf32>
    %175 = arith.addf %174, %173 : vector<2x32xf32>
    %176 = arith.divf %174, %175 : vector<2x32xf32>
    %177 = arith.mulf %168, %148 : vector<2x32xf32>
    %178 = arith.mulf %162, %170 : vector<2x32xf32>
    %179 = arith.addf %177, %178 : vector<2x32xf32>
    %180 = math.tanh %179 : vector<2x32xf32>
    %181 = arith.mulf %176, %180 : vector<2x32xf32>
    %c0_78 = arith.constant 0 : index
    %c2 = arith.constant 2 : index
    %c0_79 = arith.constant 0 : index
    %c0_80 = arith.constant 0 : index
    %182 = vector.load %arg2[%c0_78, %c2, %c0_79, %c0_80] : memref<3x4x2x16xf32, #tpu.memory_space<vmem>>, vector<1x1x2x16xf32>
    %183 = vector.shape_cast %182 : vector<1x1x2x16xf32> to vector<2x16xf32>
    %cst_81 = arith.constant dense<0.000000e+00> : vector<2x128xf32>
    %184 = tpu.matmul %183, %14, %cst_81 {dimension_numbers = #tpu.dot_dimension_numbers<[1], [0], [0], [1], [0, 0, 1, 1], [], []>} : vector<2x16xf32>, vector<16x128xf32>, vector<2x128xf32> -> vector<2x128xf32>
    %185 = arith.addf %184, %119 : vector<2x128xf32>
    %cst_82 = arith.constant dense<0.000000e+00> : vector<2x128xf32>
    %186 = tpu.matmul %181, %16, %cst_82 {dimension_numbers = #tpu.dot_dimension_numbers<[1], [0], [0], [1], [0, 0, 1, 1], [], []>} : vector<2x32xf32>, vector<32x128xf32>, vector<2x128xf32> -> vector<2x128xf32>
    %187 = arith.addf %185, %186 : vector<2x128xf32>
    %188 = vector.extract_strided_slice %187 {offsets = [0, 0], sizes = [2, 32], strides = [1, 1]} : vector<2x128xf32> to vector<2x32xf32>
    %189 = arith.negf %188 : vector<2x32xf32>
    %190 = math.exp %189 : vector<2x32xf32>
    %cst_83 = arith.constant 1.000000e+00 : f32
    %191 = vector.broadcast %cst_83 : f32 to vector<2x32xf32>
    %192 = arith.addf %191, %190 : vector<2x32xf32>
    %193 = arith.divf %191, %192 : vector<2x32xf32>
    %194 = vector.extract_strided_slice %187 {offsets = [0, 32], sizes = [2, 32], strides = [1, 1]} : vector<2x128xf32> to vector<2x32xf32>
    %195 = arith.negf %194 : vector<2x32xf32>
    %196 = math.exp %195 : vector<2x32xf32>
    %cst_84 = arith.constant 1.000000e+00 : f32
    %197 = vector.broadcast %cst_84 : f32 to vector<2x32xf32>
    %198 = arith.addf %197, %196 : vector<2x32xf32>
    %199 = arith.divf %197, %198 : vector<2x32xf32>
    %200 = vector.extract_strided_slice %187 {offsets = [0, 64], sizes = [2, 32], strides = [1, 1]} : vector<2x128xf32> to vector<2x32xf32>
    %201 = math.tanh %200 : vector<2x32xf32>
    %202 = vector.extract_strided_slice %187 {offsets = [0, 96], sizes = [2, 32], strides = [1, 1]} : vector<2x128xf32> to vector<2x32xf32>
    %203 = arith.negf %202 : vector<2x32xf32>
    %204 = math.exp %203 : vector<2x32xf32>
    %cst_85 = arith.constant 1.000000e+00 : f32
    %205 = vector.broadcast %cst_85 : f32 to vector<2x32xf32>
    %206 = arith.addf %205, %204 : vector<2x32xf32>
    %207 = arith.divf %205, %206 : vector<2x32xf32>
    %208 = arith.mulf %199, %179 : vector<2x32xf32>
    %209 = arith.mulf %193, %201 : vector<2x32xf32>
    %210 = arith.addf %208, %209 : vector<2x32xf32>
    %211 = math.tanh %210 : vector<2x32xf32>
    %212 = arith.mulf %207, %211 : vector<2x32xf32>
    %c0_86 = arith.constant 0 : index
    %c3 = arith.constant 3 : index
    %c0_87 = arith.constant 0 : index
    %c0_88 = arith.constant 0 : index
    %213 = vector.load %arg2[%c0_86, %c3, %c0_87, %c0_88] : memref<3x4x2x16xf32, #tpu.memory_space<vmem>>, vector<1x1x2x16xf32>
    %214 = vector.shape_cast %213 : vector<1x1x2x16xf32> to vector<2x16xf32>
    %cst_89 = arith.constant dense<0.000000e+00> : vector<2x128xf32>
    %215 = tpu.matmul %214, %14, %cst_89 {dimension_numbers = #tpu.dot_dimension_numbers<[1], [0], [0], [1], [0, 0, 1, 1], [], []>} : vector<2x16xf32>, vector<16x128xf32>, vector<2x128xf32> -> vector<2x128xf32>
    %216 = arith.addf %215, %119 : vector<2x128xf32>
    %cst_90 = arith.constant dense<0.000000e+00> : vector<2x128xf32>
    %217 = tpu.matmul %212, %16, %cst_90 {dimension_numbers = #tpu.dot_dimension_numbers<[1], [0], [0], [1], [0, 0, 1, 1], [], []>} : vector<2x32xf32>, vector<32x128xf32>, vector<2x128xf32> -> vector<2x128xf32>
    %218 = arith.addf %216, %217 : vector<2x128xf32>
    %219 = vector.extract_strided_slice %218 {offsets = [0, 0], sizes = [2, 32], strides = [1, 1]} : vector<2x128xf32> to vector<2x32xf32>
    %220 = arith.negf %219 : vector<2x32xf32>
    %221 = math.exp %220 : vector<2x32xf32>
    %cst_91 = arith.constant 1.000000e+00 : f32
    %222 = vector.broadcast %cst_91 : f32 to vector<2x32xf32>
    %223 = arith.addf %222, %221 : vector<2x32xf32>
    %224 = arith.divf %222, %223 : vector<2x32xf32>
    %225 = vector.extract_strided_slice %218 {offsets = [0, 32], sizes = [2, 32], strides = [1, 1]} : vector<2x128xf32> to vector<2x32xf32>
    %226 = arith.negf %225 : vector<2x32xf32>
    %227 = math.exp %226 : vector<2x32xf32>
    %cst_92 = arith.constant 1.000000e+00 : f32
    %228 = vector.broadcast %cst_92 : f32 to vector<2x32xf32>
    %229 = arith.addf %228, %227 : vector<2x32xf32>
    %230 = arith.divf %228, %229 : vector<2x32xf32>
    %231 = vector.extract_strided_slice %218 {offsets = [0, 64], sizes = [2, 32], strides = [1, 1]} : vector<2x128xf32> to vector<2x32xf32>
    %232 = math.tanh %231 : vector<2x32xf32>
    %233 = vector.extract_strided_slice %218 {offsets = [0, 96], sizes = [2, 32], strides = [1, 1]} : vector<2x128xf32> to vector<2x32xf32>
    %234 = arith.negf %233 : vector<2x32xf32>
    %235 = math.exp %234 : vector<2x32xf32>
    %cst_93 = arith.constant 1.000000e+00 : f32
    %236 = vector.broadcast %cst_93 : f32 to vector<2x32xf32>
    %237 = arith.addf %236, %235 : vector<2x32xf32>
    %238 = arith.divf %236, %237 : vector<2x32xf32>
    %239 = arith.mulf %230, %210 : vector<2x32xf32>
    %240 = arith.mulf %224, %232 : vector<2x32xf32>
    %241 = arith.addf %239, %240 : vector<2x32xf32>
    %242 = math.tanh %241 : vector<2x32xf32>
    %243 = arith.mulf %238, %242 : vector<2x32xf32>
    %244 = tpu.concatenate %150, %181, %212, %243 in 1 : vector<2x32xf32>, vector<2x32xf32>, vector<2x32xf32>, vector<2x32xf32> -> vector<2x128xf32>
    %245 = vector.broadcast %0 : vector<1x16xf32> to vector<2x16xf32>
    %246 = arith.addf %104, %245 : vector<2x16xf32>
    %247 = vector.shape_cast %246 : vector<2x16xf32> to vector<2x1x16xf32>
    %248 = vector.broadcast %247 : vector<2x1x16xf32> to vector<2x16x16xf32>
    %249 = arith.addf %25, %248 : vector<2x16x16xf32>
    %cst_94 = arith.constant 0.000000e+00 : f32
    %250 = vector.broadcast %cst_94 : f32 to vector<2x16x16xf32>
    %251 = arith.maximumf %249, %250 : vector<2x16x16xf32>
    %252 = vector.shape_cast %1 : vector<1x16xf32> to vector<1x1x16xf32>
    %253 = vector.broadcast %252 : vector<1x1x16xf32> to vector<2x16x16xf32>
    %254 = arith.mulf %251, %253 : vector<2x16x16xf32>
    %cst_95 = arith.constant dense<0.000000e+00> : vector<2x16xf32>
    %255 = vector.multi_reduction <add>, %254, %cst_95 [2] : vector<2x16x16xf32> to vector<2x16xf32>
    %256 = vector.broadcast %2 : vector<1x1xf32> to vector<2x16xf32>
    %257 = arith.addf %255, %256 : vector<2x16xf32>
    %cst_96 = arith.constant dense<0xFF800000> : vector<2xf32>
    %258 = vector.multi_reduction <maximumf>, %257, %cst_96 [1] : vector<2x16xf32> to vector<2xf32>
    %259 = vector.shape_cast %258 : vector<2xf32> to vector<2x1xf32>
    %260 = vector.broadcast %259 : vector<2x1xf32> to vector<2x16xf32>
    %261 = arith.subf %257, %260 : vector<2x16xf32>
    %262 = math.exp %261 : vector<2x16xf32>
    %cst_97 = arith.constant dense<0.000000e+00> : vector<2xf32>
    %263 = vector.multi_reduction <add>, %262, %cst_97 [1] : vector<2x16xf32> to vector<2xf32>
    %264 = vector.shape_cast %263 : vector<2xf32> to vector<2x1xf32>
    %265 = tpu.reciprocal %264 : vector<2x1xf32> -> vector<2x1xf32>
    %266 = vector.broadcast %265 : vector<2x1xf32> to vector<2x16xf32>
    %267 = arith.mulf %262, %266 : vector<2x16xf32>
    %268 = vector.shape_cast %267 : vector<2x16xf32> to vector<2x16x1xf32>
    %269 = vector.broadcast %268 : vector<2x16x1xf32> to vector<2x16x32xf32>
    %270 = arith.mulf %18, %269 : vector<2x16x32xf32>
    %cst_98 = arith.constant dense<0.000000e+00> : vector<2x32xf32>
    %271 = vector.multi_reduction <add>, %270, %cst_98 [1] : vector<2x16x32xf32> to vector<2x32xf32>
    %cst_99 = arith.constant dense<0.000000e+00> : vector<2x32xf32>
    %272 = tpu.matmul %271, %3, %cst_99 {dimension_numbers = #tpu.dot_dimension_numbers<[1], [0], [0], [1], [0, 0, 1, 1], [], []>} : vector<2x32xf32>, vector<32x32xf32>, vector<2x32xf32> -> vector<2x32xf32>
    %273 = vector.broadcast %4 : vector<1x32xf32> to vector<2x32xf32>
    %274 = arith.addf %272, %273 : vector<2x32xf32>
    %275 = tpu.concatenate %274, %92 in 1 : vector<2x32xf32>, vector<2x32xf32> -> vector<2x64xf32>
    %cst_100 = arith.constant dense<0.000000e+00> : vector<2x32xf32>
    %276 = tpu.matmul %275, %5, %cst_100 {dimension_numbers = #tpu.dot_dimension_numbers<[1], [0], [0], [1], [0, 0, 1, 1], [], []>} : vector<2x64xf32>, vector<64x32xf32>, vector<2x32xf32> -> vector<2x32xf32>
    %277 = vector.broadcast %6 : vector<1x32xf32> to vector<2x32xf32>
    %278 = arith.addf %276, %277 : vector<2x32xf32>
    %cst_101 = arith.constant 0.000000e+00 : f32
    %279 = vector.broadcast %cst_101 : f32 to vector<2x32xf32>
    %280 = arith.maximumf %278, %279 : vector<2x32xf32>
    %281 = tpu.concatenate %280, %92 in 1 : vector<2x32xf32>, vector<2x32xf32> -> vector<2x64xf32>
    %cst_102 = arith.constant dense<0.000000e+00> : vector<2x128xf32>
    %282 = tpu.matmul %281, %7, %cst_102 {dimension_numbers = #tpu.dot_dimension_numbers<[1], [0], [0], [1], [0, 0, 1, 1], [], []>} : vector<2x64xf32>, vector<64x128xf32>, vector<2x128xf32> -> vector<2x128xf32>
    %283 = vector.broadcast %8 : vector<1x128xf32> to vector<2x128xf32>
    %284 = arith.addf %282, %283 : vector<2x128xf32>
    %285 = vector.extract_strided_slice %284 {offsets = [0, 0], sizes = [2, 32], strides = [1, 1]} : vector<2x128xf32> to vector<2x32xf32>
    %286 = arith.negf %285 : vector<2x32xf32>
    %287 = math.exp %286 : vector<2x32xf32>
    %cst_103 = arith.constant 1.000000e+00 : f32
    %288 = vector.broadcast %cst_103 : f32 to vector<2x32xf32>
    %289 = arith.addf %288, %287 : vector<2x32xf32>
    %290 = arith.divf %288, %289 : vector<2x32xf32>
    %291 = vector.extract_strided_slice %284 {offsets = [0, 32], sizes = [2, 32], strides = [1, 1]} : vector<2x128xf32> to vector<2x32xf32>
    %292 = arith.negf %291 : vector<2x32xf32>
    %293 = math.exp %292 : vector<2x32xf32>
    %cst_104 = arith.constant 1.000000e+00 : f32
    %294 = vector.broadcast %cst_104 : f32 to vector<2x32xf32>
    %295 = arith.addf %294, %293 : vector<2x32xf32>
    %296 = arith.divf %294, %295 : vector<2x32xf32>
    %297 = vector.extract_strided_slice %284 {offsets = [0, 64], sizes = [2, 32], strides = [1, 1]} : vector<2x128xf32> to vector<2x32xf32>
    %298 = math.tanh %297 : vector<2x32xf32>
    %299 = vector.extract_strided_slice %284 {offsets = [0, 96], sizes = [2, 32], strides = [1, 1]} : vector<2x128xf32> to vector<2x32xf32>
    %300 = arith.negf %299 : vector<2x32xf32>
    %301 = math.exp %300 : vector<2x32xf32>
    %cst_105 = arith.constant 1.000000e+00 : f32
    %302 = vector.broadcast %cst_105 : f32 to vector<2x32xf32>
    %303 = arith.addf %302, %301 : vector<2x32xf32>
    %304 = arith.divf %302, %303 : vector<2x32xf32>
    %305 = arith.mulf %296, %90 : vector<2x32xf32>
    %306 = arith.mulf %290, %298 : vector<2x32xf32>
    %307 = arith.addf %305, %306 : vector<2x32xf32>
    %308 = math.tanh %307 : vector<2x32xf32>
    %309 = arith.mulf %304, %308 : vector<2x32xf32>
    %310 = tpu.concatenate %92, %309 in 1 : vector<2x32xf32>, vector<2x32xf32> -> vector<2x64xf32>
    %cst_106 = arith.constant dense<0.000000e+00> : vector<2x64xf32>
    %311 = tpu.matmul %310, %9, %cst_106 {dimension_numbers = #tpu.dot_dimension_numbers<[1], [0], [0], [1], [0, 0, 1, 1], [], []>} : vector<2x64xf32>, vector<64x64xf32>, vector<2x64xf32> -> vector<2x64xf32>
    %312 = vector.extract_strided_slice %311 {offsets = [0, 0], sizes = [2, 16], strides = [1, 1]} : vector<2x64xf32> to vector<2x16xf32>
    %313 = vector.broadcast %10 : vector<1x16xf32> to vector<2x16xf32>
    %314 = arith.addf %312, %313 : vector<2x16xf32>
    %cst_107 = arith.constant 0.000000e+00 : f32
    %315 = vector.broadcast %cst_107 : f32 to vector<2x16xf32>
    %316 = arith.maximumf %314, %315 : vector<2x16xf32>
    %317 = vector.extract_strided_slice %311 {offsets = [0, 16], sizes = [2, 32], strides = [1, 1]} : vector<2x64xf32> to vector<2x32xf32>
    %318 = vector.broadcast %11 : vector<1x32xf32> to vector<2x32xf32>
    %319 = arith.addf %317, %318 : vector<2x32xf32>
    %320 = math.tanh %319 : vector<2x32xf32>
    %321 = vector.extract_strided_slice %311 {offsets = [0, 48], sizes = [2, 16], strides = [1, 1]} : vector<2x64xf32> to vector<2x16xf32>
    %322 = vector.broadcast %12 : vector<1x32xf32> to vector<2x32xf32>
    %323 = arith.mulf %320, %322 : vector<2x32xf32>
    %cst_108 = arith.constant dense<0.000000e+00> : vector<2xf32>
    %324 = vector.multi_reduction <add>, %323, %cst_108 [1] : vector<2x32xf32> to vector<2xf32>
    %325 = vector.shape_cast %324 : vector<2xf32> to vector<2x1xf32>
    %326 = vector.broadcast %13 : vector<1x1xf32> to vector<2x1xf32>
    %327 = arith.addf %325, %326 : vector<2x1xf32>
    %328 = arith.negf %327 : vector<2x1xf32>
    %329 = math.exp %328 : vector<2x1xf32>
    %cst_109 = arith.constant 1.000000e+00 : f32
    %330 = vector.broadcast %cst_109 : f32 to vector<2x1xf32>
    %331 = arith.addf %330, %329 : vector<2x1xf32>
    %332 = arith.divf %330, %331 : vector<2x1xf32>
    %333 = tpu.concatenate %316, %332 in 1 : vector<2x16xf32>, vector<2x1xf32> -> vector<2x17xf32>
    %cst_110 = arith.constant dense<0.000000e+00> : vector<2x128xf32>
    %334 = tpu.matmul %316, %15, %cst_110 {dimension_numbers = #tpu.dot_dimension_numbers<[1], [0], [0], [1], [0, 0, 1, 1], [], []>} : vector<2x16xf32>, vector<16x128xf32>, vector<2x128xf32> -> vector<2x128xf32>
    %335 = vector.broadcast %17 : vector<1x128xf32> to vector<2x128xf32>
    %336 = arith.addf %334, %335 : vector<2x128xf32>
    %c1_111 = arith.constant 1 : index
    %c0_112 = arith.constant 0 : index
    %c0_113 = arith.constant 0 : index
    %c0_114 = arith.constant 0 : index
    %337 = vector.load %arg2[%c1_111, %c0_112, %c0_113, %c0_114] : memref<3x4x2x16xf32, #tpu.memory_space<vmem>>, vector<1x1x2x16xf32>
    %338 = vector.shape_cast %337 : vector<1x1x2x16xf32> to vector<2x16xf32>
    %cst_115 = arith.constant dense<0.000000e+00> : vector<2x128xf32>
    %339 = tpu.matmul %338, %14, %cst_115 {dimension_numbers = #tpu.dot_dimension_numbers<[1], [0], [0], [1], [0, 0, 1, 1], [], []>} : vector<2x16xf32>, vector<16x128xf32>, vector<2x128xf32> -> vector<2x128xf32>
    %340 = arith.addf %339, %336 : vector<2x128xf32>
    %cst_116 = arith.constant dense<0.000000e+00> : vector<2x128xf32>
    %341 = tpu.matmul %26, %16, %cst_116 {dimension_numbers = #tpu.dot_dimension_numbers<[1], [0], [0], [1], [0, 0, 1, 1], [], []>} : vector<2x32xf32>, vector<32x128xf32>, vector<2x128xf32> -> vector<2x128xf32>
    %342 = arith.addf %340, %341 : vector<2x128xf32>
    %343 = vector.extract_strided_slice %342 {offsets = [0, 0], sizes = [2, 32], strides = [1, 1]} : vector<2x128xf32> to vector<2x32xf32>
    %344 = arith.negf %343 : vector<2x32xf32>
    %345 = math.exp %344 : vector<2x32xf32>
    %cst_117 = arith.constant 1.000000e+00 : f32
    %346 = vector.broadcast %cst_117 : f32 to vector<2x32xf32>
    %347 = arith.addf %346, %345 : vector<2x32xf32>
    %348 = arith.divf %346, %347 : vector<2x32xf32>
    %349 = vector.extract_strided_slice %342 {offsets = [0, 32], sizes = [2, 32], strides = [1, 1]} : vector<2x128xf32> to vector<2x32xf32>
    %350 = arith.negf %349 : vector<2x32xf32>
    %351 = math.exp %350 : vector<2x32xf32>
    %cst_118 = arith.constant 1.000000e+00 : f32
    %352 = vector.broadcast %cst_118 : f32 to vector<2x32xf32>
    %353 = arith.addf %352, %351 : vector<2x32xf32>
    %354 = arith.divf %352, %353 : vector<2x32xf32>
    %355 = vector.extract_strided_slice %342 {offsets = [0, 64], sizes = [2, 32], strides = [1, 1]} : vector<2x128xf32> to vector<2x32xf32>
    %356 = math.tanh %355 : vector<2x32xf32>
    %357 = vector.extract_strided_slice %342 {offsets = [0, 96], sizes = [2, 32], strides = [1, 1]} : vector<2x128xf32> to vector<2x32xf32>
    %358 = arith.negf %357 : vector<2x32xf32>
    %359 = math.exp %358 : vector<2x32xf32>
    %cst_119 = arith.constant 1.000000e+00 : f32
    %360 = vector.broadcast %cst_119 : f32 to vector<2x32xf32>
    %361 = arith.addf %360, %359 : vector<2x32xf32>
    %362 = arith.divf %360, %361 : vector<2x32xf32>
    %363 = arith.mulf %354, %26 : vector<2x32xf32>
    %364 = arith.mulf %348, %356 : vector<2x32xf32>
    %365 = arith.addf %363, %364 : vector<2x32xf32>
    %366 = math.tanh %365 : vector<2x32xf32>
    %367 = arith.mulf %362, %366 : vector<2x32xf32>
    %c1_120 = arith.constant 1 : index
    %c1_121 = arith.constant 1 : index
    %c0_122 = arith.constant 0 : index
    %c0_123 = arith.constant 0 : index
    %368 = vector.load %arg2[%c1_120, %c1_121, %c0_122, %c0_123] : memref<3x4x2x16xf32, #tpu.memory_space<vmem>>, vector<1x1x2x16xf32>
    %369 = vector.shape_cast %368 : vector<1x1x2x16xf32> to vector<2x16xf32>
    %cst_124 = arith.constant dense<0.000000e+00> : vector<2x128xf32>
    %370 = tpu.matmul %369, %14, %cst_124 {dimension_numbers = #tpu.dot_dimension_numbers<[1], [0], [0], [1], [0, 0, 1, 1], [], []>} : vector<2x16xf32>, vector<16x128xf32>, vector<2x128xf32> -> vector<2x128xf32>
    %371 = arith.addf %370, %336 : vector<2x128xf32>
    %cst_125 = arith.constant dense<0.000000e+00> : vector<2x128xf32>
    %372 = tpu.matmul %367, %16, %cst_125 {dimension_numbers = #tpu.dot_dimension_numbers<[1], [0], [0], [1], [0, 0, 1, 1], [], []>} : vector<2x32xf32>, vector<32x128xf32>, vector<2x128xf32> -> vector<2x128xf32>
    %373 = arith.addf %371, %372 : vector<2x128xf32>
    %374 = vector.extract_strided_slice %373 {offsets = [0, 0], sizes = [2, 32], strides = [1, 1]} : vector<2x128xf32> to vector<2x32xf32>
    %375 = arith.negf %374 : vector<2x32xf32>
    %376 = math.exp %375 : vector<2x32xf32>
    %cst_126 = arith.constant 1.000000e+00 : f32
    %377 = vector.broadcast %cst_126 : f32 to vector<2x32xf32>
    %378 = arith.addf %377, %376 : vector<2x32xf32>
    %379 = arith.divf %377, %378 : vector<2x32xf32>
    %380 = vector.extract_strided_slice %373 {offsets = [0, 32], sizes = [2, 32], strides = [1, 1]} : vector<2x128xf32> to vector<2x32xf32>
    %381 = arith.negf %380 : vector<2x32xf32>
    %382 = math.exp %381 : vector<2x32xf32>
    %cst_127 = arith.constant 1.000000e+00 : f32
    %383 = vector.broadcast %cst_127 : f32 to vector<2x32xf32>
    %384 = arith.addf %383, %382 : vector<2x32xf32>
    %385 = arith.divf %383, %384 : vector<2x32xf32>
    %386 = vector.extract_strided_slice %373 {offsets = [0, 64], sizes = [2, 32], strides = [1, 1]} : vector<2x128xf32> to vector<2x32xf32>
    %387 = math.tanh %386 : vector<2x32xf32>
    %388 = vector.extract_strided_slice %373 {offsets = [0, 96], sizes = [2, 32], strides = [1, 1]} : vector<2x128xf32> to vector<2x32xf32>
    %389 = arith.negf %388 : vector<2x32xf32>
    %390 = math.exp %389 : vector<2x32xf32>
    %cst_128 = arith.constant 1.000000e+00 : f32
    %391 = vector.broadcast %cst_128 : f32 to vector<2x32xf32>
    %392 = arith.addf %391, %390 : vector<2x32xf32>
    %393 = arith.divf %391, %392 : vector<2x32xf32>
    %394 = arith.mulf %385, %365 : vector<2x32xf32>
    %395 = arith.mulf %379, %387 : vector<2x32xf32>
    %396 = arith.addf %394, %395 : vector<2x32xf32>
    %397 = math.tanh %396 : vector<2x32xf32>
    %398 = arith.mulf %393, %397 : vector<2x32xf32>
    %c1_129 = arith.constant 1 : index
    %c2_130 = arith.constant 2 : index
    %c0_131 = arith.constant 0 : index
    %c0_132 = arith.constant 0 : index
    %399 = vector.load %arg2[%c1_129, %c2_130, %c0_131, %c0_132] : memref<3x4x2x16xf32, #tpu.memory_space<vmem>>, vector<1x1x2x16xf32>
    %400 = vector.shape_cast %399 : vector<1x1x2x16xf32> to vector<2x16xf32>
    %cst_133 = arith.constant dense<0.000000e+00> : vector<2x128xf32>
    %401 = tpu.matmul %400, %14, %cst_133 {dimension_numbers = #tpu.dot_dimension_numbers<[1], [0], [0], [1], [0, 0, 1, 1], [], []>} : vector<2x16xf32>, vector<16x128xf32>, vector<2x128xf32> -> vector<2x128xf32>
    %402 = arith.addf %401, %336 : vector<2x128xf32>
    %cst_134 = arith.constant dense<0.000000e+00> : vector<2x128xf32>
    %403 = tpu.matmul %398, %16, %cst_134 {dimension_numbers = #tpu.dot_dimension_numbers<[1], [0], [0], [1], [0, 0, 1, 1], [], []>} : vector<2x32xf32>, vector<32x128xf32>, vector<2x128xf32> -> vector<2x128xf32>
    %404 = arith.addf %402, %403 : vector<2x128xf32>
    %405 = vector.extract_strided_slice %404 {offsets = [0, 0], sizes = [2, 32], strides = [1, 1]} : vector<2x128xf32> to vector<2x32xf32>
    %406 = arith.negf %405 : vector<2x32xf32>
    %407 = math.exp %406 : vector<2x32xf32>
    %cst_135 = arith.constant 1.000000e+00 : f32
    %408 = vector.broadcast %cst_135 : f32 to vector<2x32xf32>
    %409 = arith.addf %408, %407 : vector<2x32xf32>
    %410 = arith.divf %408, %409 : vector<2x32xf32>
    %411 = vector.extract_strided_slice %404 {offsets = [0, 32], sizes = [2, 32], strides = [1, 1]} : vector<2x128xf32> to vector<2x32xf32>
    %412 = arith.negf %411 : vector<2x32xf32>
    %413 = math.exp %412 : vector<2x32xf32>
    %cst_136 = arith.constant 1.000000e+00 : f32
    %414 = vector.broadcast %cst_136 : f32 to vector<2x32xf32>
    %415 = arith.addf %414, %413 : vector<2x32xf32>
    %416 = arith.divf %414, %415 : vector<2x32xf32>
    %417 = vector.extract_strided_slice %404 {offsets = [0, 64], sizes = [2, 32], strides = [1, 1]} : vector<2x128xf32> to vector<2x32xf32>
    %418 = math.tanh %417 : vector<2x32xf32>
    %419 = vector.extract_strided_slice %404 {offsets = [0, 96], sizes = [2, 32], strides = [1, 1]} : vector<2x128xf32> to vector<2x32xf32>
    %420 = arith.negf %419 : vector<2x32xf32>
    %421 = math.exp %420 : vector<2x32xf32>
    %cst_137 = arith.constant 1.000000e+00 : f32
    %422 = vector.broadcast %cst_137 : f32 to vector<2x32xf32>
    %423 = arith.addf %422, %421 : vector<2x32xf32>
    %424 = arith.divf %422, %423 : vector<2x32xf32>
    %425 = arith.mulf %416, %396 : vector<2x32xf32>
    %426 = arith.mulf %410, %418 : vector<2x32xf32>
    %427 = arith.addf %425, %426 : vector<2x32xf32>
    %428 = math.tanh %427 : vector<2x32xf32>
    %429 = arith.mulf %424, %428 : vector<2x32xf32>
    %c1_138 = arith.constant 1 : index
    %c3_139 = arith.constant 3 : index
    %c0_140 = arith.constant 0 : index
    %c0_141 = arith.constant 0 : index
    %430 = vector.load %arg2[%c1_138, %c3_139, %c0_140, %c0_141] : memref<3x4x2x16xf32, #tpu.memory_space<vmem>>, vector<1x1x2x16xf32>
    %431 = vector.shape_cast %430 : vector<1x1x2x16xf32> to vector<2x16xf32>
    %cst_142 = arith.constant dense<0.000000e+00> : vector<2x128xf32>
    %432 = tpu.matmul %431, %14, %cst_142 {dimension_numbers = #tpu.dot_dimension_numbers<[1], [0], [0], [1], [0, 0, 1, 1], [], []>} : vector<2x16xf32>, vector<16x128xf32>, vector<2x128xf32> -> vector<2x128xf32>
    %433 = arith.addf %432, %336 : vector<2x128xf32>
    %cst_143 = arith.constant dense<0.000000e+00> : vector<2x128xf32>
    %434 = tpu.matmul %429, %16, %cst_143 {dimension_numbers = #tpu.dot_dimension_numbers<[1], [0], [0], [1], [0, 0, 1, 1], [], []>} : vector<2x32xf32>, vector<32x128xf32>, vector<2x128xf32> -> vector<2x128xf32>
    %435 = arith.addf %433, %434 : vector<2x128xf32>
    %436 = vector.extract_strided_slice %435 {offsets = [0, 0], sizes = [2, 32], strides = [1, 1]} : vector<2x128xf32> to vector<2x32xf32>
    %437 = arith.negf %436 : vector<2x32xf32>
    %438 = math.exp %437 : vector<2x32xf32>
    %cst_144 = arith.constant 1.000000e+00 : f32
    %439 = vector.broadcast %cst_144 : f32 to vector<2x32xf32>
    %440 = arith.addf %439, %438 : vector<2x32xf32>
    %441 = arith.divf %439, %440 : vector<2x32xf32>
    %442 = vector.extract_strided_slice %435 {offsets = [0, 32], sizes = [2, 32], strides = [1, 1]} : vector<2x128xf32> to vector<2x32xf32>
    %443 = arith.negf %442 : vector<2x32xf32>
    %444 = math.exp %443 : vector<2x32xf32>
    %cst_145 = arith.constant 1.000000e+00 : f32
    %445 = vector.broadcast %cst_145 : f32 to vector<2x32xf32>
    %446 = arith.addf %445, %444 : vector<2x32xf32>
    %447 = arith.divf %445, %446 : vector<2x32xf32>
    %448 = vector.extract_strided_slice %435 {offsets = [0, 64], sizes = [2, 32], strides = [1, 1]} : vector<2x128xf32> to vector<2x32xf32>
    %449 = math.tanh %448 : vector<2x32xf32>
    %450 = vector.extract_strided_slice %435 {offsets = [0, 96], sizes = [2, 32], strides = [1, 1]} : vector<2x128xf32> to vector<2x32xf32>
    %451 = arith.negf %450 : vector<2x32xf32>
    %452 = math.exp %451 : vector<2x32xf32>
    %cst_146 = arith.constant 1.000000e+00 : f32
    %453 = vector.broadcast %cst_146 : f32 to vector<2x32xf32>
    %454 = arith.addf %453, %452 : vector<2x32xf32>
    %455 = arith.divf %453, %454 : vector<2x32xf32>
    %456 = arith.mulf %447, %427 : vector<2x32xf32>
    %457 = arith.mulf %441, %449 : vector<2x32xf32>
    %458 = arith.addf %456, %457 : vector<2x32xf32>
    %459 = math.tanh %458 : vector<2x32xf32>
    %460 = arith.mulf %455, %459 : vector<2x32xf32>
    %461 = tpu.concatenate %367, %398, %429, %460 in 1 : vector<2x32xf32>, vector<2x32xf32>, vector<2x32xf32>, vector<2x32xf32> -> vector<2x128xf32>
    %462 = vector.broadcast %0 : vector<1x16xf32> to vector<2x16xf32>
    %463 = arith.addf %321, %462 : vector<2x16xf32>
    %464 = vector.shape_cast %463 : vector<2x16xf32> to vector<2x1x16xf32>
    %465 = vector.broadcast %464 : vector<2x1x16xf32> to vector<2x16x16xf32>
    %466 = arith.addf %25, %465 : vector<2x16x16xf32>
    %cst_147 = arith.constant 0.000000e+00 : f32
    %467 = vector.broadcast %cst_147 : f32 to vector<2x16x16xf32>
    %468 = arith.maximumf %466, %467 : vector<2x16x16xf32>
    %469 = vector.shape_cast %1 : vector<1x16xf32> to vector<1x1x16xf32>
    %470 = vector.broadcast %469 : vector<1x1x16xf32> to vector<2x16x16xf32>
    %471 = arith.mulf %468, %470 : vector<2x16x16xf32>
    %cst_148 = arith.constant dense<0.000000e+00> : vector<2x16xf32>
    %472 = vector.multi_reduction <add>, %471, %cst_148 [2] : vector<2x16x16xf32> to vector<2x16xf32>
    %473 = vector.broadcast %2 : vector<1x1xf32> to vector<2x16xf32>
    %474 = arith.addf %472, %473 : vector<2x16xf32>
    %cst_149 = arith.constant dense<0xFF800000> : vector<2xf32>
    %475 = vector.multi_reduction <maximumf>, %474, %cst_149 [1] : vector<2x16xf32> to vector<2xf32>
    %476 = vector.shape_cast %475 : vector<2xf32> to vector<2x1xf32>
    %477 = vector.broadcast %476 : vector<2x1xf32> to vector<2x16xf32>
    %478 = arith.subf %474, %477 : vector<2x16xf32>
    %479 = math.exp %478 : vector<2x16xf32>
    %cst_150 = arith.constant dense<0.000000e+00> : vector<2xf32>
    %480 = vector.multi_reduction <add>, %479, %cst_150 [1] : vector<2x16xf32> to vector<2xf32>
    %481 = vector.shape_cast %480 : vector<2xf32> to vector<2x1xf32>
    %482 = tpu.reciprocal %481 : vector<2x1xf32> -> vector<2x1xf32>
    %483 = vector.broadcast %482 : vector<2x1xf32> to vector<2x16xf32>
    %484 = arith.mulf %479, %483 : vector<2x16xf32>
    %485 = vector.shape_cast %484 : vector<2x16xf32> to vector<2x16x1xf32>
    %486 = vector.broadcast %485 : vector<2x16x1xf32> to vector<2x16x32xf32>
    %487 = arith.mulf %18, %486 : vector<2x16x32xf32>
    %cst_151 = arith.constant dense<0.000000e+00> : vector<2x32xf32>
    %488 = vector.multi_reduction <add>, %487, %cst_151 [1] : vector<2x16x32xf32> to vector<2x32xf32>
    %cst_152 = arith.constant dense<0.000000e+00> : vector<2x32xf32>
    %489 = tpu.matmul %488, %3, %cst_152 {dimension_numbers = #tpu.dot_dimension_numbers<[1], [0], [0], [1], [0, 0, 1, 1], [], []>} : vector<2x32xf32>, vector<32x32xf32>, vector<2x32xf32> -> vector<2x32xf32>
    %490 = vector.broadcast %4 : vector<1x32xf32> to vector<2x32xf32>
    %491 = arith.addf %489, %490 : vector<2x32xf32>
    %492 = tpu.concatenate %491, %309 in 1 : vector<2x32xf32>, vector<2x32xf32> -> vector<2x64xf32>
    %cst_153 = arith.constant dense<0.000000e+00> : vector<2x32xf32>
    %493 = tpu.matmul %492, %5, %cst_153 {dimension_numbers = #tpu.dot_dimension_numbers<[1], [0], [0], [1], [0, 0, 1, 1], [], []>} : vector<2x64xf32>, vector<64x32xf32>, vector<2x32xf32> -> vector<2x32xf32>
    %494 = vector.broadcast %6 : vector<1x32xf32> to vector<2x32xf32>
    %495 = arith.addf %493, %494 : vector<2x32xf32>
    %cst_154 = arith.constant 0.000000e+00 : f32
    %496 = vector.broadcast %cst_154 : f32 to vector<2x32xf32>
    %497 = arith.maximumf %495, %496 : vector<2x32xf32>
    %498 = tpu.concatenate %497, %309 in 1 : vector<2x32xf32>, vector<2x32xf32> -> vector<2x64xf32>
    %cst_155 = arith.constant dense<0.000000e+00> : vector<2x128xf32>
    %499 = tpu.matmul %498, %7, %cst_155 {dimension_numbers = #tpu.dot_dimension_numbers<[1], [0], [0], [1], [0, 0, 1, 1], [], []>} : vector<2x64xf32>, vector<64x128xf32>, vector<2x128xf32> -> vector<2x128xf32>
    %500 = vector.broadcast %8 : vector<1x128xf32> to vector<2x128xf32>
    %501 = arith.addf %499, %500 : vector<2x128xf32>
    %502 = vector.extract_strided_slice %501 {offsets = [0, 0], sizes = [2, 32], strides = [1, 1]} : vector<2x128xf32> to vector<2x32xf32>
    %503 = arith.negf %502 : vector<2x32xf32>
    %504 = math.exp %503 : vector<2x32xf32>
    %cst_156 = arith.constant 1.000000e+00 : f32
    %505 = vector.broadcast %cst_156 : f32 to vector<2x32xf32>
    %506 = arith.addf %505, %504 : vector<2x32xf32>
    %507 = arith.divf %505, %506 : vector<2x32xf32>
    %508 = vector.extract_strided_slice %501 {offsets = [0, 32], sizes = [2, 32], strides = [1, 1]} : vector<2x128xf32> to vector<2x32xf32>
    %509 = arith.negf %508 : vector<2x32xf32>
    %510 = math.exp %509 : vector<2x32xf32>
    %cst_157 = arith.constant 1.000000e+00 : f32
    %511 = vector.broadcast %cst_157 : f32 to vector<2x32xf32>
    %512 = arith.addf %511, %510 : vector<2x32xf32>
    %513 = arith.divf %511, %512 : vector<2x32xf32>
    %514 = vector.extract_strided_slice %501 {offsets = [0, 64], sizes = [2, 32], strides = [1, 1]} : vector<2x128xf32> to vector<2x32xf32>
    %515 = math.tanh %514 : vector<2x32xf32>
    %516 = vector.extract_strided_slice %501 {offsets = [0, 96], sizes = [2, 32], strides = [1, 1]} : vector<2x128xf32> to vector<2x32xf32>
    %517 = arith.negf %516 : vector<2x32xf32>
    %518 = math.exp %517 : vector<2x32xf32>
    %cst_158 = arith.constant 1.000000e+00 : f32
    %519 = vector.broadcast %cst_158 : f32 to vector<2x32xf32>
    %520 = arith.addf %519, %518 : vector<2x32xf32>
    %521 = arith.divf %519, %520 : vector<2x32xf32>
    %522 = arith.mulf %513, %307 : vector<2x32xf32>
    %523 = arith.mulf %507, %515 : vector<2x32xf32>
    %524 = arith.addf %522, %523 : vector<2x32xf32>
    %525 = math.tanh %524 : vector<2x32xf32>
    %526 = arith.mulf %521, %525 : vector<2x32xf32>
    %527 = tpu.concatenate %309, %526 in 1 : vector<2x32xf32>, vector<2x32xf32> -> vector<2x64xf32>
    %cst_159 = arith.constant dense<0.000000e+00> : vector<2x64xf32>
    %528 = tpu.matmul %527, %9, %cst_159 {dimension_numbers = #tpu.dot_dimension_numbers<[1], [0], [0], [1], [0, 0, 1, 1], [], []>} : vector<2x64xf32>, vector<64x64xf32>, vector<2x64xf32> -> vector<2x64xf32>
    %529 = vector.extract_strided_slice %528 {offsets = [0, 0], sizes = [2, 16], strides = [1, 1]} : vector<2x64xf32> to vector<2x16xf32>
    %530 = vector.broadcast %10 : vector<1x16xf32> to vector<2x16xf32>
    %531 = arith.addf %529, %530 : vector<2x16xf32>
    %cst_160 = arith.constant 0.000000e+00 : f32
    %532 = vector.broadcast %cst_160 : f32 to vector<2x16xf32>
    %533 = arith.maximumf %531, %532 : vector<2x16xf32>
    %534 = vector.extract_strided_slice %528 {offsets = [0, 16], sizes = [2, 32], strides = [1, 1]} : vector<2x64xf32> to vector<2x32xf32>
    %535 = vector.broadcast %11 : vector<1x32xf32> to vector<2x32xf32>
    %536 = arith.addf %534, %535 : vector<2x32xf32>
    %537 = math.tanh %536 : vector<2x32xf32>
    %538 = vector.broadcast %12 : vector<1x32xf32> to vector<2x32xf32>
    %539 = arith.mulf %537, %538 : vector<2x32xf32>
    %cst_161 = arith.constant dense<0.000000e+00> : vector<2xf32>
    %540 = vector.multi_reduction <add>, %539, %cst_161 [1] : vector<2x32xf32> to vector<2xf32>
    %541 = vector.shape_cast %540 : vector<2xf32> to vector<2x1xf32>
    %542 = vector.broadcast %13 : vector<1x1xf32> to vector<2x1xf32>
    %543 = arith.addf %541, %542 : vector<2x1xf32>
    %544 = arith.negf %543 : vector<2x1xf32>
    %545 = math.exp %544 : vector<2x1xf32>
    %cst_162 = arith.constant 1.000000e+00 : f32
    %546 = vector.broadcast %cst_162 : f32 to vector<2x1xf32>
    %547 = arith.addf %546, %545 : vector<2x1xf32>
    %548 = arith.divf %546, %547 : vector<2x1xf32>
    %549 = tpu.concatenate %533, %548 in 1 : vector<2x16xf32>, vector<2x1xf32> -> vector<2x17xf32>
    %cst_163 = arith.constant dense<0.000000e+00> : vector<2x128xf32>
    %550 = tpu.matmul %533, %15, %cst_163 {dimension_numbers = #tpu.dot_dimension_numbers<[1], [0], [0], [1], [0, 0, 1, 1], [], []>} : vector<2x16xf32>, vector<16x128xf32>, vector<2x128xf32> -> vector<2x128xf32>
    %551 = vector.broadcast %17 : vector<1x128xf32> to vector<2x128xf32>
    %552 = arith.addf %550, %551 : vector<2x128xf32>
    %c2_164 = arith.constant 2 : index
    %c0_165 = arith.constant 0 : index
    %c0_166 = arith.constant 0 : index
    %c0_167 = arith.constant 0 : index
    %553 = vector.load %arg2[%c2_164, %c0_165, %c0_166, %c0_167] : memref<3x4x2x16xf32, #tpu.memory_space<vmem>>, vector<1x1x2x16xf32>
    %554 = vector.shape_cast %553 : vector<1x1x2x16xf32> to vector<2x16xf32>
    %cst_168 = arith.constant dense<0.000000e+00> : vector<2x128xf32>
    %555 = tpu.matmul %554, %14, %cst_168 {dimension_numbers = #tpu.dot_dimension_numbers<[1], [0], [0], [1], [0, 0, 1, 1], [], []>} : vector<2x16xf32>, vector<16x128xf32>, vector<2x128xf32> -> vector<2x128xf32>
    %556 = arith.addf %555, %552 : vector<2x128xf32>
    %cst_169 = arith.constant dense<0.000000e+00> : vector<2x128xf32>
    %557 = tpu.matmul %26, %16, %cst_169 {dimension_numbers = #tpu.dot_dimension_numbers<[1], [0], [0], [1], [0, 0, 1, 1], [], []>} : vector<2x32xf32>, vector<32x128xf32>, vector<2x128xf32> -> vector<2x128xf32>
    %558 = arith.addf %556, %557 : vector<2x128xf32>
    %559 = vector.extract_strided_slice %558 {offsets = [0, 0], sizes = [2, 32], strides = [1, 1]} : vector<2x128xf32> to vector<2x32xf32>
    %560 = arith.negf %559 : vector<2x32xf32>
    %561 = math.exp %560 : vector<2x32xf32>
    %cst_170 = arith.constant 1.000000e+00 : f32
    %562 = vector.broadcast %cst_170 : f32 to vector<2x32xf32>
    %563 = arith.addf %562, %561 : vector<2x32xf32>
    %564 = arith.divf %562, %563 : vector<2x32xf32>
    %565 = vector.extract_strided_slice %558 {offsets = [0, 32], sizes = [2, 32], strides = [1, 1]} : vector<2x128xf32> to vector<2x32xf32>
    %566 = arith.negf %565 : vector<2x32xf32>
    %567 = math.exp %566 : vector<2x32xf32>
    %cst_171 = arith.constant 1.000000e+00 : f32
    %568 = vector.broadcast %cst_171 : f32 to vector<2x32xf32>
    %569 = arith.addf %568, %567 : vector<2x32xf32>
    %570 = arith.divf %568, %569 : vector<2x32xf32>
    %571 = vector.extract_strided_slice %558 {offsets = [0, 64], sizes = [2, 32], strides = [1, 1]} : vector<2x128xf32> to vector<2x32xf32>
    %572 = math.tanh %571 : vector<2x32xf32>
    %573 = vector.extract_strided_slice %558 {offsets = [0, 96], sizes = [2, 32], strides = [1, 1]} : vector<2x128xf32> to vector<2x32xf32>
    %574 = arith.negf %573 : vector<2x32xf32>
    %575 = math.exp %574 : vector<2x32xf32>
    %cst_172 = arith.constant 1.000000e+00 : f32
    %576 = vector.broadcast %cst_172 : f32 to vector<2x32xf32>
    %577 = arith.addf %576, %575 : vector<2x32xf32>
    %578 = arith.divf %576, %577 : vector<2x32xf32>
    %579 = arith.mulf %570, %26 : vector<2x32xf32>
    %580 = arith.mulf %564, %572 : vector<2x32xf32>
    %581 = arith.addf %579, %580 : vector<2x32xf32>
    %582 = math.tanh %581 : vector<2x32xf32>
    %583 = arith.mulf %578, %582 : vector<2x32xf32>
    %c2_173 = arith.constant 2 : index
    %c1_174 = arith.constant 1 : index
    %c0_175 = arith.constant 0 : index
    %c0_176 = arith.constant 0 : index
    %584 = vector.load %arg2[%c2_173, %c1_174, %c0_175, %c0_176] : memref<3x4x2x16xf32, #tpu.memory_space<vmem>>, vector<1x1x2x16xf32>
    %585 = vector.shape_cast %584 : vector<1x1x2x16xf32> to vector<2x16xf32>
    %cst_177 = arith.constant dense<0.000000e+00> : vector<2x128xf32>
    %586 = tpu.matmul %585, %14, %cst_177 {dimension_numbers = #tpu.dot_dimension_numbers<[1], [0], [0], [1], [0, 0, 1, 1], [], []>} : vector<2x16xf32>, vector<16x128xf32>, vector<2x128xf32> -> vector<2x128xf32>
    %587 = arith.addf %586, %552 : vector<2x128xf32>
    %cst_178 = arith.constant dense<0.000000e+00> : vector<2x128xf32>
    %588 = tpu.matmul %583, %16, %cst_178 {dimension_numbers = #tpu.dot_dimension_numbers<[1], [0], [0], [1], [0, 0, 1, 1], [], []>} : vector<2x32xf32>, vector<32x128xf32>, vector<2x128xf32> -> vector<2x128xf32>
    %589 = arith.addf %587, %588 : vector<2x128xf32>
    %590 = vector.extract_strided_slice %589 {offsets = [0, 0], sizes = [2, 32], strides = [1, 1]} : vector<2x128xf32> to vector<2x32xf32>
    %591 = arith.negf %590 : vector<2x32xf32>
    %592 = math.exp %591 : vector<2x32xf32>
    %cst_179 = arith.constant 1.000000e+00 : f32
    %593 = vector.broadcast %cst_179 : f32 to vector<2x32xf32>
    %594 = arith.addf %593, %592 : vector<2x32xf32>
    %595 = arith.divf %593, %594 : vector<2x32xf32>
    %596 = vector.extract_strided_slice %589 {offsets = [0, 32], sizes = [2, 32], strides = [1, 1]} : vector<2x128xf32> to vector<2x32xf32>
    %597 = arith.negf %596 : vector<2x32xf32>
    %598 = math.exp %597 : vector<2x32xf32>
    %cst_180 = arith.constant 1.000000e+00 : f32
    %599 = vector.broadcast %cst_180 : f32 to vector<2x32xf32>
    %600 = arith.addf %599, %598 : vector<2x32xf32>
    %601 = arith.divf %599, %600 : vector<2x32xf32>
    %602 = vector.extract_strided_slice %589 {offsets = [0, 64], sizes = [2, 32], strides = [1, 1]} : vector<2x128xf32> to vector<2x32xf32>
    %603 = math.tanh %602 : vector<2x32xf32>
    %604 = vector.extract_strided_slice %589 {offsets = [0, 96], sizes = [2, 32], strides = [1, 1]} : vector<2x128xf32> to vector<2x32xf32>
    %605 = arith.negf %604 : vector<2x32xf32>
    %606 = math.exp %605 : vector<2x32xf32>
    %cst_181 = arith.constant 1.000000e+00 : f32
    %607 = vector.broadcast %cst_181 : f32 to vector<2x32xf32>
    %608 = arith.addf %607, %606 : vector<2x32xf32>
    %609 = arith.divf %607, %608 : vector<2x32xf32>
    %610 = arith.mulf %601, %581 : vector<2x32xf32>
    %611 = arith.mulf %595, %603 : vector<2x32xf32>
    %612 = arith.addf %610, %611 : vector<2x32xf32>
    %613 = math.tanh %612 : vector<2x32xf32>
    %614 = arith.mulf %609, %613 : vector<2x32xf32>
    %c2_182 = arith.constant 2 : index
    %c2_183 = arith.constant 2 : index
    %c0_184 = arith.constant 0 : index
    %c0_185 = arith.constant 0 : index
    %615 = vector.load %arg2[%c2_182, %c2_183, %c0_184, %c0_185] : memref<3x4x2x16xf32, #tpu.memory_space<vmem>>, vector<1x1x2x16xf32>
    %616 = vector.shape_cast %615 : vector<1x1x2x16xf32> to vector<2x16xf32>
    %cst_186 = arith.constant dense<0.000000e+00> : vector<2x128xf32>
    %617 = tpu.matmul %616, %14, %cst_186 {dimension_numbers = #tpu.dot_dimension_numbers<[1], [0], [0], [1], [0, 0, 1, 1], [], []>} : vector<2x16xf32>, vector<16x128xf32>, vector<2x128xf32> -> vector<2x128xf32>
    %618 = arith.addf %617, %552 : vector<2x128xf32>
    %cst_187 = arith.constant dense<0.000000e+00> : vector<2x128xf32>
    %619 = tpu.matmul %614, %16, %cst_187 {dimension_numbers = #tpu.dot_dimension_numbers<[1], [0], [0], [1], [0, 0, 1, 1], [], []>} : vector<2x32xf32>, vector<32x128xf32>, vector<2x128xf32> -> vector<2x128xf32>
    %620 = arith.addf %618, %619 : vector<2x128xf32>
    %621 = vector.extract_strided_slice %620 {offsets = [0, 0], sizes = [2, 32], strides = [1, 1]} : vector<2x128xf32> to vector<2x32xf32>
    %622 = arith.negf %621 : vector<2x32xf32>
    %623 = math.exp %622 : vector<2x32xf32>
    %cst_188 = arith.constant 1.000000e+00 : f32
    %624 = vector.broadcast %cst_188 : f32 to vector<2x32xf32>
    %625 = arith.addf %624, %623 : vector<2x32xf32>
    %626 = arith.divf %624, %625 : vector<2x32xf32>
    %627 = vector.extract_strided_slice %620 {offsets = [0, 32], sizes = [2, 32], strides = [1, 1]} : vector<2x128xf32> to vector<2x32xf32>
    %628 = arith.negf %627 : vector<2x32xf32>
    %629 = math.exp %628 : vector<2x32xf32>
    %cst_189 = arith.constant 1.000000e+00 : f32
    %630 = vector.broadcast %cst_189 : f32 to vector<2x32xf32>
    %631 = arith.addf %630, %629 : vector<2x32xf32>
    %632 = arith.divf %630, %631 : vector<2x32xf32>
    %633 = vector.extract_strided_slice %620 {offsets = [0, 64], sizes = [2, 32], strides = [1, 1]} : vector<2x128xf32> to vector<2x32xf32>
    %634 = math.tanh %633 : vector<2x32xf32>
    %635 = vector.extract_strided_slice %620 {offsets = [0, 96], sizes = [2, 32], strides = [1, 1]} : vector<2x128xf32> to vector<2x32xf32>
    %636 = arith.negf %635 : vector<2x32xf32>
    %637 = math.exp %636 : vector<2x32xf32>
    %cst_190 = arith.constant 1.000000e+00 : f32
    %638 = vector.broadcast %cst_190 : f32 to vector<2x32xf32>
    %639 = arith.addf %638, %637 : vector<2x32xf32>
    %640 = arith.divf %638, %639 : vector<2x32xf32>
    %641 = arith.mulf %632, %612 : vector<2x32xf32>
    %642 = arith.mulf %626, %634 : vector<2x32xf32>
    %643 = arith.addf %641, %642 : vector<2x32xf32>
    %644 = math.tanh %643 : vector<2x32xf32>
    %645 = arith.mulf %640, %644 : vector<2x32xf32>
    %c2_191 = arith.constant 2 : index
    %c3_192 = arith.constant 3 : index
    %c0_193 = arith.constant 0 : index
    %c0_194 = arith.constant 0 : index
    %646 = vector.load %arg2[%c2_191, %c3_192, %c0_193, %c0_194] : memref<3x4x2x16xf32, #tpu.memory_space<vmem>>, vector<1x1x2x16xf32>
    %647 = vector.shape_cast %646 : vector<1x1x2x16xf32> to vector<2x16xf32>
    %cst_195 = arith.constant dense<0.000000e+00> : vector<2x128xf32>
    %648 = tpu.matmul %647, %14, %cst_195 {dimension_numbers = #tpu.dot_dimension_numbers<[1], [0], [0], [1], [0, 0, 1, 1], [], []>} : vector<2x16xf32>, vector<16x128xf32>, vector<2x128xf32> -> vector<2x128xf32>
    %649 = arith.addf %648, %552 : vector<2x128xf32>
    %cst_196 = arith.constant dense<0.000000e+00> : vector<2x128xf32>
    %650 = tpu.matmul %645, %16, %cst_196 {dimension_numbers = #tpu.dot_dimension_numbers<[1], [0], [0], [1], [0, 0, 1, 1], [], []>} : vector<2x32xf32>, vector<32x128xf32>, vector<2x128xf32> -> vector<2x128xf32>
    %651 = arith.addf %649, %650 : vector<2x128xf32>
    %652 = vector.extract_strided_slice %651 {offsets = [0, 0], sizes = [2, 32], strides = [1, 1]} : vector<2x128xf32> to vector<2x32xf32>
    %653 = arith.negf %652 : vector<2x32xf32>
    %654 = math.exp %653 : vector<2x32xf32>
    %cst_197 = arith.constant 1.000000e+00 : f32
    %655 = vector.broadcast %cst_197 : f32 to vector<2x32xf32>
    %656 = arith.addf %655, %654 : vector<2x32xf32>
    %657 = arith.divf %655, %656 : vector<2x32xf32>
    %658 = vector.extract_strided_slice %651 {offsets = [0, 32], sizes = [2, 32], strides = [1, 1]} : vector<2x128xf32> to vector<2x32xf32>
    %659 = arith.negf %658 : vector<2x32xf32>
    %660 = math.exp %659 : vector<2x32xf32>
    %cst_198 = arith.constant 1.000000e+00 : f32
    %661 = vector.broadcast %cst_198 : f32 to vector<2x32xf32>
    %662 = arith.addf %661, %660 : vector<2x32xf32>
    %663 = arith.divf %661, %662 : vector<2x32xf32>
    %664 = vector.extract_strided_slice %651 {offsets = [0, 64], sizes = [2, 32], strides = [1, 1]} : vector<2x128xf32> to vector<2x32xf32>
    %665 = math.tanh %664 : vector<2x32xf32>
    %666 = vector.extract_strided_slice %651 {offsets = [0, 96], sizes = [2, 32], strides = [1, 1]} : vector<2x128xf32> to vector<2x32xf32>
    %667 = arith.negf %666 : vector<2x32xf32>
    %668 = math.exp %667 : vector<2x32xf32>
    %cst_199 = arith.constant 1.000000e+00 : f32
    %669 = vector.broadcast %cst_199 : f32 to vector<2x32xf32>
    %670 = arith.addf %669, %668 : vector<2x32xf32>
    %671 = arith.divf %669, %670 : vector<2x32xf32>
    %672 = arith.mulf %663, %643 : vector<2x32xf32>
    %673 = arith.mulf %657, %665 : vector<2x32xf32>
    %674 = arith.addf %672, %673 : vector<2x32xf32>
    %675 = math.tanh %674 : vector<2x32xf32>
    %676 = arith.mulf %671, %675 : vector<2x32xf32>
    %677 = tpu.concatenate %583, %614, %645, %676 in 1 : vector<2x32xf32>, vector<2x32xf32>, vector<2x32xf32>, vector<2x32xf32> -> vector<2x128xf32>
    %678 = tpu.concatenate %116, %333, %549 in 1 : vector<2x17xf32>, vector<2x17xf32>, vector<2x17xf32> -> vector<2x51xf32>
    %c0_200 = arith.constant 0 : index
    %c0_201 = arith.constant 0 : index
    %679 = vector.load %arg23[%c0_200, %c0_201] : memref<2x51xf32, #tpu.memory_space<vmem>>, vector<2x51xf32>
    tpu.vector_store %arg23[%c0_200, %c0_201], %678 {strides = array<i32>} : memref<2x51xf32, #tpu.memory_space<vmem>>, vector<2x51xf32>,
    %680 = tpu.concatenate %244, %461, %677 in 1 : vector<2x128xf32>, vector<2x128xf32>, vector<2x128xf32> -> vector<2x384xf32>
    %c0_202 = arith.constant 0 : index
    %c0_203 = arith.constant 0 : index
    %681 = vector.load %arg24[%c0_202, %c0_203] : memref<2x384xf32, #tpu.memory_space<vmem>>, vector<2x384xf32>
    tpu.vector_store %arg24[%c0_202, %c0_203], %680 {strides = array<i32>} : memref<2x384xf32, #tpu.memory_space<vmem>>, vector<2x384xf32>,
    return
  }
  func.func @transform_0(%arg0: i32) -> (i32, i32, i32) {
    %c0_i32 = arith.constant 0 : i32
    %c0_i32_0 = arith.constant 0 : i32
    %c0_i32_1 = arith.constant 0 : i32
    return %arg0, %c0_i32, %c0_i32_0 : i32, i32, i32
  }
  func.func @transform_1(%arg0: i32) -> (i32, i32, i32, i32) {
    %c0_i32 = arith.constant 0 : i32
    %c0_i32_0 = arith.constant 0 : i32
    %c0_i32_1 = arith.constant 0 : i32
    %c0_i32_2 = arith.constant 0 : i32
    return %c0_i32, %c0_i32_0, %arg0, %c0_i32_1 : i32, i32, i32, i32
  }
  func.func @transform_2(%arg0: i32) -> (i32, i32) {
    %c0_i32 = arith.constant 0 : i32
    %c0_i32_0 = arith.constant 0 : i32
    %c0_i32_1 = arith.constant 0 : i32
    return %c0_i32, %c0_i32_0 : i32, i32
  }
  func.func @transform_3(%arg0: i32) -> (i32, i32) {
    %c0_i32 = arith.constant 0 : i32
    %c0_i32_0 = arith.constant 0 : i32
    %c0_i32_1 = arith.constant 0 : i32
    return %c0_i32, %c0_i32_0 : i32, i32
  }
  func.func @transform_4(%arg0: i32) -> (i32, i32) {
    %c0_i32 = arith.constant 0 : i32
    %c0_i32_0 = arith.constant 0 : i32
    %c0_i32_1 = arith.constant 0 : i32
    return %c0_i32, %c0_i32_0 : i32, i32
  }
  func.func @transform_5(%arg0: i32) -> (i32, i32) {
    %c0_i32 = arith.constant 0 : i32
    %c0_i32_0 = arith.constant 0 : i32
    %c0_i32_1 = arith.constant 0 : i32
    return %c0_i32, %c0_i32_0 : i32, i32
  }
  func.func @transform_6(%arg0: i32) -> (i32, i32) {
    %c0_i32 = arith.constant 0 : i32
    %c0_i32_0 = arith.constant 0 : i32
    %c0_i32_1 = arith.constant 0 : i32
    return %c0_i32, %c0_i32_0 : i32, i32
  }
  func.func @transform_7(%arg0: i32) -> (i32, i32) {
    %c0_i32 = arith.constant 0 : i32
    %c0_i32_0 = arith.constant 0 : i32
    %c0_i32_1 = arith.constant 0 : i32
    return %c0_i32, %c0_i32_0 : i32, i32
  }
  func.func @transform_8(%arg0: i32) -> (i32, i32) {
    %c0_i32 = arith.constant 0 : i32
    %c0_i32_0 = arith.constant 0 : i32
    %c0_i32_1 = arith.constant 0 : i32
    return %c0_i32, %c0_i32_0 : i32, i32
  }
  func.func @transform_9(%arg0: i32) -> (i32, i32) {
    %c0_i32 = arith.constant 0 : i32
    %c0_i32_0 = arith.constant 0 : i32
    %c0_i32_1 = arith.constant 0 : i32
    return %c0_i32, %c0_i32_0 : i32, i32
  }
  func.func @transform_10(%arg0: i32) -> (i32, i32) {
    %c0_i32 = arith.constant 0 : i32
    %c0_i32_0 = arith.constant 0 : i32
    %c0_i32_1 = arith.constant 0 : i32
    return %c0_i32, %c0_i32_0 : i32, i32
  }
  func.func @transform_11(%arg0: i32) -> (i32, i32) {
    %c0_i32 = arith.constant 0 : i32
    %c0_i32_0 = arith.constant 0 : i32
    %c0_i32_1 = arith.constant 0 : i32
    return %c0_i32, %c0_i32_0 : i32, i32
  }
  func.func @transform_12(%arg0: i32) -> (i32, i32) {
    %c0_i32 = arith.constant 0 : i32
    %c0_i32_0 = arith.constant 0 : i32
    %c0_i32_1 = arith.constant 0 : i32
    return %c0_i32, %c0_i32_0 : i32, i32
  }
  func.func @transform_13(%arg0: i32) -> (i32, i32) {
    %c0_i32 = arith.constant 0 : i32
    %c0_i32_0 = arith.constant 0 : i32
    %c0_i32_1 = arith.constant 0 : i32
    return %c0_i32, %c0_i32_0 : i32, i32
  }
  func.func @transform_14(%arg0: i32) -> (i32, i32) {
    %c0_i32 = arith.constant 0 : i32
    %c0_i32_0 = arith.constant 0 : i32
    %c0_i32_1 = arith.constant 0 : i32
    return %c0_i32, %c0_i32_0 : i32, i32
  }
  func.func @transform_15(%arg0: i32) -> (i32, i32) {
    %c0_i32 = arith.constant 0 : i32
    %c0_i32_0 = arith.constant 0 : i32
    %c0_i32_1 = arith.constant 0 : i32
    return %c0_i32, %c0_i32_0 : i32, i32
  }
  func.func @transform_16(%arg0: i32) -> (i32, i32) {
    %c0_i32 = arith.constant 0 : i32
    %c0_i32_0 = arith.constant 0 : i32
    %c0_i32_1 = arith.constant 0 : i32
    return %c0_i32, %c0_i32_0 : i32, i32
  }
  func.func @transform_17(%arg0: i32) -> (i32, i32) {
    %c0_i32 = arith.constant 0 : i32
    %c0_i32_0 = arith.constant 0 : i32
    %c0_i32_1 = arith.constant 0 : i32
    return %c0_i32, %c0_i32_0 : i32, i32
  }
  func.func @transform_18(%arg0: i32) -> (i32, i32) {
    %c0_i32 = arith.constant 0 : i32
    %c0_i32_0 = arith.constant 0 : i32
    %c0_i32_1 = arith.constant 0 : i32
    return %c0_i32, %c0_i32_0 : i32, i32
  }
  func.func @transform_19(%arg0: i32) -> (i32, i32) {
    %c0_i32 = arith.constant 0 : i32
    %c0_i32_0 = arith.constant 0 : i32
    %c0_i32_1 = arith.constant 0 : i32
    return %c0_i32, %c0_i32_0 : i32, i32
  }
  func.func @transform_20(%arg0: i32) -> (i32, i32) {
    %c0_i32 = arith.constant 0 : i32
    %c0_i32_0 = arith.constant 0 : i32
    %c0_i32_1 = arith.constant 0 : i32
    return %c0_i32, %c0_i32_0 : i32, i32
  }
  func.func @transform_21(%arg0: i32) -> (i32, i32) {
    %c0_i32 = arith.constant 0 : i32
    %c0_i32_0 = arith.constant 0 : i32
    %c0_i32_1 = arith.constant 0 : i32
    return %c0_i32, %c0_i32_0 : i32, i32
  }
  func.func @transform_22(%arg0: i32) -> (i32, i32) {
    %c0_i32 = arith.constant 0 : i32
    %c0_i32_0 = arith.constant 0 : i32
    return %arg0, %c0_i32 : i32, i32
  }
  func.func @transform_23(%arg0: i32) -> (i32, i32) {
    %c0_i32 = arith.constant 0 : i32
    %c0_i32_0 = arith.constant 0 : i32
    return %arg0, %c0_i32 : i32, i32
  }
}

</mosaic_0001>

<bundles_post_ra>
// kernel: hierarchical_decoder_forward.1
= control target key start
LH: loop header
LB: loop body
LE: loop exit
PB: predicated region body
PF: predicated region fallthrough
CT: control target
= control target key end

     0   :  { %vm136_vm0 = vcmask 261120   ;;  %v2684_v10 = vmov 0   ;;  %vm203_vm1 = vcmask 130048   ;;  %v230_v42 = vlaneseq  ;;  %s2690_s26 = smov 16   ;;  %s3858_s2 = inlined_call_operand.vmem [shape: f32[32,16], index: 2, kind: input, shape index: {}]   ;;  %s3859_s3 = inlined_call_operand.vmem [shape: f32[1,16], index: 3, kind: input, shape index: {}]   ;;  %s3860_s0 = inlined_call_operand.vmem [shape: f32[2,16,32], index: 0, kind: input, shape index: {}]   ;;  %s3861_s4 = inlined_call_operand.vmem [shape: f32[1,16], index: 4, kind: input, shape index: {}]   ;;  %s3862_s5 = inlined_call_operand.vmem [shape: f32[1,16], index: 5, kind: input, shape index: {}]   ;;  %s3863_s6 = inlined_call_operand.<no memory space> [shape: f32[1,1], index: 6, kind: input, shape index: {}]   ;;  %s3864_s8 = inlined_call_operand.vmem [shape: f32[1,32], index: 8, kind: input, shape index: {}]   ;;  %s3865_s7 = inlined_call_operand.vmem [shape: f32[32,32], index: 7, kind: input, shape index: {}]   ;;  %s3866_s9 = inlined_call_operand.vmem [shape: f32[64,32], index: 9, kind: input, shape index: {}]   ;;  %s3867_s10 = inlined_call_operand.vmem [shape: f32[1,32], index: 10, kind: input, shape index: {}]   ;;  %s3868_s11 = inlined_call_operand.vmem [shape: f32[64,128], index: 11, kind: input, shape index: {}]   ;;  %s3869_s12 = inlined_call_operand.vmem [shape: f32[1,128], index: 12, kind: input, shape index: {}]   ;;  %s3870_s13 = inlined_call_operand.vmem [shape: f32[64,64], index: 13, kind: input, shape index: {}]   ;;  %s3871_s14 = inlined_call_operand.vmem [shape: f32[1,16], index: 14, kind: input, shape index: {}]   ;;  %s3872_s19 = inlined_call_operand.vmem [shape: f32[16,128], index: 19, kind: input, shape index: {}]   ;;  %s3873_s18 = inlined_call_operand.vmem [shape: f32[16,128], index: 18, kind: input, shape index: {}]   ;;  %s3874_s1 = inlined_call_operand.vmem [shape: f32[3,4,2,16], index: 1, kind: input, shape index: {}]   ;;  %s3875_s20 = inlined_call_operand.vmem [shape: f32[32,128], index: 20, kind: input, shape index: {}]   ;;  %s3876_s21 = inlined_call_operand.vmem [shape: f32[1,128], index: 21, kind: input, shape index: {}]   ;;  %s3877_s15 = inlined_call_operand.vmem [shape: f32[1,32], index: 15, kind: input, shape index: {}]   ;;  %s3878_s16 = inlined_call_operand.vmem [shape: f32[1,32], index: 16, kind: input, shape index: {}]   ;;  %s3879_s17 = inlined_call_operand.<no memory space> [shape: f32[1,1], index: 17, kind: input, shape index: {}]   ;;  %s3880_s23 = inlined_call_operand.vmem [shape: f32[2,384], index: 23, kind: output, shape index: {1}]   ;;  %s3881_s22 = inlined_call_operand.vmem [shape: f32[2,51], index: 22, kind: output, shape index: {0}]  }
   0x1   :  { %3889 = sst [smem:[#allocation5_spill]] %s3858_s2  ;;  %2465 = vset.pattern.permute.xlu2 %v2684_v10  ;;  %2467 = vset.pattern.permute.xlu1 %v2684_v10  ;;  %vm235_vm2 = vcmask 130112   ;;  %vm240_vm3 = vcmask 1041409   ;;  %vm243_vm4 = vcmask 123904   ;;  %vm388_vm9 = vcmask 523264   ;;  %s2686_s2 = smov 32  }
   0x2   :  { %3890 = sst [smem:[#allocation6_spill]] %s3859_s3  ;;  %2466 = vset.pattern.permute.xlu0 %v2684_v10  ;;  %v2893_v45 = vand.u32 127, %v230_v42 }
   0x3   :  { %3891 = sst [smem:[#allocation7_spill]] %s3860_s0  ;;  %s2687_s0 = smov 48  }
   0x4   :  { %3892 = sst [smem:[#allocation8_spill]] %s3861_s4  ;;  %v2898_v47 = vadd.s32 4294967288, %v2893_v45  ;;  %s2685_s4 = smov 64  }
   0x5   :  { %3893 = sst [smem:[#allocation9_spill]] %s3862_s5 }
   0x6   :  { %3894 = sst [smem:[#allocation10_spill]] %s3863_s6 }
   0x7   :  { %3895 = sst [smem:[#allocation11_spill]] %s3864_s8 }
   0x8   :  { %3896 = sst [smem:[#allocation12_spill]] %s3865_s7 }
   0x9   :  { %s3897_s24 = sld [smem:[#allocation5_spill]] }
   0xa   :  { %s3898_s28 = sld [smem:[#allocation7_spill]] }
   0xb   :  { %s3899_s3 = sld [smem:[#allocation10_spill]] }
   0xc   :  { %s3900_s8 = sld [smem:[#allocation8_spill]] }
   0xd   :  { %s3901_s29 = sld [smem:[#allocation6_spill]] }
   0xe   :  { %s3902_s5 = sld [smem:[#allocation9_spill]] }
   0xf   :  { %v131_v0 = vld [vmem:[%s3897_s24 + $0x18] sm:$0xff]  ;;  %v130_v1 = vld [vmem:[%s3897_s24 + $0x10] sm:$0xff]  ;;  %v129_v2 = vld [vmem:[%s3897_s24 + $0x8] sm:$0xff]  ;;  %s3903_s25 = sld [smem:[#allocation12_spill]] }
  0x10   :  { %161 = vmatpush.msra.mxu0 %v131_v0  ;;  %v128_v3 = vld [vmem:[%s3897_s24] sm:$0xff]  ;;  %v2837_v5 = vld [vmem:[%s3898_s28 + $0x8] sm:$0xff]  ;;  %v2844_v6 = vld [vmem:[%s3898_s28 + $0x10] sm:$0xff]  ;;  %s3904_s30 = sld [smem:[#allocation11_spill]] }
  0x11   :  { %v2830_v4 = vld [vmem:[%s3898_s28] sm:$0xff]  ;;  %v2851_v7 = vld [vmem:[%s3898_s28 + $0x18] sm:$0xff]  ;;  %v29_v8 = vstv %s3899_s3 }
  0x12   :  { %162 = vmatpush.msra.mxu0 %v130_v1  ;;  %30 = vst [vmem:[#allocation2] sm:$0x1] %v29_v8  ;;  %v2861_v9 = vld [vmem:[%s3900_s8] ss:$0 sm:$0xff] }
  0x13   :  { %v2468_v11 = vld [vmem:[%s3901_s29] ss:$0 sm:$0xff]  ;;  %v184_v12 = vperm.slane %v2861_v9, 0  ;;  %v183_v24 = vrot.slane %v2861_v9, 1  ;;  %s2689_s29 = smov 80  }
  0x14   :  { %163 = vmatpush.msra.mxu0 %v129_v2  ;;  %v2873_v17 = vld [vmem:[%s3902_s5] ss:$0 sm:$0xff] }
  0x15   :  { %v185_v27 = vperm.slane %v183_v24, 0 }
  0x16   :  { %164 = vmatpush.msra.mxu0 %v128_v3 }
  0x17   :  { %2385 = vmatmul.msk.f32.vlgmr.msra.gmra.mxu0 %vm136_vm0, %v2830_v4 }
  0x19   :  { %v2471_v15 = vld [vmem:[#allocation2] ss:$0 sm:$0xff] }
  0x1a   :  { %219 = vperm.xlu2 %2465, %v2471_v15  }
  0x1f   :  { %2386 = vmatmul.msk.f32.gmra.mxu0 %vm136_vm0, %v2837_v5 }
  0x27   :  { %2387 = vmatmul.msk.f32.gmra.mxu0 %vm136_vm0, %v2844_v6 }
  0x2f   :  { %2388 = vmatmul.msk.f32.gmra.mxu0 %vm136_vm0, %v2851_v7 }
  0x74   :  { %v2895_v46 = vpop.permute.xlu2 %219 }
  0x94   :  { %v166_v13 = vpop.f32.mrf.mxu0 }
  0x95   :  { %v2867_v14 = vadd.f32 %v2468_v11, %v166_v13 }
  0x97   :  { %v188_v16 = vadd.f32 %v184_v12, %v2867_v14 }
  0x99   :  { %v192_v18 = vmax.f32 %v188_v16, 0.0 }
  0x9b   :  { %v199_v19 = vmul.f32 %v2873_v17, %v192_v18 }
  0x9c   :  { %v169_v20 = vpop.f32.mrf.mxu0 }
  0x9d   :  { %v2876_v21 = vadd.f32 %v2468_v11, %v169_v20  ;;  %v204_v22 = vsel %vm203_vm1, %v199_v19, 0.0 }
  0x9e   :  { %205 = vadd.xlane.f32.xlu0 %v204_v22 }
  0x9f   :  { %v189_v23 = vadd.f32 %v184_v12, %v2876_v21 }
  0xa1   :  { %v193_v25 = vmax.f32 %v189_v23, 0.0 }
  0xa3   :  { %v200_v26 = vmul.f32 %v2873_v17, %v193_v25 }
  0xa4   :  { %v172_v28 = vpop.f32.mrf.mxu0 }
  0xa5   :  { %v2882_v29 = vadd.f32 %v2468_v11, %v172_v28  ;;  %v207_v30 = vsel %vm203_vm1, %v200_v26, 0.0 }
  0xa6   :  { %208 = vadd.xlane.f32.xlu0 %v207_v30 }
  0xa7   :  { %v190_v31 = vadd.f32 %v185_v27, %v2882_v29 }
  0xa9   :  { %v194_v32 = vmax.f32 %v190_v31, 0.0 }
  0xab   :  { %v201_v33 = vmul.f32 %v2873_v17, %v194_v32 }
  0xac   :  { %v175_v34 = vpop.f32.mrf.mxu0 }
  0xad   :  { %v2887_v35 = vadd.f32 %v2468_v11, %v175_v34  ;;  %v210_v36 = vsel %vm203_vm1, %v201_v33, 0.0 }
  0xae   :  { %211 = vadd.xlane.f32.xlu1 %v210_v36 }
  0xaf   :  { %v191_v37 = vadd.f32 %v185_v27, %v2887_v35 }
  0xb1   :  { %v195_v38 = vmax.f32 %v191_v37, 0.0 }
  0xb3   :  { %v202_v39 = vmul.f32 %v2873_v17, %v195_v38 }
  0xb5   :  { %v213_v40 = vsel %vm203_vm1, %v202_v39, 0.0 }
  0xb6   :  { %214 = vadd.xlane.f32.xlu1 %v213_v40 }
 0x111   :  { %v206_v41 = vpop.xlane.xlu0 %205 }
 0x112   :  { %v222_v49 = vadd.f32 %v2895_v46, %v206_v41 }
 0x114   :  { %v232_v54 = vperm.slane %v222_v49, %v2893_v45 }
 0x119   :  { %v209_v44 = vpop.xlane.xlu0 %208 }
 0x11a   :  { %v223_v48 = vadd.f32 %v2895_v46, %v209_v44 }
 0x11c   :  { %v234_v52 = vperm.slane %v223_v48, %v2898_v47 }
 0x11e   :  { %v236_v57 = vsel %vm235_vm2, %v234_v52, %v232_v54  ;;  %v2923_v54 = vld [vmem:[%s3903_s25 + $0x18] sm:$0xff] }
 0x11f   :  { %376 = vmatpush.msra.mxu1 %v2923_v54 }
 0x121   :  { %v212_v43 = vpop.xlane.xlu1 %211 }
 0x122   :  { %v224_v50 = vadd.f32 %v2895_v46, %v212_v43 }
 0x124   :  { %v237_v55 = vperm.slane %v224_v50, %v2893_v45 }
 0x129   :  { %v215_v51 = vpop.xlane.xlu1 %214 }
 0x12a   :  { %v225_v53 = vadd.f32 %v2895_v46, %v215_v51 }
 0x12c   :  { %v238_v56 = vperm.slane %v225_v53, %v2898_v47 }
 0x12e   :  { %v239_v58 = vsel %vm235_vm2, %v238_v56, %v237_v55  ;;  %v2928_v55 = vld [vmem:[%s3903_s25 + $0x10] sm:$0xff]  ;;  %v2934_v56 = vld [vmem:[%s3903_s25 + $0x8] sm:$0xff] }
 0x12f   :  { %v241_v59 = vsel %vm240_vm3, %v239_v58, %v236_v57  ;;  %377 = vmatpush.msra.mxu1 %v2928_v55  ;;  %v2940_v57 = vld [vmem:[%s3903_s25] sm:$0xff]  ;;  %v2947_v58 = vld [vmem:[%s3866_s9 + $0x38] sm:$0xff] }
 0x130   :  { %v244_v60 = vsel %vm243_vm4, %v241_v59, -inf  ;;  %v2952_v59 = vld [vmem:[%s3866_s9 + $0x30] sm:$0xff]  ;;  %400 = vmatpush.msra.mxu2 %v2947_v58 }
 0x131   :  { %245 = vmax.xlane.f32.xlu2 %v244_v60  ;;  %378 = vmatpush.msra.mxu1 %v2934_v56  ;;  %v2958_v60 = vld [vmem:[%s3866_s9 + $0x28] sm:$0xff] }
 0x132   :  { %401 = vmatpush.msra.mxu2 %v2952_v59 }
 0x133   :  { %379 = vmatpush.msra.mxu1 %v2940_v57 }
 0x134   :  { %402 = vmatpush.msra.mxu2 %v2958_v60 }
 0x1a4   :  { %v246_v61 = vpop.xlane.xlu2 %245 }
 0x1a5   :  { %v248_v62 = vperm.slane %v246_v61, 0  ;;  %v249_v1 = vperm.slane %v246_v61, 1 }
 0x1a7   :  { %v252_v63 = vsub.f32 %v222_v49, %v248_v62  ;;  %v253_v0 = vsub.f32 %v223_v48, %v248_v62  ;;  %v254_v8 = vsub.f32 %v224_v50, %v249_v1  ;;  %v255_v13 = vsub.f32 %v225_v53, %v249_v1  ;;  %v2964_v62 = vld [vmem:[%s3866_s9 + $0x20] sm:$0xff] }
 0x1a8   :  { %403 = vmatpush.msra.mxu2 %v2964_v62 }
 0x1a9   :  { %v256_v2 = vmul.f32 1.442695, %v252_v63  ;;  %v258_v3 = vmul.f32 1.442695, %v253_v0  ;;  %v260_v10 = vmul.f32 1.442695, %v254_v8 }
 0x1aa   :  { %v262_v15 = vmul.f32 1.442695, %v255_v13 }
 0x1ab   :  { %2480 = vpow2.f32 %v256_v2  ;;  %v2972_v2 = vld [vmem:[%s3866_s9 + $0x18] sm:$0xff] }
 0x1ac   :  { %2482 = vpow2.f32 %v258_v3  ;;  %404 = vmatpush.msra.mxu2 %v2972_v2 }
 0x1ad   :  { %2484 = vpow2.f32 %v260_v10 }
 0x1ae   :  { %2486 = vpow2.f32 %v262_v15 }
 0x1b1   :  { %v2481_v11 = vpop.eup %2480 }
 0x1b2   :  { %v2483_v12 = vpop.eup %2482  ;;  %269 = vperm.xlu0 %2466, %v2481_v11  }
 0x1b3   :  { %272 = vperm.xlu1 %2467, %v2483_v12   ;;  %v2485_v16 = vpop.eup %2484 }
 0x1b4   :  { %v2487_v18 = vpop.eup %2486 }
 0x1bb   :  { %275 = vperm.xlu1 %2467, %v2485_v16  }
 0x1c3   :  { %278 = vperm.xlu1 %2467, %v2487_v18  }
 0x224   :  { %v270_v22 = vpop.permute.xlu0 %269 }
 0x225   :  { %v273_v19 = vpop.permute.xlu1 %272  ;;  %v280_v24 = vperm.slane %v270_v22, %v2893_v45 }
 0x226   :  { %v281_v23 = vperm.slane %v273_v19, %v2898_v47 }
 0x228   :  { %v282_v28 = vsel %vm235_vm2, %v281_v23, %v280_v24 }
 0x22d   :  { %v276_v20 = vpop.permute.xlu1 %275 }
 0x22e   :  { %v283_v26 = vperm.slane %v276_v20, %v2893_v45 }
 0x235   :  { %v279_v25 = vpop.permute.xlu1 %278 }
 0x236   :  { %v284_v27 = vperm.slane %v279_v25, %v2898_v47 }
 0x238   :  { %v285_v30 = vsel %vm235_vm2, %v284_v27, %v283_v26 }
 0x239   :  { %v286_v31 = vsel %vm240_vm3, %v285_v30, %v282_v28 }
 0x23a   :  { %v288_v32 = vsel %vm243_vm4, %v286_v31, 0.0 }
 0x23b   :  { %289 = vadd.xlane.f32.xlu2 %v288_v32 }
 0x2ae   :  { %v290_v33 = vpop.xlane.xlu2 %289 }
 0x2af   :  { %2488 = vrcp.f32 %v290_v33  ;;  %v302_v38 = vand.u32 2147483648, %v290_v33  ;;  %v300_v40 = vand.u32 2147483647, %v290_v33  ;;  %vm296_vm6 = vweird.f32 %v290_v33 }
 0x2b1   :  { %v303_v42 = vor.u32 1.1754944e-38, %v302_v38  ;;  %vm301_vm8 = vcmp.eq.f32.partialorder %v300_v40, 8.507059e+37  ;;  %v3022_v38 = vld [vmem:[%s3868_s11 + $0x20] sm:$0xff] }
 0x2b2   :  { %v3035_v40 = vld [vmem:[%s3904_s30] ss:$0 sm:$0xff] }
 0x2b5   :  { %v2489_v34 = vpop.eup %2488 }
 0x2b6   :  { %v292_v36 = vmul.f32 %v2489_v34, %v290_v33  ;;  %vm297_vm5 = vweird.f32 %v2489_v34  ;;  %v2998_v33 = vld [vmem:[%s3866_s9] sm:$0xff] }
 0x2b7   :  { %vm298_vm7 = vmor %vm296_vm6, %vm297_vm5 }
 0x2b8   :  { %v293_v37 = vsub.f32 1.0, %v292_v36  ;;  %v3010_v36 = vld [vmem:[%s3868_s11 + $0x30] sm:$0xff] }
 0x2ba   :  { %v294_v39 = vmul.f32 %v2489_v34, %v293_v37  ;;  %v3016_v37 = vld [vmem:[%s3868_s11 + $0x28] sm:$0xff] }
 0x2bc   :  { %v295_v41 = vadd.f32 %v2489_v34, %v294_v39  ;;  %v3028_v39 = vld [vmem:[%s3868_s11 + $0x18] sm:$0xff] }
 0x2be   :  { %v299_v43 = vsel %vm298_vm7, %v2489_v34, %v295_v41  ;;  %v3005_v34 = vld [vmem:[%s3868_s11 + $0x38] sm:$0xff] }
 0x2bf   :  { %v304_v44 = vsel %vm301_vm8, %v303_v42, %v299_v43  ;;  %428 = vmatpush.msra.mxu3 %v3005_v34 }
 0x2c0   :  { %v307_v48 = vperm.slane %v304_v44, 1  ;;  %v306_v49 = vperm.slane %v304_v44, 0  ;;  %v3043_v44 = vld [vmem:[%s3868_s11 + $0x10] sm:$0xff] }
 0x2c1   :  { %429 = vmatpush.msra.mxu3 %v3010_v36 }
 0x2c2   :  { %v312_v50 = vmul.f32 %v2485_v16, %v307_v48  ;;  %v311_v51 = vmul.f32 %v2483_v12, %v306_v49  ;;  %v310_v52 = vmul.f32 %v2481_v11, %v306_v49  ;;  %v313_v53 = vmul.f32 %v2487_v18, %v307_v48  ;;  %v3049_v48 = vld [vmem:[%s3868_s11 + $0x8] sm:$0xff]  ;;  %v3054_v49 = vld [vmem:[%s3868_s11] sm:$0xff] }
 0x2c3   :  { %430 = vmatpush.msra.mxu3 %v3016_v37 }
 0x2c4   :  { %326 = vperm.xlu2 %2465, %v312_v50   ;;  %321 = vperm.xlu1 %2467, %v311_v51   ;;  %v3061_v50 = vld [vmem:[%s3867_s10] ss:$0 sm:$0xff] }
 0x2c5   :  { %316 = vperm.xlu0 %2466, %v310_v52   ;;  %431 = vmatpush.msra.mxu3 %v3022_v38 }
 0x2c7   :  { %432 = vmatpush.msra.mxu3 %v3028_v39 }
 0x2c9   :  { %433 = vmatpush.msra.mxu3 %v3043_v44 }
 0x2cb   :  { %434 = vmatpush.msra.mxu3 %v3049_v48 }
 0x2cc   :  { %945 = vrot.lane.b32.xlu2 %v2861_v9, %s2687_s0  ;;  %v3139_v9 = vld [vmem:[%s3873_s18 + $0x8] sm:$0xff] }
 0x2cd   :  { %331 = vperm.xlu0 %2466, %v313_v53   ;;  %435 = vmatpush.msra.mxu3 %v3054_v49 }
 0x2ce   :  { %777 = vmatpush.msrb.mxu0 %v3139_v9 }
 0x2cf   :  { %603 = vmatpush.msrb.mxu3 %v3139_v9 }
 0x31e   :  { %v327_v10 = vpop.permute.xlu2 %326 }
 0x31f   :  { %v336_v12 = vmul.f32 %v327_v10, %v2844_v6 }
 0x321   :  { %v347_v18 = vsel %vm136_vm0, %v336_v12, 0.0 }
 0x336   :  { %v322_v61 = vpop.permute.xlu1 %321 }
 0x337   :  { %v335_v63 = vmul.f32 %v322_v61, %v2837_v5  ;;  %v317_v0 = vpop.permute.xlu0 %316  ;;  %v2980_v5 = vld [vmem:[%s3866_s9 + $0x10] sm:$0xff] }
 0x338   :  { %v334_v1 = vmul.f32 %v317_v0, %v2830_v4  ;;  %405 = vmatpush.msra.mxu2 %v2980_v5 }
 0x339   :  { %v339_v3 = vsel %vm136_vm0, %v335_v63, 0.0  ;;  %v3069_v63 = vld [vmem:[%s3869_s12] ss:$0 sm:$0xff] }
 0x33a   :  { %v338_v8 = vsel %vm136_vm0, %v334_v1, 0.0 }
 0x33b   :  { %v340_v11 = vadd.f32 %v339_v3, %v338_v8 }
 0x33d   :  { %v341_v4 = vrot.slane %v340_v11, 4 }
 0x33f   :  { %v342_v13 = vadd.f32 %v341_v4, %v340_v11  ;;  %v332_v15 = vpop.permute.xlu0 %331 }
 0x340   :  { %v337_v16 = vmul.f32 %v332_v15, %v2851_v7  ;;  %v2993_v7 = vld [vmem:[%s3866_s9 + $0x8] sm:$0xff] }
 0x341   :  { %v343_v20 = vrot.slane %v342_v13, 2  ;;  %406 = vmatpush.msra.mxu2 %v2993_v7 }
 0x342   :  { %v348_v19 = vsel %vm136_vm0, %v337_v16, 0.0 }
 0x343   :  { %v349_v22 = vadd.f32 %v348_v19, %v347_v18  ;;  %v344_v24 = vadd.f32 %v343_v20, %v342_v13  ;;  %407 = vmatpush.msra.mxu2 %v2998_v33 }
 0x345   :  { %v350_v23 = vrot.slane %v349_v22, 4  ;;  %v345_v28 = vrot.slane %v344_v24, 1 }
 0x347   :  { %v351_v25 = vadd.f32 %v350_v23, %v349_v22  ;;  %v346_v31 = vadd.f32 %v345_v28, %v344_v24 }
 0x349   :  { %v352_v26 = vrot.slane %v351_v25, 2 }
 0x34b   :  { %v353_v27 = vadd.f32 %v352_v26, %v351_v25 }
 0x34d   :  { %v354_v30 = vrot.slane %v353_v27, 1 }
 0x34f   :  { %v355_v32 = vadd.f32 %v354_v30, %v353_v27 }
 0x351   :  { %v361_v6 = vsel %vm240_vm3, %v355_v32, %v346_v31  ;;  %v3081_v31 = vld [vmem:[%s3870_s13 + $0x38] sm:$0xff]  ;;  %v3086_v32 = vld [vmem:[%s3870_s13 + $0x30] sm:$0xff] }
 0x352   :  { %2389 = vmatmul.msk.f32.vlgmr.msra.gmra.mxu1 %vm136_vm0, %v361_v6  ;;  %v3092_v6 = vld [vmem:[%s3870_s13 + $0x28] sm:$0xff] }
 0x353   :  { %493 = vmatpush.msrb.mxu1 %v3081_v31 }
 0x355   :  { %494 = vmatpush.msrb.mxu1 %v3086_v32 }
 0x357   :  { %495 = vmatpush.msrb.mxu1 %v3092_v6 }
 0x3cf   :  { %v381_v41 = vpop.f32.mrf.mxu1 }
 0x3d0   :  { %v382_v42 = vadd.f32 %v3035_v40, %v381_v41  ;;  %v3098_v41 = vld [vmem:[%s3870_s13 + $0x20] sm:$0xff] }
 0x3d1   :  { %496 = vmatpush.msrb.mxu1 %v3098_v41 }
 0x3d2   :  { %v384_v43 = vsel %vm136_vm0, %v382_v42, 0.0  ;;  %v3104_v42 = vld [vmem:[%s3870_s13 + $0x18] sm:$0xff] }
 0x3d3   :  { %2390 = vmatmul.msk.f32.vlgmr.msra.gmra.mxu2 %vm388_vm9, %v384_v43  ;;  %v3110_v43 = vld [vmem:[%s3870_s13 + $0x10] sm:$0xff]  ;;  %497 = vmatpush.msrb.mxu1 %v3104_v42 }
 0x3d5   :  { %498 = vmatpush.msrb.mxu1 %v3110_v43 }
 0x456   :  { %v409_v51 = vpop.f32.mrf.mxu2 }
 0x457   :  { %v410_v52 = vadd.f32 %v3061_v50, %v409_v51  ;;  %v3116_v51 = vld [vmem:[%s3870_s13 + $0x8] sm:$0xff] }
 0x458   :  { %499 = vmatpush.msrb.mxu1 %v3116_v51 }
 0x459   :  { %v412_v53 = vmax.f32 %v410_v52, 0.0 }
 0x45b   :  { %v413_v61 = vsel %vm136_vm0, %v412_v53, 0.0 }
 0x45c   :  { %2391 = vmatmul.msk.f32.vlgmr.msra.gmra.mxu3 %vm388_vm9, %v413_v61  ;;  %v3128_v61 = vld [vmem:[%s3870_s13] sm:$0xff] }
 0x45d   :  { %500 = vmatpush.msrb.mxu1 %v3128_v61 }
 0x4df   :  { %v437_v0 = vpop.f32.mrf.mxu3 }
 0x4e0   :  { %v438_v1 = vadd.f32 %v3069_v63, %v437_v0  ;;  %v3134_v0 = vld [vmem:[%s3872_s19 + $0x8] sm:$0xff] }
 0x4e1   :  { %579 = vmatpush.msrb.mxu2 %v3134_v0 }
 0x4e2   :  { %2490 = vtanh.f32 %v438_v1  ;;  %v2392_v8 = vmul.f32 -1.442695, %v438_v1 }
 0x4e4   :  { %2492 = vpow2.f32 %v2392_v8  ;;  %v3152_v8 = vld [vmem:[%s3872_s19] sm:$0xff] }
 0x4e5   :  { %580 = vmatpush.msrb.mxu2 %v3152_v8 }
 0x4e7   :  { %689 = vmatpush.msra.mxu2 %v3139_v9 }
 0x4e8   :  { %v2491_v3 = vpop.eup %2490 }
 0x4e9   :  { %462 = vrot.lane.b32.xlu1 %v2491_v3, %s2685_s4 }
 0x4ea   :  { %v2493_v10 = vpop.eup %2492 }
 0x4eb   :  { %v443_v11 = vadd.f32 1.0, %v2493_v10  ;;  %v3157_v10 = vld [vmem:[%s3873_s18] sm:$0xff] }
 0x4ec   :  { %604 = vmatpush.msrb.mxu3 %v3157_v10  ;;  %778 = vmatpush.msrb.mxu0 %v3157_v10 }
 0x4ed   :  { %2494 = vrcp.f32 %v443_v11  ;;  %v455_v18 = vand.u32 2147483648, %v443_v11  ;;  %vm449_vm11 = vweird.f32 %v443_v11  ;;  %v453_v19 = vand.u32 2147483647, %v443_v11  ;;  %690 = vmatpush.msra.mxu2 %v3157_v10 }
 0x4ee   :  { %1128 = vmatpush.msra.mxu0 %v2923_v54  ;;  %v2402_v54 = vld [vmem:[%s3874_s1 + $0x4] sm:$0x3] }
 0x4ef   :  { %v456_v22 = vor.u32 1.1754944e-38, %v455_v18  ;;  %vm454_vm13 = vcmp.eq.f32.partialorder %v453_v19, 8.507059e+37  ;;  %2403 = vmatmul.msk.f32.vlgmr.msrb.gmra.mxu0 %vm203_vm1, %v2402_v54 }
 0x4f0   :  { %1129 = vmatpush.msra.mxu0 %v2928_v55  ;;  %v3222_v55 = vld [vmem:[%s3871_s14] ss:$0 sm:$0xff] }
 0x4f2   :  { %1130 = vmatpush.msra.mxu0 %v2934_v56  ;;  %v3224_v56 = vpop.permute.xlu2 %945 }
 0x4f3   :  { %v2495_v4 = vpop.eup %2494 }
 0x4f4   :  { %v445_v12 = vmul.f32 %v2495_v4, %v443_v11  ;;  %vm450_vm10 = vweird.f32 %v2495_v4  ;;  %v585_v11 = vld [vmem:[%s3874_s1] sm:$0x3]  ;;  %1131 = vmatpush.msra.mxu0 %v2940_v57 }
 0x4f5   :  { %vm451_vm12 = vmor %vm449_vm11, %vm450_vm10  ;;  %2396 = vmatmul.msk.f32.vlgmr.msrb.gmra.mxu3 %vm203_vm1, %v585_v11 }
 0x4f6   :  { %v446_v13 = vsub.f32 1.0, %v445_v12  ;;  %v3176_v12 = vld [vmem:[%s3875_s20 + $0x10] sm:$0xff]  ;;  %1307 = vmatpush.msrb.mxu0 %v3134_v0 }
 0x4f8   :  { %v447_v15 = vmul.f32 %v2495_v4, %v446_v13  ;;  %v3181_v13 = vld [vmem:[%s3875_s20 + $0x8] sm:$0xff]  ;;  %1308 = vmatpush.msrb.mxu0 %v3152_v8 }
 0x4fa   :  { %v448_v16 = vadd.f32 %v2495_v4, %v447_v15  ;;  %v3190_v15 = vld [vmem:[%s3875_s20] sm:$0xff] }
 0x4fc   :  { %v452_v20 = vsel %vm451_vm12, %v2495_v4, %v448_v16  ;;  %v3167_v4 = vld [vmem:[%s3875_s20 + $0x18] sm:$0xff]  ;;  %v2688_v16 = vmov 0.0  }
 0x4fd   :  { %v457_v24 = vsel %vm454_vm13, %v456_v22, %v452_v20  ;;  %624 = vmatpush.msra.mxu1 %v3167_v4  ;;  %712 = vmatpush.msra.mxu3 %v3167_v4 }
 0x4fe   :  { %v460_v26 = vmul.f32 0.0, %v457_v24 }
 0x4ff   :  { %625 = vmatpush.msra.mxu1 %v3176_v12  ;;  %713 = vmatpush.msra.mxu3 %v3176_v12 }
 0x501   :  { %626 = vmatpush.msra.mxu1 %v3181_v13  ;;  %714 = vmatpush.msra.mxu3 %v3181_v13 }
 0x503   :  { %627 = vmatpush.msra.mxu1 %v3190_v15  ;;  %715 = vmatpush.msra.mxu3 %v3190_v15 }
 0x505   :  { %888 = vmatpush.msrb.mxu3 %v3167_v4 }
 0x507   :  { %889 = vmatpush.msrb.mxu3 %v3176_v12 }
 0x509   :  { %890 = vmatpush.msrb.mxu3 %v3181_v13 }
 0x50b   :  { %891 = vmatpush.msrb.mxu3 %v3190_v15 }
 0x55b   :  { %v463_v23 = vpop.permute.xlu1 %462 }
 0x55c   :  { %v465_v25 = vmul.f32 %v463_v23, %v457_v24 }
 0x55e   :  { %467 = vrot.lane.b32.xlu0 %v465_v25, %s2686_s2 }
 0x578   :  { %v606_v19 = vpop.f32.mrf.mxu3 }
 0x5d0   :  { %v468_v27 = vpop.permute.xlu0 %467 }
 0x5d1   :  { %v3074_v28 = vadd.f32 %v468_v27, %v460_v26 }
 0x5d3   :  { %2496 = vtanh.f32 %v3074_v28 }
 0x5d9   :  { %v2497_v30 = vpop.eup %2496 }
 0x5da   :  { %473 = vrot.lane.b32.xlu1 %v2497_v30, %s2685_s4 }
 0x64c   :  { %v474_v52 = vpop.permute.xlu1 %473 }
 0x64d   :  { %v3121_v53 = vmul.f32 %v474_v52, %v457_v24 }
 0x64f   :  { %478 = vrot.lane.b32.xlu0 %v3121_v53, %s2685_s4 }
 0x6c1   :  { %v3144_v1 = vpop.permute.xlu0 %478 }
 0x6c2   :  { %v481_v3 = vsel %vm136_vm0, 0.0, %v3144_v1 }
 0x6c3   :  { %2393 = vmatmul.msk.f32.vlgmr.msrb.gmra.mxu1 %vm388_vm9, %v481_v3 }
 0x6c4   :  { %800 = vmatpush.msrb.mxu1 %v3167_v4 }
 0x6c6   :  { %801 = vmatpush.msrb.mxu1 %v3176_v12 }
 0x6c8   :  { %802 = vmatpush.msrb.mxu1 %v3181_v13 }
 0x6ca   :  { %803 = vmatpush.msrb.mxu1 %v3190_v15 }
 0x6cb   :  { %628 = vmatmul.f32.vlgmr.msra.gmra.mxu1 %v2688_v16 }
 0x6cc   :  { %1148 = vmatpush.msra.mxu1 %v2947_v58 }
 0x6ce   :  { %1149 = vmatpush.msra.mxu1 %v2952_v59 }
 0x6d0   :  { %1150 = vmatpush.msra.mxu1 %v2958_v60 }
 0x6d2   :  { %1151 = vmatpush.msra.mxu1 %v2964_v62 }
 0x6d4   :  { %1152 = vmatpush.msra.mxu1 %v2972_v2 }
 0x6d6   :  { %1153 = vmatpush.msra.mxu1 %v2980_v5  ;;  %v2398_v5 = vld [vmem:[%s3874_s1 + $0x2] sm:$0x3] }
 0x6d8   :  { %1154 = vmatpush.msra.mxu1 %v2993_v7  ;;  %v2406_v7 = vld [vmem:[%s3874_s1 + $0x6] sm:$0x3] }
 0x6da   :  { %1155 = vmatpush.msra.mxu1 %v2998_v33  ;;  %v3267_v33 = vld [vmem:[%s3876_s21] ss:$0 sm:$0xff] }
 0x740   :  { %v3227_v57 = vpop.f32.mrf.mxu1 }
 0x741   :  { %v3232_v58 = vadd.f32 %v3222_v55, %v3227_v57  ;;  %v948_v59 = vadd.f32 %v3224_v56, %v3227_v57 }
 0x743   :  { %3905 = vst [vmem:[#allocation4_spill] sm:$0xff] %v3232_v58  ;;  %v3887_v60 = vmax.f32 %v3232_v58, 0.0  ;;  %v950_v62 = vrot.slane %v948_v59, 1  ;;  %v951_v26 = vperm.slane %v948_v59, 0 }
 0x745   :  { %2395 = vmatmul.msk.f32.vlgmr.msrb.gmra.mxu2 %vm203_vm1, %v3887_v60  ;;  %v952_v2 = vperm.slane %v950_v62, 0 }
 0x746   :  { %865 = vmatpush.msrb.mxu2 %v3139_v9 }
 0x747   :  { %955 = vrot.lane.b32.xlu2 %v952_v2, %s2689_s29 }
 0x748   :  { %866 = vmatpush.msrb.mxu2 %v3157_v10  ;;  %v3272_v22 = vpop.f32.mrf.mxu1 }
 0x74d   :  { %2399 = vmatmul.msk.f32.vlgmr.msra.gmra.mxu2 %vm203_vm1, %v2398_v5 }
 0x74e   :  { %1173 = vmatpush.msra.mxu2 %v3005_v34 }
 0x750   :  { %1174 = vmatpush.msra.mxu2 %v3010_v36 }
 0x752   :  { %1175 = vmatpush.msra.mxu2 %v3016_v37 }
 0x754   :  { %1176 = vmatpush.msra.mxu2 %v3022_v38 }
 0x755   :  { %2407 = vmatmul.msk.f32.vlgmr.msrb.gmra.mxu2 %vm203_vm1, %v2406_v7 }
 0x756   :  { %1177 = vmatpush.msra.mxu2 %v3028_v39 }
 0x758   :  { %1178 = vmatpush.msra.mxu2 %v3043_v44 }
 0x75a   :  { %1179 = vmatpush.msra.mxu2 %v3049_v48 }
 0x75c   :  { %1180 = vmatpush.msra.mxu2 %v3054_v49 }
 0x75e   :  { %1418 = vmatpush.msrb.mxu2 %v3167_v4 }
 0x760   :  { %1419 = vmatpush.msrb.mxu2 %v3176_v12 }
 0x762   :  { %1420 = vmatpush.msrb.mxu2 %v3181_v13 }
 0x764   :  { %1421 = vmatpush.msrb.mxu2 %v3190_v15 }
 0x7c8   :  { %v582_v18 = vpop.f32.mrf.mxu2 }
 0x7c9   :  { %v3270_v20 = vadd.f32 %v3267_v33, %v582_v18 }
 0x7cb   :  { %v607_v23 = vadd.f32 %v606_v19, %v3270_v20 }
 0x7cd   :  { %v632_v24 = vadd.f32 %v3272_v22, %v607_v23 }
 0x7cf   :  { %2498 = vtanh.f32 %v632_v24  ;;  %v2397_v27 = vmul.f32 -1.442695, %v632_v24  ;;  %v956_v24 = vpop.permute.xlu2 %955 }
 0x7d1   :  { %2500 = vpow2.f32 %v2397_v27 }
 0x7d5   :  { %v2499_v25 = vpop.eup %2498 }
 0x7d6   :  { %655 = vrot.lane.b32.xlu1 %v2499_v25, %s2685_s4 }
 0x7d7   :  { %v2501_v30 = vpop.eup %2500 }
 0x7d8   :  { %v636_v52 = vadd.f32 1.0, %v2501_v30  ;;  %v962_v30 = vadd.f32 %v956_v24, %v2887_v35 }
 0x7da   :  { %2502 = vrcp.f32 %v636_v52  ;;  %v648_v2 = vand.u32 2147483648, %v636_v52  ;;  %vm642_vm15 = vweird.f32 %v636_v52  ;;  %v646_v5 = vand.u32 2147483647, %v636_v52 }
 0x7dc   :  { %v649_v18 = vor.u32 1.1754944e-38, %v648_v2  ;;  %vm647_vm6 = vcmp.eq.f32.partialorder %v646_v5, 8.507059e+37 }
 0x7de   :  { %953 = vrot.lane.b32.xlu1 %v951_v26, %s2689_s29 }
 0x7e0   :  { %v2503_v3 = vpop.eup %2502 }
 0x7e1   :  { %v638_v11 = vmul.f32 %v2503_v3, %v636_v52  ;;  %vm643_vm14 = vweird.f32 %v2503_v3 }
 0x7e2   :  { %vm644_vm5 = vmor %vm642_vm15, %vm643_vm14 }
 0x7e3   :  { %v639_v54 = vsub.f32 1.0, %v638_v11 }
 0x7e5   :  { %v640_v16 = vmul.f32 %v2503_v3, %v639_v54 }
 0x7e7   :  { %v641_v62 = vadd.f32 %v2503_v3, %v640_v16  ;;  %v966_v16 = vmax.f32 %v962_v30, 0.0 }
 0x7e9   :  { %v645_v7 = vsel %vm644_vm5, %v2503_v3, %v641_v62  ;;  %v970_v5 = vmul.f32 %v2873_v17, %v966_v16 }
 0x7ea   :  { %v650_v19 = vsel %vm647_vm6, %v649_v18, %v645_v7 }
 0x7eb   :  { %v980_v7 = vsel %vm203_vm1, %v970_v5, 0.0  ;;  %v653_v18 = vmul.f32 0.0, %v650_v19 }
 0x848   :  { %v656_v59 = vpop.permute.xlu1 %655 }
 0x849   :  { %v658_v23 = vmul.f32 %v656_v59, %v650_v19 }
 0x84b   :  { %660 = vrot.lane.b32.xlu0 %v658_v23, %s2686_s2 }
 0x850   :  { %v954_v25 = vpop.permute.xlu1 %953 }
 0x851   :  { %v959_v26 = vadd.f32 %v954_v25, %v2867_v14  ;;  %v960_v27 = vadd.f32 %v954_v25, %v2876_v21 }
 0x853   :  { %v963_v11 = vmax.f32 %v959_v26, 0.0  ;;  %v964_v54 = vmax.f32 %v960_v27, 0.0  ;;  %v961_v26 = vadd.f32 %v956_v24, %v2882_v29 }
 0x855   :  { %v968_v52 = vmul.f32 %v2873_v17, %v964_v54  ;;  %v967_v3 = vmul.f32 %v2873_v17, %v963_v11  ;;  %v965_v27 = vmax.f32 %v961_v26, 0.0 }
 0x857   :  { %v974_v62 = vsel %vm203_vm1, %v968_v52, 0.0  ;;  %v971_v2 = vsel %vm203_vm1, %v967_v3, 0.0  ;;  %v969_v30 = vmul.f32 %v2873_v17, %v965_v27 }
 0x858   :  { %975 = vadd.xlane.f32.xlu2 %v974_v62  ;;  %972 = vadd.xlane.f32.xlu1 %v971_v2 }
 0x859   :  { %v977_v11 = vsel %vm203_vm1, %v969_v30, 0.0 }
 0x860   :  { %981 = vadd.xlane.f32.xlu2 %v980_v7 }
 0x8bd   :  { %v661_v59 = vpop.permute.xlu0 %660 }
 0x8be   :  { %v3288_v23 = vadd.f32 %v661_v59, %v653_v18 }
 0x8c0   :  { %2504 = vtanh.f32 %v3288_v23 }
 0x8c6   :  { %v2505_v25 = vpop.eup %2504 }
 0x8c7   :  { %666 = vrot.lane.b32.xlu0 %v2505_v25, %s2685_s4 }
 0x8cb   :  { %v976_v3 = vpop.xlane.xlu2 %975  ;;  %v973_v16 = vpop.xlane.xlu1 %972 }
 0x8cc   :  { %v984_v2 = vadd.f32 %v976_v3, %v2895_v46  ;;  %v983_v5 = vadd.f32 %v973_v16, %v2895_v46 }
 0x8ce   :  { %v992_v18 = vperm.slane %v984_v2, %v2898_v47  ;;  %v991_v17 = vperm.slane %v983_v5, %v2893_v45 }
 0x8d0   :  { %v993_v26 = vsel %vm235_vm2, %v992_v18, %v991_v17 }
 0x8d3   :  { %v982_v62 = vpop.xlane.xlu2 %981 }
 0x8d4   :  { %v986_v7 = vadd.f32 %v982_v62, %v2895_v46 }
 0x8f1   :  { %978 = vadd.xlane.f32.xlu0 %v977_v11 }
 0x939   :  { %v667_v54 = vpop.permute.xlu0 %666 }
 0x93a   :  { %v669_v52 = vmul.f32 %v667_v54, %v650_v19  ;;  %v995_v19 = vperm.slane %v986_v7, %v2898_v47 }
 0x93c   :  { %696 = vrot.lane.b32.xlu1 %v669_v52, %s2686_s2 }
 0x964   :  { %v979_v24 = vpop.xlane.xlu0 %978 }
 0x965   :  { %v985_v59 = vadd.f32 %v979_v24, %v2895_v46 }
 0x967   :  { %v994_v25 = vperm.slane %v985_v59, %v2893_v45 }
 0x969   :  { %v996_v27 = vsel %vm235_vm2, %v995_v19, %v994_v25 }
 0x96a   :  { %v997_v30 = vsel %vm240_vm3, %v996_v27, %v993_v26 }
 0x96b   :  { %v999_v11 = vsel %vm243_vm4, %v997_v30, -inf }
 0x96c   :  { %1000 = vmax.xlane.f32.xlu0 %v999_v11 }
 0x9ae   :  { %v3308_v54 = vpop.permute.xlu1 %696 }
 0x9af   :  { %2400 = vmatmul.msk.f32.vlgmr.msra.gmra.mxu3 %vm136_vm0, %v3308_v54 }
 0x9b0   :  { %1241 = vmatpush.msra.mxu3 %v3081_v31 }
 0x9b2   :  { %1242 = vmatpush.msra.mxu3 %v3086_v32 }
 0x9b4   :  { %1243 = vmatpush.msra.mxu3 %v3092_v6 }
 0x9b6   :  { %1244 = vmatpush.msra.mxu3 %v3098_v41 }
 0x9b8   :  { %1245 = vmatpush.msra.mxu3 %v3104_v42 }
 0x9ba   :  { %1246 = vmatpush.msra.mxu3 %v3110_v43 }
 0x9bc   :  { %1247 = vmatpush.msra.mxu3 %v3116_v51 }
 0x9be   :  { %1248 = vmatpush.msra.mxu3 %v3128_v61 }
 0x9df   :  { %v1001_v52 = vpop.xlane.xlu0 %1000 }
 0x9e0   :  { %v1003_v3 = vperm.slane %v1001_v52, 0  ;;  %v1004_v16 = vperm.slane %v1001_v52, 1 }
 0x9e2   :  { %v1007_v62 = vsub.f32 %v983_v5, %v1003_v3  ;;  %v1008_v24 = vsub.f32 %v984_v2, %v1003_v3  ;;  %v1009_v31 = vsub.f32 %v985_v59, %v1004_v16  ;;  %v1010_v6 = vsub.f32 %v986_v7, %v1004_v16 }
 0x9e4   :  { %v1011_v18 = vmul.f32 1.442695, %v1007_v62  ;;  %v1013_v32 = vmul.f32 1.442695, %v1008_v24  ;;  %v1015_v17 = vmul.f32 1.442695, %v1009_v31 }
 0x9e5   :  { %v1017_v41 = vmul.f32 1.442695, %v1010_v6 }
 0x9e6   :  { %2506 = vpow2.f32 %v1011_v18 }
 0x9e7   :  { %2508 = vpow2.f32 %v1013_v32 }
 0x9e8   :  { %2510 = vpow2.f32 %v1015_v17 }
 0x9e9   :  { %2512 = vpow2.f32 %v1017_v41 }
 0x9ec   :  { %v2507_v42 = vpop.eup %2506 }
 0x9ed   :  { %v2509_v43 = vpop.eup %2508  ;;  %1024 = vperm.xlu2 %2465, %v2507_v42  }
 0x9ee   :  { %v2511_v51 = vpop.eup %2510  ;;  %1027 = vperm.xlu0 %2466, %v2509_v43  }
 0x9ef   :  { %1030 = vperm.xlu1 %2467, %v2511_v51   ;;  %v2513_v61 = vpop.eup %2512 }
 0x9f5   :  { %1033 = vperm.xlu2 %2465, %v2513_v61  }
 0xa47   :  { %v1025_v5 = vpop.permute.xlu2 %1024 }
 0xa48   :  { %v1035_v19 = vperm.slane %v1025_v5, %v2893_v45 }
 0xa4f   :  { %v1034_v2 = vpop.permute.xlu2 %1033 }
 0xa50   :  { %v1039_v26 = vperm.slane %v1034_v2, %v2898_v47 }
 0xa60   :  { %v1028_v59 = vpop.permute.xlu0 %1027 }
 0xa61   :  { %v1031_v25 = vpop.permute.xlu1 %1030  ;;  %v1036_v7 = vperm.slane %v1028_v59, %v2898_v47 }
 0xa62   :  { %v1038_v27 = vperm.slane %v1031_v25, %v2893_v45 }
 0xa63   :  { %v1037_v30 = vsel %vm235_vm2, %v1036_v7, %v1035_v19  ;;  %v692_v7 = vpop.f32.mrf.mxu2 }
 0xa64   :  { %v1040_v11 = vsel %vm235_vm2, %v1039_v26, %v1038_v27  ;;  %v717_v26 = vpop.f32.mrf.mxu3 }
 0xa65   :  { %v1041_v52 = vsel %vm240_vm3, %v1040_v11, %v1037_v30  ;;  %v693_v30 = vadd.f32 %v692_v7, %v3270_v20 }
 0xa66   :  { %v1043_v3 = vsel %vm243_vm4, %v1041_v52, 0.0 }
 0xa67   :  { %1044 = vadd.xlane.f32.xlu1 %v1043_v3  ;;  %v720_v11 = vadd.f32 %v717_v26, %v693_v30  ;;  %v3347_v26 = vld [vmem:[%s3898_s28 + $0x18] sm:$0xff] }
 0xada   :  { %v1045_v16 = vpop.xlane.xlu1 %1044 }
 0xadb   :  { %2514 = vrcp.f32 %v1045_v16  ;;  %v1057_v18 = vand.u32 2147483648, %v1045_v16  ;;  %v1055_v17 = vand.u32 2147483647, %v1045_v16  ;;  %vm1051_vm8 = vweird.f32 %v1045_v16 }
 0xadc   :  { %2516 = vtanh.f32 %v720_v11 }
 0xadd   :  { %v1058_v41 = vor.u32 1.1754944e-38, %v1057_v18  ;;  %vm1056_vm11 = vcmp.eq.f32.partialorder %v1055_v17, 8.507059e+37  ;;  %v3339_v17 = vld [vmem:[%s3898_s28] sm:$0xff] }
 0xae1   :  { %v2515_v62 = vpop.eup %2514 }
 0xae2   :  { %v1047_v24 = vmul.f32 %v2515_v62, %v1045_v16  ;;  %vm1052_vm7 = vweird.f32 %v2515_v62  ;;  %v2517_v16 = vpop.eup %2516 }
 0xae3   :  { %vm1053_vm10 = vmor %vm1051_vm8, %vm1052_vm7 }
 0xae4   :  { %v1048_v31 = vsub.f32 1.0, %v1047_v24 }
 0xae6   :  { %v1049_v32 = vmul.f32 %v2515_v62, %v1048_v31 }
 0xae8   :  { %v1050_v6 = vadd.f32 %v2515_v62, %v1049_v32  ;;  %v3333_v32 = vld [vmem:[%s3898_s28 + $0x8] sm:$0xff] }
 0xaea   :  { %v1054_v5 = vsel %vm1053_vm10, %v2515_v62, %v1050_v6  ;;  %v2401_v62 = vmul.f32 -1.442695, %v720_v11 }
 0xaeb   :  { %v1059_v2 = vsel %vm1056_vm11, %v1058_v41, %v1054_v5 }
 0xaec   :  { %v1061_v59 = vperm.slane %v1059_v2, 0  ;;  %v1062_v27 = vperm.slane %v1059_v2, 1  ;;  %2518 = vpow2.f32 %v2401_v62 }
 0xaee   :  { %v1066_v19 = vmul.f32 %v2509_v43, %v1061_v59  ;;  %v1065_v25 = vmul.f32 %v2507_v42, %v1061_v59  ;;  %v1068_v52 = vmul.f32 %v2513_v61, %v1062_v27  ;;  %v1067_v3 = vmul.f32 %v2511_v51, %v1062_v27 }
 0xaf0   :  { %1076 = vperm.xlu2 %2465, %v1066_v19   ;;  %1071 = vperm.xlu0 %2466, %v1065_v25  }
 0xaf2   :  { %v2519_v43 = vpop.eup %2518 }
 0xaf3   :  { %v724_v42 = vadd.f32 1.0, %v2519_v43 }
 0xaf5   :  { %2520 = vrcp.f32 %v724_v42  ;;  %v736_v62 = vand.u32 2147483648, %v724_v42  ;;  %vm730_vm13 = vweird.f32 %v724_v42 }
 0xaf8   :  { %1086 = vperm.xlu2 %2465, %v1068_v52   ;;  %1081 = vperm.xlu0 %2466, %v1067_v3   ;;  %v3353_v52 = vld [vmem:[%s3898_s28 + $0x10] sm:$0xff] }
 0xafb   :  { %v2521_v24 = vpop.eup %2520 }
 0xafc   :  { %v726_v18 = vmul.f32 %v2521_v24, %v724_v42  ;;  %vm731_vm12 = vweird.f32 %v2521_v24 }
 0xafd   :  { %vm732_vm14 = vmor %vm730_vm13, %vm731_vm12 }
 0xafe   :  { %v727_v41 = vsub.f32 1.0, %v726_v18  ;;  %v734_v18 = vand.u32 2147483647, %v724_v42 }
 0xb00   :  { %743 = vrot.lane.b32.xlu0 %v2517_v16, %s2685_s4  ;;  %v728_v25 = vmul.f32 %v2521_v24, %v727_v41  ;;  %vm735_vm15 = vcmp.eq.f32.partialorder %v734_v18, 8.507059e+37 }
 0xb02   :  { %v729_v16 = vadd.f32 %v2521_v24, %v728_v25 }
 0xb4a   :  { %v1077_v31 = vpop.permute.xlu2 %1076 }
 0xb4b   :  { %v1090_v51 = vmul.f32 %v3333_v32, %v1077_v31 }
 0xb4d   :  { %v1094_v5 = vsel %vm136_vm0, %v1090_v51, 0.0 }
 0xb52   :  { %v1087_v59 = vpop.permute.xlu2 %1086 }
 0xb53   :  { %v1092_v27 = vmul.f32 %v3347_v26, %v1087_v59 }
 0xb55   :  { %v1103_v43 = vsel %vm136_vm0, %v1092_v27, 0.0 }
 0xb62   :  { %v1072_v61 = vpop.permute.xlu0 %1071 }
 0xb63   :  { %v1089_v6 = vmul.f32 %v3339_v17, %v1072_v61 }
 0xb65   :  { %v1093_v2 = vsel %vm136_vm0, %v1089_v6, 0.0  ;;  %v733_v6 = vsel %vm732_vm14, %v2521_v24, %v729_v16 }
 0xb66   :  { %v1095_v19 = vadd.f32 %v1094_v5, %v1093_v2  ;;  %v737_v5 = vor.u32 1.1754944e-38, %v736_v62 }
 0xb68   :  { %v1096_v7 = vrot.slane %v1095_v19, 4 }
 0xb6a   :  { %v1097_v30 = vadd.f32 %v1096_v7, %v1095_v19  ;;  %v1082_v11 = vpop.permute.xlu0 %1081  ;;  %v738_v19 = vsel %vm735_vm15, %v737_v5, %v733_v6 }
 0xb6b   :  { %v1091_v3 = vmul.f32 %v3353_v52, %v1082_v11  ;;  %v741_v24 = vmul.f32 %v738_v19, %v3288_v23 }
 0xb6c   :  { %v1098_v51 = vrot.slane %v1097_v30, 2 }
 0xb6d   :  { %v1102_v31 = vsel %vm136_vm0, %v1091_v3, 0.0 }
 0xb6e   :  { %v1104_v61 = vadd.f32 %v1103_v43, %v1102_v31  ;;  %v1099_v2 = vadd.f32 %v1098_v51, %v1097_v30 }
 0xb70   :  { %v1105_v41 = vrot.slane %v1104_v61, 4  ;;  %v1100_v27 = vrot.slane %v1099_v2, 1 }
 0xb72   :  { %v1106_v59 = vadd.f32 %v1105_v41, %v1104_v61  ;;  %v744_v7 = vpop.permute.xlu0 %743  ;;  %v1101_v58 = vadd.f32 %v1100_v27, %v1099_v2 }
 0xb73   :  { %v746_v25 = vmul.f32 %v744_v7, %v738_v19 }
 0xb74   :  { %v1107_v11 = vrot.slane %v1106_v59, 2 }
 0xb75   :  { %748 = vrot.lane.b32.xlu2 %v746_v25, %s2686_s2 }
 0xb76   :  { %v1108_v60 = vadd.f32 %v1107_v11, %v1106_v59 }
 0xb78   :  { %v1109_v3 = vrot.slane %v1108_v60, 1 }
 0xb7a   :  { %v1110_v42 = vadd.f32 %v1109_v3, %v1108_v60 }
 0xb7c   :  { %v1113_v43 = vsel %vm240_vm3, %v1110_v42, %v1101_v58  ;;  %v780_v58 = vpop.f32.mrf.mxu0 }
 0xb7d   :  { %2410 = vmatmul.msk.f32.vlgmr.msra.gmra.mxu0 %vm136_vm0, %v1113_v43  ;;  %v781_v6 = vadd.f32 %v780_v58, %v3270_v20 }
 0xb7e   :  { %1332 = vmatpush.msra.mxu0 %v3139_v9 }
 0xb80   :  { %1333 = vmatpush.msra.mxu0 %v3157_v10 }
 0xbcf   :  { %v749_v30 = vpop.permute.xlu2 %748 }
 0xbd0   :  { %v3364_v16 = vadd.f32 %v749_v30, %v741_v24 }
 0xbd2   :  { %2522 = vtanh.f32 %v3364_v16 }
 0xbd8   :  { %v2523_v62 = vpop.eup %2522 }
 0xbd9   :  { %754 = vrot.lane.b32.xlu0 %v2523_v62, %s2685_s4 }
 0xbfa   :  { %v1133_v51 = vpop.f32.mrf.mxu0 }
 0xbfb   :  { %v1134_v23 = vadd.f32 %v3035_v40, %v1133_v51 }
 0xbfd   :  { %v1136_v61 = vsel %vm136_vm0, %v1134_v23, %v3144_v1  ;;  %v3392_v23 = vpop.f32.mrf.mxu2 }
 0xc4b   :  { %v755_v31 = vpop.permute.xlu0 %754 }
 0xc4c   :  { %v3368_v60 = vmul.f32 %v755_v31, %v738_v19 }
 0xc4e   :  { %784 = vrot.lane.b32.xlu2 %v3368_v60, %s2686_s2 }
 0xca8   :  { %v785_v18 = vpop.permute.xlu2 %784 }
 0xca9   :  { %2404 = vmatmul.msk.f32.vlgmr.msrb.gmra.mxu1 %vm136_vm0, %v785_v18 }
 0xcaa   :  { %1395 = vmatpush.msrb.mxu1 %v3139_v9 }
 0xcac   :  { %1396 = vmatpush.msrb.mxu1 %v3157_v10 }
 0xcb1   :  { %2411 = vmatmul.msk.f32.vlgmr.msra.gmra.mxu1 %vm388_vm9, %v1136_v61 }
 0xcb2   :  { %1571 = vmatpush.msra.mxu1 %v3139_v9 }
 0xcb4   :  { %1572 = vmatpush.msra.mxu1 %v3157_v10 }
 0xd26   :  { %v805_v41 = vpop.f32.mrf.mxu1 }
 0xd27   :  { %v808_v5 = vadd.f32 %v805_v41, %v781_v6 }
 0xd29   :  { %2524 = vtanh.f32 %v808_v5  ;;  %v2405_v25 = vmul.f32 -1.442695, %v808_v5 }
 0xd2b   :  { %2526 = vpow2.f32 %v2405_v25 }
 0xd2e   :  { %v1157_v2 = vpop.f32.mrf.mxu1 }
 0xd2f   :  { %v2525_v59 = vpop.eup %2524  ;;  %v1158_v40 = vadd.f32 %v3061_v50, %v1157_v2 }
 0xd30   :  { %831 = vrot.lane.b32.xlu0 %v2525_v59, %s2685_s4 }
 0xd31   :  { %v1160_v19 = vmax.f32 %v1158_v40, 0.0  ;;  %v2527_v11 = vpop.eup %2526 }
 0xd32   :  { %v812_v50 = vadd.f32 1.0, %v2527_v11 }
 0xd33   :  { %v1161_v7 = vsel %vm136_vm0, %v1160_v19, %v3144_v1 }
 0xd34   :  { %2412 = vmatmul.msk.f32.vlgmr.msra.gmra.mxu2 %vm388_vm9, %v1161_v7  ;;  %2528 = vrcp.f32 %v812_v50  ;;  %v824_v24 = vand.u32 2147483648, %v812_v50  ;;  %vm818_vm6 = vweird.f32 %v812_v50  ;;  %v822_v30 = vand.u32 2147483647, %v812_v50 }
 0xd35   :  { %1594 = vmatpush.msra.mxu2 %v3167_v4 }
 0xd36   :  { %v825_v31 = vor.u32 1.1754944e-38, %v824_v24  ;;  %vm823_vm8 = vcmp.eq.f32.partialorder %v822_v30, 8.507059e+37 }
 0xd37   :  { %1595 = vmatpush.msra.mxu2 %v3176_v12 }
 0xd39   :  { %1596 = vmatpush.msra.mxu2 %v3181_v13 }
 0xd3a   :  { %v2529_v27 = vpop.eup %2528 }
 0xd3b   :  { %1597 = vmatpush.msra.mxu2 %v3190_v15  ;;  %v814_v3 = vmul.f32 %v2529_v27, %v812_v50  ;;  %vm819_vm5 = vweird.f32 %v2529_v27 }
 0xd3c   :  { %vm820_vm7 = vmor %vm818_vm6, %vm819_vm5 }
 0xd3d   :  { %v815_v42 = vsub.f32 1.0, %v814_v3 }
 0xd3f   :  { %v816_v43 = vmul.f32 %v2529_v27, %v815_v42 }
 0xd41   :  { %v817_v1 = vadd.f32 %v2529_v27, %v816_v43 }
 0xd43   :  { %v821_v62 = vsel %vm820_vm7, %v2529_v27, %v817_v1 }
 0xd44   :  { %v826_v18 = vsel %vm823_vm8, %v825_v31, %v821_v62 }
 0xd45   :  { %v829_v27 = vmul.f32 %v826_v18, %v3364_v16 }
 0xda2   :  { %v832_v58 = vpop.permute.xlu0 %831 }
 0xda3   :  { %v834_v51 = vmul.f32 %v832_v58, %v826_v18 }
 0xda5   :  { %836 = vrot.lane.b32.xlu0 %v834_v51, %s2686_s2 }
 0xdb7   :  { %v1182_v61 = vpop.f32.mrf.mxu2 }
 0xdb8   :  { %v1183_v6 = vadd.f32 %v3069_v63, %v1182_v61 }
 0xdba   :  { %2530 = vtanh.f32 %v1183_v6  ;;  %v2413_v5 = vmul.f32 -1.442695, %v1183_v6 }
 0xdbc   :  { %2532 = vpow2.f32 %v2413_v5 }
 0xdc0   :  { %v2531_v41 = vpop.eup %2530 }
 0xdc1   :  { %1207 = vrot.lane.b32.xlu2 %v2531_v41, %s2685_s4 }
 0xdc2   :  { %v2533_v2 = vpop.eup %2532 }
 0xdc3   :  { %v1188_v59 = vadd.f32 1.0, %v2533_v2  ;;  %v2420_v2 = vld [vmem:[%s3874_s1 + $0xa] sm:$0x3] }
 0xdc4   :  { %2421 = vmatmul.msk.f32.vlgmr.msrb.gmra.mxu1 %vm203_vm1, %v2420_v2 }
 0xdc5   :  { %2534 = vrcp.f32 %v1188_v59  ;;  %v1200_v50 = vand.u32 2147483648, %v1188_v59  ;;  %vm1194_vm11 = vweird.f32 %v1188_v59  ;;  %v1198_v63 = vand.u32 2147483647, %v1188_v59  ;;  %1875 = vmatpush.msrb.mxu1 %v3005_v34 }
 0xdc7   :  { %v1201_v1 = vor.u32 1.1754944e-38, %v1200_v50  ;;  %vm1199_vm13 = vcmp.eq.f32.partialorder %v1198_v63, 8.507059e+37  ;;  %1876 = vmatpush.msrb.mxu1 %v3010_v36  ;;  %v2652_v36 = vld [vmem:[%s3903_s25 + $0x18] sm:$0xff]  ;;  %v2664_v63 = vld [vmem:[%s3902_s5] ss:$0 sm:$0xff] }
 0xdc9   :  { %1877 = vmatpush.msrb.mxu1 %v3016_v37  ;;  %v2653_v37 = vld [vmem:[%s3903_s25 + $0x10] sm:$0xff] }
 0xdcb   :  { %v2535_v40 = vpop.eup %2534  ;;  %1878 = vmatpush.msrb.mxu1 %v3022_v38  ;;  %v2654_v38 = vld [vmem:[%s3903_s25 + $0x8] sm:$0xff] }
 0xdcc   :  { %v1190_v19 = vmul.f32 %v2535_v40, %v1188_v59  ;;  %vm1195_vm10 = vweird.f32 %v2535_v40 }
 0xdcd   :  { %vm1196_vm12 = vmor %vm1194_vm11, %vm1195_vm10  ;;  %1879 = vmatpush.msrb.mxu1 %v3028_v39  ;;  %v2655_v39 = vld [vmem:[%s3903_s25] sm:$0xff] }
 0xdce   :  { %v1191_v7 = vsub.f32 1.0, %v1190_v19  ;;  %v2661_v19 = vld [vmem:[%s3866_s9 + $0x10] sm:$0xff] }
 0xdcf   :  { %1880 = vmatpush.msrb.mxu1 %v3043_v44  ;;  %v2424_v44 = vld [vmem:[%s3874_s1 + $0xc] sm:$0x3] }
 0xdd0   :  { %v1192_v25 = vmul.f32 %v2535_v40, %v1191_v7  ;;  %v2662_v7 = vld [vmem:[%s3866_s9 + $0x8] sm:$0xff] }
 0xdd1   :  { %1881 = vmatpush.msrb.mxu1 %v3049_v48  ;;  %v2428_v48 = vld [vmem:[%s3874_s1 + $0xe] sm:$0x3] }
 0xdd2   :  { %v1193_v11 = vadd.f32 %v2535_v40, %v1192_v25  ;;  %2429 = vmatmul.msk.f32.vlgmr.msra.gmra.mxu1 %vm203_vm1, %v2428_v48  ;;  %v2663_v25 = vld [vmem:[%s3866_s9] sm:$0xff] }
 0xdd3   :  { %1882 = vmatpush.msrb.mxu1 %v3054_v49 }
 0xdd4   :  { %v1197_v43 = vsel %vm1196_vm12, %v2535_v40, %v1193_v11 }
 0xdd5   :  { %v1202_v30 = vsel %vm1199_vm13, %v1201_v1, %v1197_v43  ;;  %2120 = vmatpush.msra.mxu1 %v3167_v4 }
 0xdd6   :  { %v1205_v51 = vmul.f32 %v1202_v30, %v3074_v28 }
 0xdd7   :  { %2121 = vmatpush.msra.mxu1 %v3176_v12 }
 0xdd9   :  { %2122 = vmatpush.msra.mxu1 %v3181_v13 }
 0xddb   :  { %2123 = vmatpush.msra.mxu1 %v3190_v15 }
 0xe17   :  { %v837_v3 = vpop.permute.xlu0 %836 }
 0xe18   :  { %v3397_v42 = vadd.f32 %v837_v3, %v829_v27 }
 0xe1a   :  { %2536 = vtanh.f32 %v3397_v42 }
 0xe1b   :  { %v1208_v24 = vpop.permute.xlu2 %1207 }
 0xe1c   :  { %v1210_v62 = vmul.f32 %v1208_v24, %v1202_v30 }
 0xe1e   :  { %1212 = vrot.lane.b32.xlu1 %v1210_v62, %s2686_s2 }
 0xe20   :  { %v2537_v31 = vpop.eup %2536 }
 0xe21   :  { %842 = vrot.lane.b32.xlu2 %v2537_v31, %s2685_s4 }
 0xe7b   :  { %v843_v16 = vpop.permute.xlu2 %842 }
 0xe7c   :  { %v3402_v58 = vmul.f32 %v843_v16, %v826_v18 }
 0xe7e   :  { %872 = vrot.lane.b32.xlu2 %v3402_v58, %s2686_s2 }
 0xe90   :  { %v1213_v61 = vpop.permute.xlu1 %1212 }
 0xe91   :  { %v3407_v6 = vadd.f32 %v1213_v61, %v1205_v51 }
 0xe93   :  { %2538 = vtanh.f32 %v3407_v6 }
 0xe99   :  { %v2539_v41 = vpop.eup %2538 }
 0xe9a   :  { %1218 = vrot.lane.b32.xlu0 %v2539_v41, %s2685_s4 }
 0xea2   :  { %1222 = vrot.lane.b32.xlu0 %v3121_v53, %s2686_s2 }
 0xed8   :  { %v873_v5 = vpop.permute.xlu2 %872 }
 0xed9   :  { %2408 = vmatmul.msk.f32.vlgmr.msrb.gmra.mxu3 %vm136_vm0, %v873_v5 }
 0xeda   :  { %1483 = vmatpush.msrb.mxu3 %v3139_v9 }
 0xedc   :  { %1484 = vmatpush.msrb.mxu3 %v3157_v10 }
 0xf0c   :  { %v1219_v18 = vpop.permute.xlu0 %1218 }
 0xf0d   :  { %v3416_v28 = vmul.f32 %v1219_v18, %v1202_v30 }
 0xf0f   :  { %1226 = vrot.lane.b32.xlu2 %v3416_v28, %s2685_s4 }
 0xf14   :  { %v1223_v53 = vpop.permute.xlu0 %1222 }
 0xf5c   :  { %v3463_v49 = vpop.f32.mrf.mxu3 }
 0xf69   :  { %v3432_v9 = vpop.permute.xlu2 %1226 }
 0xf6a   :  { %v1229_v34 = vsel %vm136_vm0, %v1223_v53, %v3432_v9 }
 0xf6b   :  { %2414 = vmatmul.msk.f32.vlgmr.msra.gmra.mxu3 %vm388_vm9, %v1229_v34 }
 0xf6c   :  { %1830 = vmatpush.msra.mxu3 %v2652_v36 }
 0xf6e   :  { %1831 = vmatpush.msra.mxu3 %v2653_v37 }
 0xf70   :  { %1832 = vmatpush.msra.mxu3 %v2654_v38 }
 0xf72   :  { %1833 = vmatpush.msra.mxu3 %v2655_v39 }
 0xf73   :  { %2425 = vmatmul.msk.f32.vlgmr.msrb.gmra.mxu3 %vm203_vm1, %v2424_v44 }
 0xf74   :  { %2009 = vmatpush.msrb.mxu3 %v3134_v0 }
 0xf76   :  { %2010 = vmatpush.msrb.mxu3 %v3152_v8 }
 0xfee   :  { %v3465_v10 = vpop.f32.mrf.mxu3 }
 0xfef   :  { %v3469_v0 = vadd.f32 %v3222_v55, %v3465_v10  ;;  %v1650_v8 = vadd.f32 %v3465_v10, %v3224_v56  ;;  %v2417_v55 = vld [vmem:[%s3874_s1 + $0x8] sm:$0x3]  ;;  %v2656_v56 = vld [vmem:[%s3866_s9 + $0x38] sm:$0xff] }
 0xff1   :  { %v1254_v59 = vmax.f32 %v3469_v0, 0.0  ;;  %v1653_v40 = vperm.slane %v1650_v8, 0  ;;  %v1652_v16 = vrot.slane %v1650_v8, 1 }
 0xff3   :  { %1655 = vrot.lane.b32.xlu2 %v1653_v40, %s2689_s29  ;;  %2416 = vmatmul.msk.f32.vlgmr.msrb.gmra.mxu0 %vm203_vm1, %v1254_v59  ;;  %v1654_v51 = vperm.slane %v1652_v16, 0 }
 0xff4   :  { %1506 = vmatpush.msrb.mxu0 %v3167_v4  ;;  %v2657_v4 = vld [vmem:[%s3866_s9 + $0x30] sm:$0xff] }
 0xff6   :  { %1507 = vmatpush.msrb.mxu0 %v3176_v12  ;;  %v2658_v12 = vld [vmem:[%s3866_s9 + $0x28] sm:$0xff] }
 0xff8   :  { %1508 = vmatpush.msrb.mxu0 %v3181_v13  ;;  %v2659_v13 = vld [vmem:[%s3866_s9 + $0x20] sm:$0xff] }
 0xffa   :  { %1509 = vmatpush.msrb.mxu0 %v3190_v15  ;;  %v2660_v15 = vld [vmem:[%s3866_s9 + $0x18] sm:$0xff] }
 0xffb   :  { %2418 = vmatmul.msk.f32.vlgmr.msra.gmra.mxu0 %vm203_vm1, %v2417_v55 }
 0xffc   :  { %1850 = vmatpush.msra.mxu0 %v2656_v56 }
 0xffe   :  { %1851 = vmatpush.msra.mxu0 %v2657_v4 }
0x1000   :  { %1852 = vmatpush.msra.mxu0 %v2658_v12 }
0x1002   :  { %1853 = vmatpush.msra.mxu0 %v2659_v13 }
0x1004   :  { %1854 = vmatpush.msra.mxu0 %v2660_v15 }
0x1006   :  { %1855 = vmatpush.msra.mxu0 %v2661_v19 }
0x1008   :  { %1856 = vmatpush.msra.mxu0 %v2662_v7 }
0x100a   :  { %1857 = vmatpush.msra.mxu0 %v2663_v25 }
0x104d   :  { %v1656_v11 = vpop.permute.xlu2 %1655 }
0x104e   :  { %v1661_v50 = vadd.f32 %v1656_v11, %v2867_v14  ;;  %v1662_v61 = vadd.f32 %v1656_v11, %v2876_v21 }
0x1050   :  { %v1665_v27 = vmax.f32 %v1661_v50, 0.0  ;;  %v1666_v41 = vmax.f32 %v1662_v61, 0.0 }
0x1052   :  { %v1669_v3 = vmul.f32 %v2664_v63, %v1665_v27  ;;  %v1670_v5 = vmul.f32 %v2664_v63, %v1666_v41 }
0x1054   :  { %v1673_v43 = vsel %vm203_vm1, %v1669_v3, 0.0 }
0x1055   :  { %1674 = vadd.xlane.f32.xlu2 %v1673_v43 }
0x1070   :  { %v1310_v1 = vpop.f32.mrf.mxu0 }
0x1071   :  { %v3516_v24 = vadd.f32 %v3267_v33, %v1310_v1  ;;  %v1676_v33 = vsel %vm203_vm1, %v1670_v5, 0.0 }
0x1078   :  { %v1335_v30 = vpop.f32.mrf.mxu0 }
0x1079   :  { %v1336_v62 = vadd.f32 %v1335_v30, %v3516_v24 }
0x107b   :  { %v1338_v31 = vadd.f32 %v1336_v62, %v3272_v22 }
0x107d   :  { %2540 = vtanh.f32 %v1338_v31  ;;  %v2419_v18 = vmul.f32 -1.442695, %v1338_v31 }
0x107f   :  { %2542 = vpow2.f32 %v2419_v18 }
0x1083   :  { %v2541_v14 = vpop.eup %2540 }
0x1084   :  { %1361 = vrot.lane.b32.xlu0 %v2541_v14, %s2685_s4 }
0x1085   :  { %v2543_v2 = vpop.eup %2542 }
0x1086   :  { %v1342_v53 = vadd.f32 1.0, %v2543_v2 }
0x1088   :  { %2544 = vrcp.f32 %v1342_v53  ;;  %v1354_v44 = vand.u32 2147483648, %v1342_v53  ;;  %vm1348_vm15 = vweird.f32 %v1342_v53  ;;  %v1352_v48 = vand.u32 2147483647, %v1342_v53 }
0x108a   :  { %v1355_v8 = vor.u32 1.1754944e-38, %v1354_v44  ;;  %vm1353_vm6 = vcmp.eq.f32.partialorder %v1352_v48, 8.507059e+37  ;;  %v2668_v44 = vld [vmem:[%s3870_s13 + $0x20] sm:$0xff]  ;;  %v2669_v48 = vld [vmem:[%s3870_s13 + $0x18] sm:$0xff] }
0x108c   :  { %1657 = vrot.lane.b32.xlu0 %v1654_v51, %s2689_s29 }
0x108e   :  { %v2545_v34 = vpop.eup %2544 }
0x108f   :  { %v1344_v36 = vmul.f32 %v2545_v34, %v1342_v53  ;;  %vm1349_vm14 = vweird.f32 %v2545_v34 }
0x1090   :  { %vm1350_vm5 = vmor %vm1348_vm15, %vm1349_vm14 }
0x1091   :  { %v1345_v37 = vsub.f32 1.0, %v1344_v36 }
0x1093   :  { %v1346_v38 = vmul.f32 %v2545_v34, %v1345_v37 }
0x1095   :  { %v1347_v39 = vadd.f32 %v2545_v34, %v1346_v38  ;;  %v2666_v38 = vld [vmem:[%s3870_s13 + $0x30] sm:$0xff] }
0x1097   :  { %v1351_v21 = vsel %vm1350_vm5, %v2545_v34, %v1347_v39  ;;  %v2667_v39 = vld [vmem:[%s3870_s13 + $0x28] sm:$0xff] }
0x1098   :  { %v1356_v55 = vsel %vm1353_vm6, %v1355_v8, %v1351_v21  ;;  %v2670_v21 = vld [vmem:[%s3870_s13 + $0x10] sm:$0xff]  ;;  %v2671_v8 = vld [vmem:[%s3870_s13 + $0x8] sm:$0xff] }
0x1099   :  { %v1359_v7 = vmul.f32 0.0, %v1356_v55 }
0x10b6   :  { %1677 = vadd.xlane.f32.xlu0 %v1676_v33 }
0x10c8   :  { %v1675_v62 = vpop.xlane.xlu2 %1674 }
0x10c9   :  { %v1685_v51 = vadd.f32 %v1675_v62, %v2895_v46 }
0x10cb   :  { %v1693_v5 = vperm.slane %v1685_v51, %v2893_v45 }
0x10f6   :  { %v1362_v40 = vpop.permute.xlu0 %1361 }
0x10f7   :  { %v1364_v56 = vmul.f32 %v1362_v40, %v1356_v55  ;;  %v2672_v40 = vld [vmem:[%s3870_s13] sm:$0xff] }
0x10f9   :  { %1366 = vrot.lane.b32.xlu1 %v1364_v56, %s2686_s2 }
0x10fe   :  { %v1658_v4 = vpop.permute.xlu0 %1657 }
0x10ff   :  { %v1664_v12 = vadd.f32 %v1658_v4, %v2887_v35  ;;  %v1663_v27 = vadd.f32 %v1658_v4, %v2882_v29 }
0x1101   :  { %v1668_v13 = vmax.f32 %v1664_v12, 0.0  ;;  %v1667_v3 = vmax.f32 %v1663_v27, 0.0 }
0x1103   :  { %v1672_v15 = vmul.f32 %v2664_v63, %v1668_v13  ;;  %v1671_v43 = vmul.f32 %v2664_v63, %v1667_v3 }
0x1105   :  { %v1682_v19 = vsel %vm203_vm1, %v1672_v15, 0.0  ;;  %v1679_v35 = vsel %vm203_vm1, %v1671_v43, 0.0 }
0x1106   :  { %1683 = vadd.xlane.f32.xlu2 %v1682_v19 }
0x1129   :  { %v1678_v31 = vpop.xlane.xlu0 %1677 }
0x112a   :  { %v1686_v16 = vadd.f32 %v1678_v31, %v2895_v46 }
0x112c   :  { %v1694_v29 = vperm.slane %v1686_v16, %v2898_v47 }
0x112e   :  { %v1695_v2 = vsel %vm235_vm2, %v1694_v29, %v1693_v5 }
0x116b   :  { %v1367_v25 = vpop.permute.xlu1 %1366 }
0x116c   :  { %v3527_v11 = vadd.f32 %v1367_v25, %v1359_v7 }
0x116e   :  { %2546 = vtanh.f32 %v3527_v11 }
0x1174   :  { %v2547_v50 = vpop.eup %2546 }
0x1175   :  { %1372 = vrot.lane.b32.xlu1 %v2547_v50, %s2685_s4 }
0x1179   :  { %v1684_v14 = vpop.xlane.xlu2 %1683 }
0x117a   :  { %v1688_v61 = vadd.f32 %v1684_v14, %v2895_v46 }
0x117c   :  { %v1697_v33 = vperm.slane %v1688_v61, %v2898_v47 }
0x119f   :  { %1680 = vadd.xlane.f32.xlu1 %v1679_v35 }
0x11e7   :  { %v1373_v1 = vpop.permute.xlu1 %1372 }
0x11e8   :  { %v1375_v30 = vmul.f32 %v1373_v1, %v1356_v55 }
0x11ea   :  { %1402 = vrot.lane.b32.xlu0 %v1375_v30, %s2686_s2 }
0x1212   :  { %v1681_v41 = vpop.xlane.xlu1 %1680 }
0x1213   :  { %v1687_v63 = vadd.f32 %v1681_v41, %v2895_v46  ;;  %v2665_v46 = vld [vmem:[%s3870_s13 + $0x38] sm:$0xff] }
0x1215   :  { %v1696_v18 = vperm.slane %v1687_v63, %v2893_v45 }
0x1217   :  { %v1698_v53 = vsel %vm235_vm2, %v1697_v33, %v1696_v18 }
0x1218   :  { %v1699_v34 = vsel %vm240_vm3, %v1698_v53, %v1695_v2 }
0x1219   :  { %v1701_v36 = vsel %vm243_vm4, %v1699_v34, -inf }
0x121a   :  { %1702 = vmax.xlane.f32.xlu1 %v1701_v36 }
0x125c   :  { %v3546_v37 = vpop.permute.xlu0 %1402 }
0x125d   :  { %2422 = vmatmul.msk.f32.vlgmr.msrb.gmra.mxu2 %vm136_vm0, %v3546_v37 }
0x125e   :  { %1943 = vmatpush.msrb.mxu2 %v2665_v46 }
0x1260   :  { %1944 = vmatpush.msrb.mxu2 %v2666_v38 }
0x1262   :  { %1945 = vmatpush.msrb.mxu2 %v2667_v39 }
0x1264   :  { %1946 = vmatpush.msrb.mxu2 %v2668_v44 }
0x1266   :  { %1947 = vmatpush.msrb.mxu2 %v2669_v48 }
0x1268   :  { %1948 = vmatpush.msrb.mxu2 %v2670_v21 }
0x126a   :  { %1949 = vmatpush.msrb.mxu2 %v2671_v8 }
0x126c   :  { %1950 = vmatpush.msrb.mxu2 %v2672_v40  ;;  %v1398_v40 = vpop.f32.mrf.mxu1 }
0x128d   :  { %v1703_v55 = vpop.xlane.xlu1 %1702 }
0x128e   :  { %v1705_v56 = vperm.slane %v1703_v55, 0  ;;  %v1706_v4 = vperm.slane %v1703_v55, 1 }
0x1290   :  { %v1709_v12 = vsub.f32 %v1685_v51, %v1705_v56  ;;  %v1710_v13 = vsub.f32 %v1686_v16, %v1705_v56  ;;  %v1711_v15 = vsub.f32 %v1687_v63, %v1706_v4  ;;  %v1712_v50 = vsub.f32 %v1688_v61, %v1706_v4 }
0x1291   :  { %v1399_v4 = vadd.f32 %v1398_v40, %v3516_v24 }
0x1292   :  { %v1713_v19 = vmul.f32 1.442695, %v1709_v12  ;;  %v1715_v7 = vmul.f32 1.442695, %v1710_v13  ;;  %v1717_v25 = vmul.f32 1.442695, %v1711_v15 }
0x1293   :  { %v1719_v27 = vmul.f32 1.442695, %v1712_v50 }
0x1294   :  { %2548 = vpow2.f32 %v1713_v19 }
0x1295   :  { %2550 = vpow2.f32 %v1715_v7 }
0x1296   :  { %2552 = vpow2.f32 %v1717_v25 }
0x1297   :  { %2554 = vpow2.f32 %v1719_v27 }
0x129a   :  { %v2549_v3 = vpop.eup %2548 }
0x129b   :  { %v2551_v43 = vpop.eup %2550  ;;  %1726 = vperm.xlu2 %2465, %v2549_v3  }
0x129c   :  { %v2553_v35 = vpop.eup %2552  ;;  %1729 = vperm.xlu1 %2467, %v2551_v43  }
0x129d   :  { %1732 = vperm.xlu0 %2466, %v2553_v35   ;;  %v2555_v1 = vpop.eup %2554 }
0x12a3   :  { %1735 = vperm.xlu2 %2465, %v2555_v1  }
0x12e0   :  { %v1423_v55 = vpop.f32.mrf.mxu2 }
0x12e1   :  { %v1426_v12 = vadd.f32 %v1423_v55, %v1399_v4 }
0x12e3   :  { %v2423_v7 = vmul.f32 -1.442695, %v1426_v12 }
0x12f5   :  { %v1727_v30 = vpop.permute.xlu2 %1726 }
0x12f6   :  { %v1737_v14 = vperm.slane %v1727_v30, %v2893_v45 }
0x12fd   :  { %v1736_v62 = vpop.permute.xlu2 %1735 }
0x12fe   :  { %v1741_v61 = vperm.slane %v1736_v62, %v2898_v47 }
0x130e   :  { %v1730_v31 = vpop.permute.xlu1 %1729 }
0x130f   :  { %v1733_v16 = vpop.permute.xlu0 %1732  ;;  %v1738_v51 = vperm.slane %v1730_v31, %v2898_v47 }
0x1310   :  { %v1740_v41 = vperm.slane %v1733_v16, %v2893_v45 }
0x1311   :  { %v1739_v29 = vsel %vm235_vm2, %v1738_v51, %v1737_v14 }
0x1312   :  { %v1742_v63 = vsel %vm235_vm2, %v1741_v61, %v1740_v41 }
0x1313   :  { %v1743_v5 = vsel %vm240_vm3, %v1742_v63, %v1739_v29 }
0x1314   :  { %v1745_v33 = vsel %vm243_vm4, %v1743_v5, 0.0 }
0x1315   :  { %1746 = vadd.xlane.f32.xlu0 %v1745_v33 }
0x1388   :  { %v1747_v18 = vpop.xlane.xlu0 %1746 }
0x1389   :  { %2556 = vrcp.f32 %v1747_v18  ;;  %v1759_v36 = vand.u32 2147483648, %v1747_v18  ;;  %v1757_v47 = vand.u32 2147483647, %v1747_v18  ;;  %vm1753_vm8 = vweird.f32 %v1747_v18 }
0x138a   :  { %2558 = vtanh.f32 %v1426_v12  ;;  %v3598_v12 = vld [vmem:[%s3873_s18 + $0x8] sm:$0xff] }
0x138b   :  { %v1760_v45 = vor.u32 1.1754944e-38, %v1759_v36  ;;  %vm1758_vm11 = vcmp.eq.f32.partialorder %v1757_v47, 8.507059e+37  ;;  %2560 = vpow2.f32 %v2423_v7 }
0x138f   :  { %v2557_v2 = vpop.eup %2556 }
0x1390   :  { %v1749_v53 = vmul.f32 %v2557_v2, %v1747_v18  ;;  %vm1754_vm7 = vweird.f32 %v2557_v2  ;;  %v2559_v19 = vpop.eup %2558 }
0x1391   :  { %vm1755_vm10 = vmor %vm1753_vm8, %vm1754_vm7  ;;  %v2561_v25 = vpop.eup %2560 }
0x1392   :  { %v1750_v34 = vsub.f32 1.0, %v1749_v53  ;;  %v1430_v50 = vadd.f32 1.0, %v2561_v25 }
0x1394   :  { %v1751_v46 = vmul.f32 %v2557_v2, %v1750_v34  ;;  %2562 = vrcp.f32 %v1430_v50  ;;  %vm1436_vm4 = vweird.f32 %v1430_v50  ;;  %v1440_v53 = vand.u32 2147483647, %v1430_v50 }
0x1396   :  { %v1752_v38 = vadd.f32 %v2557_v2, %v1751_v46  ;;  %vm1441_vm13 = vcmp.eq.f32.partialorder %v1440_v53, 8.507059e+37 }
0x1398   :  { %v1756_v39 = vsel %vm1755_vm10, %v2557_v2, %v1752_v38 }
0x1399   :  { %v1761_v44 = vsel %vm1758_vm11, %v1760_v45, %v1756_v39 }
0x139a   :  { %v1763_v48 = vperm.slane %v1761_v44, 0  ;;  %v1764_v56 = vperm.slane %v1761_v44, 1  ;;  %v2563_v27 = vpop.eup %2562 }
0x139b   :  { %vm1437_vm2 = vweird.f32 %v2563_v27 }
0x139c   :  { %v1768_v21 = vmul.f32 %v2551_v43, %v1763_v48  ;;  %v1767_v8 = vmul.f32 %v2549_v3, %v1763_v48  ;;  %v1770_v13 = vmul.f32 %v2555_v1, %v1764_v56  ;;  %v1769_v15 = vmul.f32 %v2553_v35, %v1764_v56  ;;  %vm1438_vm12 = vmor %vm1436_vm4, %vm1437_vm2 }
0x139d   :  { %v1432_v43 = vmul.f32 %v2563_v27, %v1430_v50 }
0x139e   :  { %1778 = vperm.xlu2 %2465, %v1768_v21   ;;  %1773 = vperm.xlu1 %2467, %v1767_v8  }
0x139f   :  { %v1433_v35 = vsub.f32 1.0, %v1432_v43 }
0x13a1   :  { %v1434_v61 = vmul.f32 %v2563_v27, %v1433_v35 }
0x13a3   :  { %v1435_v18 = vadd.f32 %v2563_v27, %v1434_v61  ;;  %v2676_v61 = vld [vmem:[%s3867_s10] ss:$0 sm:$0xff]  ;;  %s2694_s10 = smov 34  }
0x13a5   :  { %v1439_v46 = vsel %vm1438_vm12, %v2563_v27, %v1435_v18  ;;  %v3656_v18 = vld [vmem:[%s3875_s20] sm:$0xff] }
0x13a6   :  { %1788 = vperm.xlu2 %2465, %v1770_v13   ;;  %1783 = vperm.xlu1 %2467, %v1769_v15   ;;  %v3604_v13 = vld [vmem:[%s3873_s18] sm:$0xff] }
0x13ae   :  { %1449 = vrot.lane.b32.xlu1 %v2559_v19, %s2685_s4 }
0x13f8   :  { %v1779_v3 = vpop.permute.xlu2 %1778 }
0x13f9   :  { %v1792_v30 = vmul.f32 %v3333_v32, %v1779_v3  ;;  %v1442_v32 = vand.u32 2147483648, %v1430_v50  ;;  %v1486_v3 = vpop.f32.mrf.mxu3 }
0x13fa   :  { %v1487_v35 = vadd.f32 %v1486_v3, %v3516_v24 }
0x13fb   :  { %v1796_v31 = vsel %vm136_vm0, %v1792_v30, 0.0  ;;  %v1443_v38 = vor.u32 1.1754944e-38, %v1442_v32 }
0x13fd   :  { %v1444_v39 = vsel %vm1441_vm13, %v1443_v38, %v1439_v46 }
0x13fe   :  { %v1447_v15 = vmul.f32 %v1444_v39, %v3527_v11  ;;  %v2675_v11 = vld [vmem:[%s3904_s30] ss:$0 sm:$0xff] }
0x1400   :  { %v1789_v16 = vpop.permute.xlu2 %1788 }
0x1401   :  { %v1794_v29 = vmul.f32 %v3347_v26, %v1789_v16 }
0x1410   :  { %v1774_v62 = vpop.permute.xlu1 %1773 }
0x1411   :  { %v1791_v1 = vmul.f32 %v3339_v17, %v1774_v62  ;;  %v1805_v17 = vsel %vm136_vm0, %v1794_v29, 0.0 }
0x1413   :  { %v1795_v14 = vsel %vm136_vm0, %v1791_v1, 0.0 }
0x1414   :  { %v1797_v51 = vadd.f32 %v1796_v31, %v1795_v14 }
0x1416   :  { %v1798_v41 = vrot.slane %v1797_v51, 4 }
0x1418   :  { %v1799_v63 = vadd.f32 %v1798_v41, %v1797_v51  ;;  %v1784_v5 = vpop.permute.xlu1 %1783 }
0x1419   :  { %v1793_v33 = vmul.f32 %v3353_v52, %v1784_v5  ;;  %v3638_v5 = vld [vmem:[%s3875_s20 + $0x18] sm:$0xff] }
0x141a   :  { %v1800_v34 = vrot.slane %v1799_v63, 2 }
0x141b   :  { %v1804_v2 = vsel %vm136_vm0, %v1793_v33, 0.0  ;;  %v3644_v33 = vld [vmem:[%s3875_s20 + $0x10] sm:$0xff] }
0x141c   :  { %v1806_v36 = vadd.f32 %v1805_v17, %v1804_v2  ;;  %v1801_v26 = vadd.f32 %v1800_v34, %v1799_v63 }
0x141e   :  { %v1807_v47 = vrot.slane %v1806_v36, 4  ;;  %v1802_v21 = vrot.slane %v1801_v26, 1 }
0x1420   :  { %v1808_v45 = vadd.f32 %v1807_v47, %v1806_v36  ;;  %v1450_v52 = vpop.permute.xlu1 %1449  ;;  %v1803_v55 = vadd.f32 %v1802_v21, %v1801_v26  ;;  %v3660_v21 = vpop.f32.mrf.mxu1 }
0x1421   :  { %v1452_v44 = vmul.f32 %v1450_v52, %v1444_v39 }
0x1422   :  { %v1809_v48 = vrot.slane %v1808_v45, 2 }
0x1423   :  { %1454 = vrot.lane.b32.xlu2 %v1452_v44, %s2686_s2 }
0x1424   :  { %v1810_v8 = vadd.f32 %v1809_v48, %v1808_v45 }
0x1426   :  { %v1811_v40 = vrot.slane %v1810_v8, 1 }
0x1428   :  { %v1812_v56 = vadd.f32 %v1811_v40, %v1810_v8  ;;  %v2681_v40 = vld [vmem:[%s3869_s12] ss:$0 sm:$0xff] }
0x142a   :  { %v1815_v4 = vsel %vm240_vm3, %v1812_v56, %v1803_v55 }
0x142b   :  { %2432 = vmatmul.msk.f32.vlgmr.msra.gmra.mxu3 %vm136_vm0, %v1815_v4 }
0x142c   :  { %2034 = vmatpush.msra.mxu3 %v3598_v12 }
0x142e   :  { %2035 = vmatpush.msra.mxu3 %v3604_v13 }
0x147d   :  { %v1455_v19 = vpop.permute.xlu2 %1454 }
0x147e   :  { %v3608_v7 = vadd.f32 %v1455_v19, %v1447_v15 }
0x1480   :  { %2564 = vtanh.f32 %v3608_v7 }
0x1486   :  { %v2565_v25 = vpop.eup %2564 }
0x1487   :  { %1460 = vrot.lane.b32.xlu1 %v2565_v25, %s2685_s4 }
0x14ae   :  { %v1835_v30 = vpop.f32.mrf.mxu3 }
0x14af   :  { %v1836_v62 = vadd.f32 %v2675_v11, %v1835_v30 }
0x14b1   :  { %v1838_v1 = vsel %vm136_vm0, %v1836_v62, %v3432_v9 }
0x14f9   :  { %v1461_v50 = vpop.permute.xlu1 %1460 }
0x14fa   :  { %v3612_v27 = vmul.f32 %v1461_v50, %v1444_v39 }
0x14fc   :  { %1490 = vrot.lane.b32.xlu2 %v3612_v27, %s2686_s2 }
0x1556   :  { %v1491_v43 = vpop.permute.xlu2 %1490 }
0x1557   :  { %2426 = vmatmul.msk.f32.vlgmr.msrb.gmra.mxu0 %vm136_vm0, %v1491_v43 }
0x1558   :  { %2097 = vmatpush.msrb.mxu0 %v3598_v12 }
0x155a   :  { %2098 = vmatpush.msrb.mxu0 %v3604_v13 }
0x155f   :  { %2433 = vmatmul.msk.f32.vlgmr.msra.gmra.mxu0 %vm388_vm9, %v1838_v1 }
0x1560   :  { %2273 = vmatpush.msra.mxu0 %v3598_v12 }
0x1562   :  { %2274 = vmatpush.msra.mxu0 %v3604_v13 }
0x15d4   :  { %v1511_v31 = vpop.f32.mrf.mxu0 }
0x15d5   :  { %v1514_v14 = vadd.f32 %v1511_v31, %v1487_v35 }
0x15d7   :  { %2566 = vtanh.f32 %v1514_v14  ;;  %v2427_v32 = vmul.f32 -1.442695, %v1514_v14 }
0x15d9   :  { %2568 = vpow2.f32 %v2427_v32 }
0x15dc   :  { %v1859_v16 = vpop.f32.mrf.mxu0 }
0x15dd   :  { %v2567_v51 = vpop.eup %2566  ;;  %v1860_v41 = vadd.f32 %v2676_v61, %v1859_v16 }
0x15de   :  { %1537 = vrot.lane.b32.xlu1 %v2567_v51, %s2685_s4 }
0x15df   :  { %v1862_v29 = vmax.f32 %v1860_v41, 0.0  ;;  %v2569_v17 = vpop.eup %2568 }
0x15e0   :  { %v1518_v2 = vadd.f32 1.0, %v2569_v17 }
0x15e1   :  { %v1863_v63 = vsel %vm136_vm0, %v1862_v29, %v3432_v9  ;;  %v3650_v9 = vld [vmem:[%s3875_s20 + $0x8] sm:$0xff] }
0x15e2   :  { %2434 = vmatmul.msk.f32.vlgmr.msrb.gmra.mxu1 %vm388_vm9, %v1863_v63  ;;  %2570 = vrcp.f32 %v1518_v2  ;;  %v1530_v38 = vand.u32 2147483648, %v1518_v2  ;;  %vm1524_vm14 = vweird.f32 %v1518_v2  ;;  %v1528_v26 = vand.u32 2147483647, %v1518_v2 }
0x15e3   :  { %2296 = vmatpush.msrb.mxu1 %v3638_v5 }
0x15e4   :  { %v1531_v39 = vor.u32 1.1754944e-38, %v1530_v38  ;;  %vm1529_vm5 = vcmp.eq.f32.partialorder %v1528_v26, 8.507059e+37  ;;  %v2442_v38 = vld [vmem:[%s3874_s1 + $0x12] sm:$0x3] }
0x15e5   :  { %2297 = vmatpush.msrb.mxu1 %v3644_v33  ;;  %2443 = vmatmul.msk.f32.vlgmr.msrb.gmra.mxu0 %vm203_vm1, %v2442_v38 }
0x15e7   :  { %2298 = vmatpush.msrb.mxu1 %v3650_v9 }
0x15e8   :  { %v2571_v53 = vpop.eup %2570 }
0x15e9   :  { %2299 = vmatpush.msrb.mxu1 %v3656_v18  ;;  %v1520_v34 = vmul.f32 %v2571_v53, %v1518_v2  ;;  %vm1525_vm3 = vweird.f32 %v2571_v53 }
0x15ea   :  { %vm1526_vm15 = vmor %vm1524_vm14, %vm1525_vm3 }
0x15eb   :  { %v1521_v36 = vsub.f32 1.0, %v1520_v34 }
0x15ed   :  { %v1522_v46 = vmul.f32 %v2571_v53, %v1521_v36 }
0x15ef   :  { %v1523_v47 = vadd.f32 %v2571_v53, %v1522_v46 }
0x15f1   :  { %v1527_v45 = vsel %vm1526_vm15, %v2571_v53, %v1523_v47 }
0x15f2   :  { %v1532_v44 = vsel %vm1529_vm5, %v1531_v39, %v1527_v45  ;;  %v2682_v39 = vld [vmem:[%s3871_s14] ss:$0 sm:$0xff] }
0x15f3   :  { %v1535_v16 = vmul.f32 %v1532_v44, %v3608_v7 }
0x1650   :  { %v1538_v52 = vpop.permute.xlu1 %1537 }
0x1651   :  { %v1540_v48 = vmul.f32 %v1538_v52, %v1532_v44 }
0x1653   :  { %1542 = vrot.lane.b32.xlu0 %v1540_v48, %s2686_s2  ;;  %v2439_v48 = vld [vmem:[%s3874_s1 + $0x10] sm:$0x3] }
0x165b   :  { %1924 = vrot.lane.b32.xlu0 %v3416_v28, %s2686_s2 }
0x165f   :  { %v1884_v8 = vpop.f32.mrf.mxu1 }
0x1660   :  { %v1885_v55 = vadd.f32 %v2681_v40, %v1884_v8  ;;  %v2683_v40 = vld [vmem:[%s3876_s21] ss:$0 sm:$0xff] }
0x1662   :  { %2572 = vtanh.f32 %v1885_v55  ;;  %v2435_v4 = vmul.f32 -1.442695, %v1885_v55 }
0x1664   :  { %2574 = vpow2.f32 %v2435_v4 }
0x1668   :  { %v2573_v56 = vpop.eup %2572 }
0x1669   :  { %1909 = vrot.lane.b32.xlu2 %v2573_v56, %s2685_s4 }
0x166a   :  { %v2575_v15 = vpop.eup %2574 }
0x166b   :  { %v1890_v19 = vadd.f32 1.0, %v2575_v15 }
0x166d   :  { %2576 = vrcp.f32 %v1890_v19  ;;  %v1902_v30 = vand.u32 2147483648, %v1890_v19  ;;  %vm1896_vm7 = vweird.f32 %v1890_v19  ;;  %v1900_v11 = vand.u32 2147483647, %v1890_v19 }
0x166f   :  { %v1903_v1 = vor.u32 1.1754944e-38, %v1902_v30  ;;  %vm1901_vm10 = vcmp.eq.f32.partialorder %v1900_v11, 8.507059e+37 }
0x1673   :  { %v2577_v25 = vpop.eup %2576 }
0x1674   :  { %v1892_v50 = vmul.f32 %v2577_v25, %v1890_v19  ;;  %vm1897_vm6 = vweird.f32 %v2577_v25 }
0x1675   :  { %vm1898_vm8 = vmor %vm1896_vm7, %vm1897_vm6 }
0x1676   :  { %v1893_v3 = vsub.f32 1.0, %v1892_v50 }
0x1678   :  { %v1894_v43 = vmul.f32 %v2577_v25, %v1893_v3 }
0x167a   :  { %v1895_v28 = vadd.f32 %v2577_v25, %v1894_v43 }
0x167c   :  { %v1899_v62 = vsel %vm1898_vm8, %v2577_v25, %v1895_v28 }
0x167d   :  { %v1904_v31 = vsel %vm1901_vm10, %v1903_v1, %v1899_v62  ;;  %vm527_vm10 = vcmask 254976  }
0x167e   :  { %v1907_v32 = vmul.f32 %v1904_v31, %v3407_v6 }
0x16c3   :  { %v1910_v35 = vpop.permute.xlu2 %1909 }
0x16c4   :  { %v1912_v14 = vmul.f32 %v1910_v35, %v1904_v31 }
0x16c5   :  { %v1543_v51 = vpop.permute.xlu0 %1542 }
0x16c6   :  { %v3669_v61 = vadd.f32 %v1543_v51, %v1535_v16  ;;  %1914 = vrot.lane.b32.xlu1 %v1912_v14, %s2686_s2 }
0x16c8   :  { %2578 = vtanh.f32 %v3669_v61 }
0x16cd   :  { %v1925_v46 = vpop.permute.xlu0 %1924 }
0x16ce   :  { %v2579_v41 = vpop.eup %2578 }
0x16cf   :  { %1548 = vrot.lane.b32.xlu2 %v2579_v41, %s2685_s4 }
0x1729   :  { %v1549_v29 = vpop.permute.xlu2 %1548 }
0x172a   :  { %v3674_v63 = vmul.f32 %v1549_v29, %v1532_v44 }
0x172c   :  { %1578 = vrot.lane.b32.xlu2 %v3674_v63, %s2686_s2 }
0x1738   :  { %v1915_v17 = vpop.permute.xlu1 %1914 }
0x1739   :  { %v1917_v7 = vadd.f32 %v1915_v17, %v1907_v32  ;;  %v2100_v17 = vpop.f32.mrf.mxu0 }
0x173b   :  { %2580 = vtanh.f32 %v1917_v7 }
0x1741   :  { %v2581_v2 = vpop.eup %2580 }
0x1742   :  { %1920 = vrot.lane.b32.xlu1 %v2581_v2, %s2685_s4 }
0x1786   :  { %v1579_v53 = vpop.permute.xlu2 %1578 }
0x1787   :  { %2430 = vmatmul.msk.f32.vlgmr.msra.gmra.mxu2 %vm136_vm0, %v1579_v53 }
0x1788   :  { %2185 = vmatpush.msra.mxu2 %v3598_v12  ;;  %v2446_v12 = vld [vmem:[%s3874_s1 + $0x14] sm:$0x3] }
0x178a   :  { %2186 = vmatpush.msra.mxu2 %v3604_v13  ;;  %v2450_v13 = vld [vmem:[%s3874_s1 + $0x16] sm:$0x3] }
0x178b   :  { %2451 = vmatmul.msk.f32.vlgmr.msra.gmra.mxu0 %vm203_vm1, %v2450_v13 }
0x17b4   :  { %v1921_v34 = vpop.permute.xlu1 %1920 }
0x17b5   :  { %v1923_v36 = vmul.f32 %v1921_v34, %v1904_v31 }
0x17b7   :  { %1928 = vrot.lane.b32.xlu1 %v1923_v36, %s2685_s4 }
0x180a   :  { %v3698_v26 = vpop.f32.mrf.mxu2 }
0x1829   :  { %v1929_v47 = vpop.permute.xlu1 %1928 }
0x182a   :  { %v1931_v6 = vsel %vm136_vm0, %v1925_v46, %v1929_v47 }
0x182b   :  { %2436 = vmatmul.msk.f32.vlgmr.msrb.gmra.mxu2 %vm388_vm9, %v1931_v6 }
0x1833   :  { %2447 = vmatmul.msk.f32.vlgmr.msra.gmra.mxu2 %vm203_vm1, %v2446_v12 }
0x18ae   :  { %v3700_v45 = vpop.f32.mrf.mxu2 }
0x18af   :  { %v3706_v52 = vadd.f32 %v2682_v39, %v3700_v45 }
0x18b1   :  { %v1956_v44 = vmax.f32 %v3706_v52, 0.0 }
0x18b3   :  { %2438 = vmatmul.msk.f32.vlgmr.msrb.gmra.mxu3 %vm203_vm1, %v1956_v44 }
0x18b4   :  { %2208 = vmatpush.msrb.mxu3 %v3638_v5 }
0x18b6   :  { %2209 = vmatpush.msrb.mxu3 %v3644_v33 }
0x18b8   :  { %2210 = vmatpush.msrb.mxu3 %v3650_v9 }
0x18ba   :  { %2211 = vmatpush.msrb.mxu3 %v3656_v18 }
0x18bb   :  { %2440 = vmatmul.msk.f32.vlgmr.msra.gmra.mxu3 %vm203_vm1, %v2439_v48 }
0x1936   :  { %v2012_v8 = vpop.f32.mrf.mxu3 }
0x1937   :  { %v3723_v55 = vadd.f32 %v2683_v40, %v2012_v8 }
0x1939   :  { %v2101_v7 = vadd.f32 %v2100_v17, %v3723_v55 }
0x193e   :  { %v2037_v5 = vpop.f32.mrf.mxu3 }
0x193f   :  { %v2038_v33 = vadd.f32 %v2037_v5, %v3723_v55 }
0x1941   :  { %v2040_v56 = vadd.f32 %v2038_v33, %v3272_v22 }
0x1943   :  { %2582 = vtanh.f32 %v2040_v56  ;;  %v2441_v9 = vmul.f32 -1.442695, %v2040_v56 }
0x1945   :  { %2584 = vpow2.f32 %v2441_v9 }
0x1949   :  { %v2583_v4 = vpop.eup %2582 }
0x194a   :  { %2063 = vrot.lane.b32.xlu2 %v2583_v4, %s2685_s4 }
0x194b   :  { %v2585_v18 = vpop.eup %2584 }
0x194c   :  { %v2044_v15 = vadd.f32 1.0, %v2585_v18 }
0x194e   :  { %2586 = vrcp.f32 %v2044_v15  ;;  %v2056_v28 = vand.u32 2147483648, %v2044_v15  ;;  %vm2050_vm2 = vweird.f32 %v2044_v15  ;;  %v2054_v30 = vand.u32 2147483647, %v2044_v15 }
0x1950   :  { %v2057_v11 = vor.u32 1.1754944e-38, %v2056_v28  ;;  %vm2055_vm12 = vcmp.eq.f32.partialorder %v2054_v30, 8.507059e+37 }
0x1954   :  { %v2587_v19 = vpop.eup %2586 }
0x1955   :  { %v2046_v25 = vmul.f32 %v2587_v19, %v2044_v15  ;;  %vm2051_vm11 = vweird.f32 %v2587_v19 }
0x1956   :  { %vm2052_vm4 = vmor %vm2050_vm2, %vm2051_vm11 }
0x1957   :  { %v2047_v50 = vsub.f32 1.0, %v2046_v25 }
0x1959   :  { %v2048_v3 = vmul.f32 %v2587_v19, %v2047_v50 }
0x195b   :  { %v2049_v43 = vadd.f32 %v2587_v19, %v2048_v3 }
0x195d   :  { %v2053_v22 = vsel %vm2052_vm4, %v2587_v19, %v2049_v43  ;;  %v2188_v43 = vpop.f32.mrf.mxu2 }
0x195e   :  { %v2058_v1 = vsel %vm2055_vm12, %v2057_v11, %v2053_v22  ;;  %v2189_v28 = vadd.f32 %v2188_v43, %v3723_v55 }
0x195f   :  { %v2061_v31 = vmul.f32 0.0, %v2058_v1 }
0x19a4   :  { %v2064_v62 = vpop.permute.xlu2 %2063 }
0x19a5   :  { %v2066_v35 = vmul.f32 %v2064_v62, %v2058_v1 }
0x19a7   :  { %2068 = vrot.lane.b32.xlu0 %v2066_v35, %s2686_s2 }
0x1a19   :  { %v2069_v14 = vpop.permute.xlu0 %2068 }
0x1a1a   :  { %v2071_v16 = vadd.f32 %v2069_v14, %v2061_v31 }
0x1a1c   :  { %2588 = vtanh.f32 %v2071_v16 }
0x1a22   :  { %v2589_v51 = vpop.eup %2588 }
0x1a23   :  { %2074 = vrot.lane.b32.xlu1 %v2589_v51, %s2685_s4 }
0x1a95   :  { %v2075_v41 = vpop.permute.xlu1 %2074 }
0x1a96   :  { %v2077_v29 = vmul.f32 %v2075_v41, %v2058_v1 }
0x1a98   :  { %2104 = vrot.lane.b32.xlu2 %v2077_v29, %s2686_s2 }
0x1af2   :  { %v3731_v32 = vpop.permute.xlu2 %2104 }
0x1af3   :  { %2444 = vmatmul.msk.f32.vlgmr.msra.gmra.mxu1 %vm136_vm0, %v3731_v32 }
0x1b70   :  { %v2125_v2 = vpop.f32.mrf.mxu1 }
0x1b71   :  { %v2128_v53 = vadd.f32 %v2125_v2, %v2101_v7 }
0x1b73   :  { %2590 = vtanh.f32 %v2128_v53  ;;  %v2445_v36 = vmul.f32 -1.442695, %v2128_v53 }
0x1b75   :  { %2592 = vpow2.f32 %v2445_v36 }
0x1b79   :  { %v2591_v34 = vpop.eup %2590 }
0x1b7a   :  { %2151 = vrot.lane.b32.xlu0 %v2591_v34, %s2685_s4 }
0x1b7b   :  { %v2593_v46 = vpop.eup %2592 }
0x1b7c   :  { %v2132_v47 = vadd.f32 1.0, %v2593_v46  ;;  %v2477_v46 = vld [vmem:[%s3877_s15] ss:$0 sm:$0xff]  ;;  %s2691_s15 = smov 112  }
0x1b7e   :  { %2594 = vrcp.f32 %v2132_v47  ;;  %v2144_v48 = vand.u32 2147483648, %v2132_v47  ;;  %vm2138_vm3 = vweird.f32 %v2132_v47  ;;  %v2142_v8 = vand.u32 2147483647, %v2132_v47 }
0x1b80   :  { %v2145_v5 = vor.u32 1.1754944e-38, %v2144_v48  ;;  %vm2143_vm15 = vcmp.eq.f32.partialorder %v2142_v8, 8.507059e+37 }
0x1b84   :  { %v2595_v6 = vpop.eup %2594 }
0x1b85   :  { %v2134_v38 = vmul.f32 %v2595_v6, %v2132_v47  ;;  %vm2139_vm13 = vweird.f32 %v2595_v6 }
0x1b86   :  { %vm2140_vm14 = vmor %vm2138_vm3, %vm2139_vm13 }
0x1b87   :  { %v2135_v12 = vsub.f32 1.0, %v2134_v38 }
0x1b89   :  { %v2136_v13 = vmul.f32 %v2595_v6, %v2135_v12 }
0x1b8b   :  { %v2137_v39 = vadd.f32 %v2595_v6, %v2136_v13  ;;  %v2478_v13 = vld [vmem:[%s3878_s16] ss:$0 sm:$0xff] }
0x1b8d   :  { %v2141_v40 = vsel %vm2140_vm14, %v2595_v6, %v2137_v39 }
0x1b8e   :  { %v2146_v56 = vsel %vm2143_vm15, %v2145_v5, %v2141_v40 }
0x1b8f   :  { %v2149_v9 = vmul.f32 %v2146_v56, %v2071_v16 }
0x1bec   :  { %v2152_v33 = vpop.permute.xlu0 %2151 }
0x1bed   :  { %v2154_v4 = vmul.f32 %v2152_v33, %v2146_v56 }
0x1bef   :  { %2156 = vrot.lane.b32.xlu1 %v2154_v4, %s2686_s2  ;;  %v1575_v4 = vadd.f32 %v3660_v21, %v3516_v24 }
0x1c61   :  { %v2157_v18 = vpop.permute.xlu1 %2156 }
0x1c62   :  { %v2159_v15 = vadd.f32 %v2157_v18, %v2149_v9 }
0x1c64   :  { %2596 = vtanh.f32 %v2159_v15 }
0x1c6a   :  { %v2597_v19 = vpop.eup %2596 }
0x1c6b   :  { %2162 = vrot.lane.b32.xlu2 %v2597_v19, %s2685_s4 }
0x1cc5   :  { %v2163_v25 = vpop.permute.xlu2 %2162 }
0x1cc6   :  { %v3739_v50 = vmul.f32 %v2163_v25, %v2146_v56  ;;  %v869_v25 = vadd.f32 %v3392_v23, %v3270_v20 }
0x1cc8   :  { %2192 = vrot.lane.b32.xlu0 %v3739_v50, %s2686_s2 }
0x1d3a   :  { %v2193_v3 = vpop.permute.xlu0 %2192 }
0x1d3b   :  { %2448 = vmatmul.msk.f32.vlgmr.msrb.gmra.mxu3 %vm136_vm0, %v2193_v3  ;;  %v3772_v3 = vadd.f32 %v3463_v49, %v869_v25  ;;  %v31_v49 = vstv %s3879_s17  ;;  %s2692_s17 = smov 96  }
0x1d3c   :  { %32 = vst [vmem:[#allocation3] sm:$0x1] %v31_v49 }
0x1dbe   :  { %v2213_v30 = vpop.f32.mrf.mxu3 }
0x1dbf   :  { %v2216_v22 = vadd.f32 %v2213_v30, %v2189_v28 }
0x1dc1   :  { %2598 = vtanh.f32 %v2216_v22  ;;  %v2449_v62 = vmul.f32 -1.442695, %v2216_v22 }
0x1dc3   :  { %2600 = vpow2.f32 %v2449_v62 }
0x1dc7   :  { %v2599_v11 = vpop.eup %2598 }
0x1dc8   :  { %2239 = vrot.lane.b32.xlu1 %v2599_v11, %s2685_s4 }
0x1dc9   :  { %v2601_v1 = vpop.eup %2600 }
0x1dca   :  { %v2220_v35 = vadd.f32 1.0, %v2601_v1 }
0x1dcc   :  { %2602 = vrcp.f32 %v2220_v35  ;;  %v2232_v29 = vand.u32 2147483648, %v2220_v35  ;;  %vm2226_vm6 = vweird.f32 %v2220_v35  ;;  %v2230_v17 = vand.u32 2147483647, %v2220_v35 }
0x1dce   :  { %v2233_v2 = vor.u32 1.1754944e-38, %v2232_v29  ;;  %vm2231_vm8 = vcmp.eq.f32.partialorder %v2230_v17, 8.507059e+37 }
0x1dd2   :  { %v2603_v31 = vpop.eup %2602 }
0x1dd3   :  { %v2222_v14 = vmul.f32 %v2603_v31, %v2220_v35  ;;  %vm2227_vm5 = vweird.f32 %v2603_v31 }
0x1dd4   :  { %vm2228_vm7 = vmor %vm2226_vm6, %vm2227_vm5 }
0x1dd5   :  { %v2223_v16 = vsub.f32 1.0, %v2222_v14 }
0x1dd7   :  { %v2224_v51 = vmul.f32 %v2603_v31, %v2223_v16 }
0x1dd9   :  { %v2225_v41 = vadd.f32 %v2603_v31, %v2224_v51 }
0x1ddb   :  { %v2229_v7 = vsel %vm2228_vm7, %v2603_v31, %v2225_v41 }
0x1ddc   :  { %v2234_v34 = vsel %vm2231_vm8, %v2233_v2, %v2229_v7 }
0x1ddd   :  { %v2237_v47 = vmul.f32 %v2234_v34, %v2159_v15 }
0x1e3a   :  { %v2240_v53 = vpop.permute.xlu1 %2239 }
0x1e3b   :  { %v2242_v36 = vmul.f32 %v2240_v53, %v2234_v34 }
0x1e3d   :  { %2244 = vrot.lane.b32.xlu2 %v2242_v36, %s2686_s2  ;;  %v2276_v36 = vpop.f32.mrf.mxu0 }
0x1e45   :  { %512 = vrot.lane.b32.xlu2 %v2477_v46, %s2690_s26  ;;  %v2277_v46 = vadd.f32 %v2276_v36, %v3723_v55 }
0x1e97   :  { %v2245_v6 = vpop.permute.xlu2 %2244 }
0x1e98   :  { %v3751_v38 = vadd.f32 %v2245_v6, %v2237_v47  ;;  %v3789_v47 = vld [vmem:[#allocation3] ss:$0 sm:$0xff] }
0x1e9a   :  { %2604 = vtanh.f32 %v3751_v38 }
0x1e9f   :  { %v513_v39 = vpop.permute.xlu2 %512 }
0x1ea0   :  { %v2605_v12 = vpop.eup %2604  ;;  %v515_v48 = vadd.f32 %v513_v39, %v3227_v57  ;;  %v1255_v8 = vadd.f32 %v3465_v10, %v513_v39  ;;  %v1957_v40 = vadd.f32 %v3700_v45, %v513_v39  ;;  %v1602_v57 = vadd.f32 %v3698_v26, %v1575_v4 }
0x1ea1   :  { %2250 = vrot.lane.b32.xlu0 %v2605_v12, %s2685_s4 }
0x1ea2   :  { %2606 = vtanh.f32 %v515_v48  ;;  %v2431_v28 = vmul.f32 -1.442695, %v1602_v57 }
0x1ea3   :  { %2608 = vtanh.f32 %v1255_v8 }
0x1ea4   :  { %2610 = vtanh.f32 %v1957_v40 }
0x1ea5   :  { %2612 = vtanh.f32 %v1602_v57 }
0x1ea6   :  { %2614 = vtanh.f32 %v3772_v3 }
0x1ea7   :  { %2616 = vpow2.f32 %v2431_v28 }
0x1ea8   :  { %v2607_v56 = vpop.eup %2606 }
0x1ea9   :  { %519 = vrot.lane.b32.xlu0 %v2478_v13, %s2690_s26  ;;  %v2609_v9 = vpop.eup %2608 }
0x1eaa   :  { %v2611_v18 = vpop.eup %2610 }
0x1eab   :  { %v2613_v24 = vpop.eup %2612 }
0x1eac   :  { %v2615_v21 = vpop.eup %2614 }
0x1ead   :  { %v2617_v30 = vpop.eup %2616 }
0x1eae   :  { %v1606_v23 = vadd.f32 1.0, %v2617_v30 }
0x1eb0   :  { %2618 = vrcp.f32 %v1606_v23  ;;  %v1618_v41 = vand.u32 2147483648, %v1606_v23  ;;  %vm1612_vm2 = vweird.f32 %v1606_v23  ;;  %v1616_v29 = vand.u32 2147483647, %v1606_v23 }
0x1eb2   :  { %v1619_v2 = vor.u32 1.1754944e-38, %v1618_v41  ;;  %vm1617_vm12 = vcmp.eq.f32.partialorder %v1616_v29, 8.507059e+37 }
0x1eb6   :  { %v2619_v35 = vpop.eup %2618 }
0x1eb7   :  { %v1608_v31 = vmul.f32 %v2619_v35, %v1606_v23  ;;  %vm1613_vm11 = vweird.f32 %v2619_v35 }
0x1eb8   :  { %vm1614_vm4 = vmor %vm1612_vm2, %vm1613_vm11 }
0x1eb9   :  { %v1609_v14 = vsub.f32 1.0, %v1608_v31 }
0x1ebb   :  { %v1610_v16 = vmul.f32 %v2619_v35, %v1609_v14 }
0x1ebd   :  { %v1611_v51 = vadd.f32 %v2619_v35, %v1610_v16 }
0x1ebf   :  { %v1615_v17 = vsel %vm1614_vm4, %v2619_v35, %v1611_v51 }
0x1ec0   :  { %v3784_v53 = vsel %vm1617_vm12, %v1619_v2, %v1615_v17 }
0x1f13   :  { %v2251_v5 = vpop.permute.xlu0 %2250 }
0x1f14   :  { %v3762_v33 = vmul.f32 %v2251_v5, %v2234_v34 }
0x1f16   :  { %2280 = vrot.lane.b32.xlu1 %v3762_v33, %s2686_s2 }
0x1f1b   :  { %v520_v10 = vpop.permute.xlu0 %519 }
0x1f1c   :  { %v522_v15 = vmul.f32 %v2607_v56, %v520_v10  ;;  %v1257_v45 = vmul.f32 %v2609_v9, %v520_v10  ;;  %v1959_v19 = vmul.f32 %v2611_v18, %v520_v10 }
0x1f1e   :  { %524 = vrot.lane.b32.xlu0 %v522_v15, %s2691_s15  ;;  %1961 = vrot.lane.b32.xlu2 %v1959_v19, %s2691_s15 }
0x1f1f   :  { %1259 = vrot.lane.b32.xlu1 %v1257_v45, %s2691_s15 }
0x1f26   :  { %1625 = vrot.lane.b32.xlu0 %v2613_v24, %s2685_s4 }
0x1f2e   :  { %919 = vrot.lane.b32.xlu0 %v2615_v21, %s2685_s4 }
0x1f78   :  { %v1962_v26 = vpop.permute.xlu2 %1961 }
0x1f79   :  { %v1964_v43 = vsel %vm527_vm10, %v1962_v26, 0.0 }
0x1f7a   :  { %1965 = vadd.xlane.f32.xlu2 %v1964_v43 }
0x1f88   :  { %v2281_v20 = vpop.permute.xlu1 %2280 }
0x1f89   :  { %2452 = vmatmul.msk.f32.vlgmr.msrb.gmra.mxu1 %vm136_vm0, %v2281_v20 }
0x1f90   :  { %v525_v22 = vpop.permute.xlu0 %524 }
0x1f91   :  { %v1260_v11 = vpop.permute.xlu1 %1259  ;;  %v528_v62 = vsel %vm527_vm10, %v525_v22, 0.0 }
0x1f92   :  { %v1262_v1 = vsel %vm527_vm10, %v1260_v11, 0.0 }
0x1f93   :  { %1263 = vadd.xlane.f32.xlu1 %v1262_v1 }
0x1f98   :  { %v1626_v7 = vpop.permute.xlu0 %1625 }
0x1f99   :  { %v1628_v34 = vmul.f32 %v1626_v7, %v3784_v53 }
0x1fac   :  { %1630 = vrot.lane.b32.xlu1 %v1628_v34, %s2686_s2 }
0x1fed   :  { %v1966_v56 = vpop.xlane.xlu2 %1965 }
0x1fee   :  { %v1967_v55 = vadd.f32 %v3789_v47, %v1966_v56 }
0x1ff0   :  { %v2437_v45 = vmul.f32 -1.442695, %v1967_v55 }
0x2006   :  { %v1264_v6 = vpop.xlane.xlu1 %1263  ;;  %v2301_v12 = vpop.f32.mrf.mxu1 }
0x2007   :  { %v1265_v13 = vadd.f32 %v3789_v47, %v1264_v6  ;;  %v2304_v39 = vadd.f32 %v2301_v12, %v2277_v46  ;;  %v920_v46 = vpop.permute.xlu0 %919 }
0x2009   :  { %v2415_v48 = vmul.f32 -1.442695, %v1265_v13  ;;  %2620 = vtanh.f32 %v2304_v39  ;;  %v2453_v14 = vmul.f32 -1.442695, %v2304_v39 }
0x200b   :  { %2622 = vpow2.f32 %v2415_v48 }
0x200f   :  { %v2621_v8 = vpop.eup %2620 }
0x2010   :  { %2327 = vrot.lane.b32.xlu0 %v2621_v8, %s2685_s4 }
0x2011   :  { %v2623_v40 = vpop.eup %2622 }
0x2012   :  { %v1269_v5 = vadd.f32 1.0, %v2623_v40 }
0x2014   :  { %2624 = vrcp.f32 %v1269_v5  ;;  %v1281_v57 = vand.u32 2147483648, %v1269_v5  ;;  %v1279_v15 = vand.u32 2147483647, %v1269_v5  ;;  %vm1275_vm3 = vweird.f32 %v1269_v5 }
0x2015   :  { %2626 = vpow2.f32 %v2437_v45 }
0x2016   :  { %v1282_v25 = vor.u32 1.1754944e-38, %v1281_v57  ;;  %vm1280_vm15 = vcmp.eq.f32.partialorder %v1279_v15, 8.507059e+37 }
0x201a   :  { %v2625_v4 = vpop.eup %2624 }
0x201b   :  { %v1271_v9 = vmul.f32 %v2625_v4, %v1269_v5  ;;  %vm1276_vm13 = vweird.f32 %v2625_v4  ;;  %v2627_v26 = vpop.eup %2626 }
0x201c   :  { %vm1277_vm14 = vmor %vm1275_vm3, %vm1276_vm13  ;;  %v1971_v43 = vadd.f32 1.0, %v2627_v26 }
0x201d   :  { %v1272_v18 = vsub.f32 1.0, %v1271_v9 }
0x201e   :  { %2628 = vrcp.f32 %v1971_v43  ;;  %v1983_v22 = vand.u32 2147483648, %v1971_v43  ;;  %vm1977_vm6 = vweird.f32 %v1971_v43  ;;  %v1981_v11 = vand.u32 2147483647, %v1971_v43 }
0x201f   :  { %v1273_v10 = vmul.f32 %v2625_v4, %v1272_v18  ;;  %2630 = vpow2.f32 %v2453_v14  ;;  %v1631_v18 = vpop.permute.xlu1 %1630 }
0x2020   :  { %v1984_v35 = vor.u32 1.1754944e-38, %v1983_v22  ;;  %vm1982_vm8 = vcmp.eq.f32.partialorder %v1981_v11, 8.507059e+37 }
0x2021   :  { %v1274_v19 = vadd.f32 %v2625_v4, %v1273_v10  ;;  %v1623_v10 = vmul.f32 %v3784_v53, %v3669_v61 }
0x2023   :  { %v1278_v24 = vsel %vm1277_vm14, %v2625_v4, %v1274_v19  ;;  %v1633_v45 = vadd.f32 %v1631_v18, %v1623_v10 }
0x2024   :  { %v1283_v21 = vsel %vm1280_vm15, %v1282_v25, %v1278_v24  ;;  %v2629_v28 = vpop.eup %2628 }
0x2025   :  { %1286 = vrot.lane.b32.xlu1 %v1283_v21, %s2690_s26  ;;  %v1973_v30 = vmul.f32 %v2629_v28, %v1971_v43  ;;  %vm1978_vm5 = vweird.f32 %v2629_v28 }
0x2026   :  { %vm1979_vm7 = vmor %vm1977_vm6, %vm1978_vm5 }
0x2027   :  { %v1974_v20 = vsub.f32 1.0, %v1973_v30 }
0x2029   :  { %v1975_v23 = vmul.f32 %v2629_v28, %v1974_v20 }
0x202b   :  { %v1976_v49 = vadd.f32 %v2629_v28, %v1975_v23 }
0x202d   :  { %1641 = vrot.lane.b32.xlu1 %v3612_v27, %s2685_s4  ;;  %v1980_v1 = vsel %vm1979_vm7, %v2629_v28, %v1976_v49  ;;  %v2409_v27 = vmul.f32 -1.442695, %v3772_v3 }
0x202e   :  { %v1985_v31 = vsel %vm1982_vm8, %v1984_v35, %v1980_v1  ;;  %vm943_vm8 = vcmask 785408  }
0x202f   :  { %2632 = vpow2.f32 %v2409_v27 }
0x203a   :  { %529 = vadd.xlane.f32.xlu0 %v528_v62  ;;  %v2631_v62 = vpop.eup %2630 }
0x203b   :  { %v2308_v16 = vadd.f32 1.0, %v2631_v62  ;;  %v2633_v51 = vpop.eup %2632 }
0x203c   :  { %v900_v41 = vadd.f32 1.0, %v2633_v51 }
0x203d   :  { %2634 = vrcp.f32 %v2308_v16  ;;  %vm2314_vm11 = vweird.f32 %v2308_v16  ;;  %v2318_v3 = vand.u32 2147483647, %v2308_v16 }
0x203e   :  { %2636 = vrcp.f32 %v900_v41  ;;  %v912_v4 = vand.u32 2147483648, %v900_v41  ;;  %vm906_vm13 = vweird.f32 %v900_v41  ;;  %v910_v9 = vand.u32 2147483647, %v900_v41 }
0x203f   :  { %vm2319_vm4 = vcmp.eq.f32.partialorder %v2318_v3, 8.507059e+37  ;;  %2638 = vtanh.f32 %v1633_v45 }
0x2040   :  { %v913_v57 = vor.u32 1.1754944e-38, %v912_v4  ;;  %vm911_vm14 = vcmp.eq.f32.partialorder %v910_v9, 8.507059e+37 }
0x2043   :  { %v2635_v29 = vpop.eup %2634 }
0x2044   :  { %v2310_v17 = vmul.f32 %v2635_v29, %v2308_v16  ;;  %v2637_v2 = vpop.eup %2636  ;;  %vm2315_vm10 = vweird.f32 %v2635_v29 }
0x2045   :  { %v902_v34 = vmul.f32 %v2637_v2, %v900_v41  ;;  %vm2316_vm2 = vmor %vm2314_vm11, %vm2315_vm10  ;;  %vm907_vm12 = vweird.f32 %v2637_v2  ;;  %v2639_v25 = vpop.eup %2638  ;;  %vm2371_vm10 = vcmask 1041408   ;;  %vm2373_vm11 = vcmask 1043456  }
0x2046   :  { %v2311_v7 = vsub.f32 1.0, %v2310_v17  ;;  %vm908_vm3 = vmor %vm906_vm13, %vm907_vm12 }
0x2047   :  { %v903_v6 = vsub.f32 1.0, %v902_v34 }
0x2048   :  { %v2312_v36 = vmul.f32 %v2635_v29, %v2311_v7 }
0x2049   :  { %v904_v13 = vmul.f32 %v2637_v2, %v903_v6 }
0x204a   :  { %v2313_v12 = vadd.f32 %v2635_v29, %v2312_v36 }
0x204b   :  { %v905_v5 = vadd.f32 %v2637_v2, %v904_v13 }
0x204c   :  { %v2317_v39 = vsel %vm2316_vm2, %v2635_v29, %v2313_v12  ;;  %vm2360_vm2 = vcmask 138240  }
0x204d   :  { %v909_v55 = vsel %vm908_vm3, %v2637_v2, %v905_v5 }
0x204e   :  { %1988 = vrot.lane.b32.xlu0 %v1985_v31, %s2690_s26  ;;  %v3807_v15 = vsel %vm911_vm14, %v913_v57, %v909_v55 }
0x204f   :  { %v922_v19 = vmul.f32 %v920_v46, %v3807_v15  ;;  %v917_v1 = vmul.f32 %v3807_v15, %v3397_v42 }
0x2056   :  { %935 = vrot.lane.b32.xlu0 %v3368_v60, %s2685_s4  ;;  %v2320_v60 = vand.u32 2147483648, %v2308_v16 }
0x2058   :  { %v2321_v48 = vor.u32 1.1754944e-38, %v2320_v60 }
0x205a   :  { %v3801_v8 = vsel %vm2319_vm4, %v2321_v48, %v2317_v39 }
0x205b   :  { %v2325_v27 = vmul.f32 %v3801_v8, %v3751_v38 }
0x2082   :  { %v2328_v40 = vpop.permute.xlu0 %2327 }
0x2083   :  { %v2330_v56 = vmul.f32 %v2328_v40, %v3801_v8 }
0x2085   :  { %2332 = vrot.lane.b32.xlu2 %v2330_v56, %s2686_s2  ;;  %v3906_v56 = vld [vmem:[#allocation4_spill] sm:$0xff] }
0x2086   :  { %v3907_v4 = vmax.f32 %v3906_v56, 0.0 }
0x208d   :  { %924 = vrot.lane.b32.xlu2 %v922_v19, %s2686_s2  ;;  %s2693_s2 = smov 17  }
0x2095   :  { %1636 = vrot.lane.b32.xlu2 %v2639_v25, %s2685_s4 }
0x2097   :  { %v1287_v26 = vpop.permute.xlu1 %1286 }
0x2098   :  { %v1289_v43 = vsel %vm203_vm1, %v1254_v59, %v1287_v26 }
0x209d   :  { %1644 = vrot.lane.b32.xlu2 %v3674_v63, %s2692_s17 }
0x209f   :  { %v1642_v29 = vpop.permute.xlu1 %1641 }
0x20a5   :  { %2343 = vrot.lane.b32.xlu2 %v3739_v50, %s2685_s4 }
0x20ad   :  { %v530_v61 = vpop.xlane.xlu0 %529  ;;  %2346 = vrot.lane.b32.xlu2 %v3762_v33, %s2692_s17 }
0x20ae   :  { %v534_v24 = vadd.f32 %v3789_v47, %v530_v61 }
0x20b0   :  { %v2394_v21 = vmul.f32 -1.442695, %v534_v24 }
0x20b2   :  { %2640 = vpow2.f32 %v2394_v21 }
0x20b5   :  { %2353 = vrot.lane.b32.xlu2 %v1289_v43, %s2693_s2 }
0x20b8   :  { %v2641_v28 = vpop.eup %2640 }
0x20b9   :  { %v538_v63 = vadd.f32 1.0, %v2641_v28 }
0x20bb   :  { %2642 = vrcp.f32 %v538_v63  ;;  %v550_v23 = vand.u32 2147483648, %v538_v63  ;;  %v548_v33 = vand.u32 2147483647, %v538_v63  ;;  %vm544_vm5 = vweird.f32 %v538_v63 }
0x20bd   :  { %v551_v22 = vor.u32 1.1754944e-38, %v550_v23  ;;  %vm549_vm7 = vcmp.eq.f32.partialorder %v548_v33, 8.507059e+37 }
0x20c0   :  { %v1989_v51 = vpop.permute.xlu0 %1988 }
0x20c1   :  { %v2643_v30 = vpop.eup %2642  ;;  %v1991_v42 = vsel %vm203_vm1, %v1956_v44, %v1989_v51 }
0x20c2   :  { %v540_v50 = vmul.f32 %v2643_v30, %v538_v63  ;;  %vm545_vm15 = vweird.f32 %v2643_v30 }
0x20c3   :  { %vm546_vm6 = vmor %vm544_vm5, %vm545_vm15 }
0x20c4   :  { %v541_v20 = vsub.f32 1.0, %v540_v50 }
0x20c6   :  { %v542_v49 = vmul.f32 %v2643_v30, %v541_v20 }
0x20c8   :  { %v543_v47 = vadd.f32 %v2643_v30, %v542_v49  ;;  %v936_v34 = vpop.permute.xlu0 %935 }
0x20c9   :  { %v941_v52 = vsel %vm136_vm0, %v3308_v54, %v936_v34 }
0x20ca   :  { %v547_v11 = vsel %vm546_vm6, %v2643_v30, %v543_v47 }
0x20cb   :  { %v552_v0 = vsel %vm549_vm7, %v551_v22, %v547_v11 }
0x20cc   :  { %555 = vrot.lane.b32.xlu0 %v552_v0, %s2690_s26 }
0x20df   :  { %v2333_v59 = vpop.permute.xlu2 %2332 }
0x20e0   :  { %v2335_v62 = vadd.f32 %v2333_v59, %v2325_v27 }
0x20e7   :  { %v925_v35 = vpop.permute.xlu2 %924 }
0x20e8   :  { %v927_v31 = vadd.f32 %v925_v35, %v917_v1 }
0x20ea   :  { %2644 = vtanh.f32 %v927_v31 }
0x20eb   :  { %2646 = vtanh.f32 %v2335_v62 }
0x20ef   :  { %v1637_v41 = vpop.permute.xlu2 %1636 }
0x20f0   :  { %v2645_v14 = vpop.eup %2644  ;;  %v1639_v44 = vmul.f32 %v1637_v41, %v3784_v53 }
0x20f1   :  { %930 = vrot.lane.b32.xlu1 %v2645_v14, %s2685_s4  ;;  %v2647_v16 = vpop.eup %2646 }
0x20f7   :  { %v1645_v17 = vpop.permute.xlu2 %1644 }
0x20f9   :  { %938 = vrot.lane.b32.xlu1 %v3402_v58, %s2692_s17  ;;  %v1647_v58 = vsel %vm136_vm0, %v3546_v37, %v1642_v29 }
0x20fa   :  { %v1648_v36 = vsel %vm388_vm9, %v1647_v58, %v1645_v17 }
0x20fb   :  { %v1649_v12 = vsel %vm943_vm8, %v1648_v36, %v1639_v44 }
0x20fc   :  { %v2369_v40 = vrot.slane %v1649_v12, 6 }
0x20ff   :  { %v2344_v38 = vpop.permute.xlu2 %2343 }
0x2100   :  { %v2349_v13 = vsel %vm136_vm0, %v3731_v32, %v2344_v38  ;;  %vm2362_vm0 = vcmask 277504  }
0x2101   :  { %2338 = vrot.lane.b32.xlu1 %v2647_v16, %s2685_s4 }
0x2107   :  { %v2347_v46 = vpop.permute.xlu2 %2346 }
0x2108   :  { %v2350_v39 = vsel %vm388_vm9, %v2349_v13, %v2347_v46 }
0x2109   :  { %2357 = vrot.lane.b32.xlu1 %v1991_v42, %s2694_s10 }
0x213e   :  { %v556_v48 = vpop.permute.xlu0 %555 }
0x213f   :  { %v558_v9 = vsel %vm203_vm1, %v3907_v4, %v556_v48 }
0x2163   :  { %v931_v7 = vpop.permute.xlu1 %930 }
0x2164   :  { %v933_v60 = vmul.f32 %v931_v7, %v3807_v15 }
0x216b   :  { %v939_v2 = vpop.permute.xlu1 %938 }
0x216c   :  { %v942_v6 = vsel %vm388_vm9, %v941_v52, %v939_v2  ;;  %vm2364_vm9 = vcmask 410624  }
0x216d   :  { %v944_v54 = vsel %vm943_vm8, %v942_v6, %v933_v60 }
0x216e   :  { %v2372_v55 = vsel %vm2371_vm10, %v944_v54, %v2369_v40 }
0x2173   :  { %v2339_v3 = vpop.permute.xlu1 %2338 }
0x2174   :  { %v2341_v37 = vmul.f32 %v2339_v3, %v3801_v8  ;;  %v2354_v8 = vpop.permute.xlu2 %2353 }
0x2175   :  { %v2361_v57 = vsel %vm2360_vm2, %v558_v9, %v2354_v8 }
0x2176   :  { %v2351_v53 = vsel %vm943_vm8, %v2350_v39, %v2341_v37 }
0x2177   :  { %v2370_v5 = vrot.slane %v2351_v53, 4 }
0x2179   :  { %v2374_v32 = vsel %vm2373_vm11, %v2372_v55, %v2370_v5 }
0x217a   :  { %2376 = vst [vmem:[%s3880_s23] sm:$0x3f] %v2374_v32 }
0x217b   :  { %v2358_v18 = vpop.permute.xlu1 %2357 }
0x217c   :  { %v2363_v10 = vsel %vm2362_vm0, %v2361_v57, %v2358_v18 }
0x217d   :  { %2365 = vst.msk [vmem:[%s3881_s22] sm:$0x3] %vm2364_vm9, %v2363_v10 }

</bundles_post_ra>
